<compile_context>
chip_gen: v7x
topology: tpu7x:2x2x1
jax: 0.10.0
libtpu: 0.0.40
codegen_flags: <defaults>
</compile_context>

<pallas_src>
import jax
import jax.numpy as jnp
from jax.experimental import pallas as pl
from jax.experimental.pallas import tpu as pltpu

_EPS = 1e-5


def _vmem_limit_bytes():
    # ~3/4 of physical VMEM, capped at 100 MiB (v5e/v6e: 96 MiB, v7x: 48 MiB).
    try:
        cap = pltpu.get_tpu_info().vmem_capacity_bytes
        return int(min(cap * 3 // 4, 100 * 1024 * 1024))
    except Exception:
        return 48 * 1024 * 1024


def _pick_row_tile(H, W, Ch, Cz, budget_bytes):
    """Largest row tile TH (divisor of H) whose per-step footprint fits the budget."""
    ws = W + 2
    for th in (64, 32, 16, 8):
        if H % th:
            continue
        est = 4 * (2 * 2 * Ch * th * W          # h_in + out tiles, double buffered
                   + 2 * Ch * th * ws           # conv1/conv2 accumulators
                   + 2 * Cz * (th + 2) * ws     # x + xpad scratch
                   + 2 * 3 * (th + 5) * ws)     # z tile, double buffered
        if est <= budget_bytes:
            return th
    return H if H % 8 else 8


# ----------------------------------------------------------------------------
# kernel 1: BatchNorm batch statistics
#   grid = (split, N): split halves of H on a "parallel" axis (v7x megacore),
#   batch axis is the "arbitrary" reduction accumulated into a resident block.
# ----------------------------------------------------------------------------
def bn_stats_kernel(x_ref, stats_ref):
    """x_ref: (1, Ch, Hh, W).  stats_ref: (1, Ch, 2): col 0 = sum, col 1 = sum(x*x)."""
    @pl.when(pl.program_id(1) == 0)
    def _init():
        stats_ref[...] = jnp.zeros_like(stats_ref)

    x = x_ref[0]                                                      # (Ch, Hh, W)
    s = jnp.sum(jnp.sum(x, axis=2), axis=1, keepdims=True)            # (Ch, 1)
    ss = jnp.sum(jnp.sum(x * x, axis=2), axis=1, keepdims=True)       # (Ch, 1)
    stats_ref[0] = stats_ref[0] + jnp.concatenate([s, ss], axis=1)


# ----------------------------------------------------------------------------
# kernel 2: fused  mlp_shared -> conv1 & conv2 -> folded-BN normalize -> blend
#   One (batch, row-tile) block per grid step.
#   "wide" layout: a padded image row occupies Ws = W+2 consecutive lanes; valid
#   output columns are [0, W), the last 2 columns are garbage and are cropped /
#   masked before they can influence anything.
# ----------------------------------------------------------------------------
def spade_kernel(z_ref, hin_ref, mask_ref, w0_ref, b0_ref, w1_ref, w2_ref,
                 b1_ref, b2_ref, scale_ref, shift_ref, o_ref, xpad_ref):
    """
    z_ref    : (1, 1, 3, (TH+5)*Ws)  z_att tile (pre-padded, with row halo), flat
    hin_ref  : (1, Ch, TH, W)        h_in tile (no halo needed: pointwise use)
    mask_ref : (1, (TH+2)*Ws)        1.0 on valid columns, 0.0 on the 2 garbage cols
    w0_ref   : (9, Cz, 3)            mlp_shared weights, per-tap (Cout, Cin)
    w1_ref   : (9, Ch, Cz)           conv1 weights, per-tap
    w2_ref   : (9, Ch, Cz)           conv2 weights, per-tap
    b0/b1/b2 : (C, 1)                biases (sublane broadcast)
    scale/shift : (Ch, 1)            folded BN:  scale = g/sqrt(var+eps),
                                                 shift = beta - mean*scale
    o_ref    : (1, Ch, TH, W)
    xpad_ref : VMEM (Cz, 128 + (TH+2)*Ws + 8)  zero-haloed wide scratch for x
    """
    _, Ch, TH, W = o_ref.shape
    Cz = xpad_ref.shape[0]
    Ws = W + 2                      # wide row stride
    Lx = (TH + 2) * Ws              # padded-x rows computed per tile (incl. row halos)
    Lo = TH * Ws                    # output rows per tile, wide layout
    B = 128                         # lane-aligned start of the interior xpad store
    tile = pl.program_id(1)

    # ---- stage 1: x = ReLU(mlp_shared(z)) for padded-x rows [tile*TH, tile*TH+TH+2) --
    # 9 accumulated matmuls on lane-shifted views of the z tile (no im2col buffer).
    zt = z_ref[0, 0]                                                  # (3, Lz)
    acc = jnp.zeros((Cz, Lx), jnp.float32)
    for t in range(9):
        dy, dx = divmod(t, 3)
        off = dy * Ws + dx
        acc = acc + jnp.dot(w0_ref[t], zt[:, off:off + Lx],
                            preferred_element_type=jnp.float32)
    x = jnp.maximum(acc + b0_ref[...], 0.0) * mask_ref[...]           # garbage cols -> 0

    # ---- write x into the zero-haloed wide scratch (interior store lane-aligned) ----
    # Every lane that stage 2 reads is (re)written below, so no cross-step persistence
    # is required (safe under dimension_semantics=("parallel","parallel") / megacore).
    xpad_ref[:, pl.ds(0, B)] = jnp.zeros((Cz, B), jnp.float32)        # left ring (col 0)
    xpad_ref[:, pl.ds(B, Lx)] = x                                     # interior, aligned
    xpad_ref[:, pl.ds(B + Lx, 8)] = jnp.zeros((Cz, 8), jnp.float32)   # tail ring

    @pl.when(tile == 0)                        # padded-x row 0 is conv zero-padding
    def _():
        xpad_ref[:, pl.ds(B - 1, Ws)] = jnp.zeros((Cz, Ws), jnp.float32)

    @pl.when(tile == pl.num_programs(1) - 1)   # padded-x row H+1 is conv zero-padding
    def _():
        xpad_ref[:, pl.ds(B - 1 + (TH + 1) * Ws, Ws)] = jnp.zeros((Cz, Ws), jnp.float32)

    # ---- stage 2: conv1 / conv2 as 9 accumulated matmuls sharing each shifted tap ----
    racc = jnp.zeros((Ch, Lo), jnp.float32)
    bacc = jnp.zeros((Ch, Lo), jnp.float32)
    for t in range(9):
        dy, dx = divmod(t, 3)
        tap = xpad_ref[:, pl.ds(B - 1 + dy * Ws + dx, Lo)]            # (Cz, Lo)
        racc = racc + jnp.dot(w1_ref[t], tap, preferred_element_type=jnp.float32)
        bacc = bacc + jnp.dot(w2_ref[t], tap, preferred_element_type=jnp.float32)
    r_att = (racc + b1_ref[...]).reshape(Ch, TH, Ws)[:, :, :W]        # crop garbage cols
    beta_att = (bacc + b2_ref[...]).reshape(Ch, TH, Ws)[:, :, :W]

    # ---- stage 3: folded-BN normalize + SPADE blend (never round-trips HBM) --------
    h_bar = hin_ref[0] * scale_ref[...][:, :, None] + shift_ref[...][:, :, None]
    o_ref[0] = r_att * h_bar + beta_att


# ----------------------------------------------------------------------------
# wrapper (NCHW in / NCHW out, no layout transposes)
# ----------------------------------------------------------------------------
def spade_forward(params, h_in, z_att):
    h_in = h_in.astype(jnp.float32)       # keep f32 to match PyTorch numerics;
    z_att = z_att.astype(jnp.float32)     # bf16 inputs/MXU operands are an optional lever.
    N, Ch, H, W = h_in.shape
    Cz = params["b0"].shape[0]
    vmem_limit = _vmem_limit_bytes()

    # ---- pass 1: BN batch statistics (split over H halves for v7x megacore) --------
    split = 2 if H % 16 == 0 else 1
    Hh = H // split
    stats = pl.pallas_call(
        bn_stats_kernel,
        grid=(split, N),
        in_specs=[pl.BlockSpec((1, Ch, Hh, W), lambda p, n: (n, 0, p, 0))],
        out_specs=pl.BlockSpec((1, Ch, 2), lambda p, n: (p, 0, 0)),
        out_shape=jax.ShapeDtypeStruct((split, Ch, 2), jnp.float32),
        compiler_params=pltpu.CompilerParams(
            dimension_semantics=("parallel", "arbitrary"),
            vmem_limit_bytes=vmem_limit),
    )(h_in)
    tot = jnp.sum(stats, axis=0)                                      # (Ch, 2)
    cnt = jnp.float32(N * H * W)
    mean = tot[:, 0] / cnt
    var = jnp.maximum(tot[:, 1] / cnt - mean * mean, 0.0)             # biased (train-mode)
    inv = jax.lax.rsqrt(var + _EPS)
    scale = (params["bn_gamma"] * inv).reshape(Ch, 1)
    shift = (params["bn_beta"] - params["bn_gamma"] * mean * inv).reshape(Ch, 1)

    # ---- tiling / layout prep (cheap: z_att is 3 channels, weights are KB-scale) ----
    TH = _pick_row_tile(H, W, Ch, Cz, budget_bytes=int(vmem_limit * 0.8))
    T = H // TH
    Ws = W + 2
    Lx = (TH + 2) * Ws
    Lz = (TH + 5) * Ws

    # z padded by (2 top, 3 bottom, 1 left, 1 right) -> per-tile halo'd flat slabs.
    zp = jnp.pad(z_att, ((0, 0), (0, 0), (2, 3), (1, 1)))             # (N, 3, H+5, Ws)
    z_tiles = jnp.stack([zp[:, :, i * TH:i * TH + TH + 5, :] for i in range(T)],
                        axis=1).reshape(N, T, 3, Lz)

    colmask = ((jnp.arange(Lx) % Ws) < W).astype(jnp.float32).reshape(1, Lx)

    # per-tap weights (tap, Cout, Cin) from HWIO layout
    w0k = jnp.transpose(params["w0"], (0, 1, 3, 2)).reshape(9, Cz, 3)
    w1k = jnp.transpose(params["w1"], (0, 1, 3, 2)).reshape(9, Ch, Cz)
    w2k = jnp.transpose(params["w2"], (0, 1, 3, 2)).reshape(9, Ch, Cz)
    b0 = params["b0"].reshape(Cz, 1)
    b1 = params["b1"].reshape(Ch, 1)
    b2 = params["b2"].reshape(Ch, 1)

    const2 = lambda n, i: (0, 0)
    const3 = lambda n, i: (0, 0, 0)

    # ---- pass 2: fused conv / normalize / blend over a (batch, row-tile) grid -------
    out = pl.pallas_call(
        spade_kernel,
        grid=(N, T),
        in_specs=[
            pl.BlockSpec((1, 1, 3, Lz), lambda n, i: (n, i, 0, 0)),
            pl.BlockSpec((1, Ch, TH, W), lambda n, i: (n, 0, i, 0)),
            pl.BlockSpec((1, Lx), const2),
            pl.BlockSpec((9, Cz, 3), const3),
            pl.BlockSpec((Cz, 1), const2),
            pl.BlockSpec((9, Ch, Cz), const3),
            pl.BlockSpec((9, Ch, Cz), const3),
            pl.BlockSpec((Ch, 1), const2),
            pl.BlockSpec((Ch, 1), const2),
            pl.BlockSpec((Ch, 1), const2),
            pl.BlockSpec((Ch, 1), const2),
        ],
        out_specs=pl.BlockSpec((1, Ch, TH, W), lambda n, i: (n, 0, i, 0)),
        out_shape=jax.ShapeDtypeStruct((N, Ch, H, W), jnp.float32),
        scratch_shapes=[pltpu.VMEM((Cz, 128 + Lx + 8), jnp.float32)],
        compiler_params=pltpu.CompilerParams(
            dimension_semantics=("parallel", "parallel"),
            vmem_limit_bytes=vmem_limit),
    )(z_tiles, h_in, colmask, w0k, b0, w1k, w2k, b1, b2, scale, shift)
    return out


# ----------------------------------------------------------------------------
# parameters + pure-JAX reference (for the correctness check in __main__)
# ----------------------------------------------------------------------------
def make_params(key, h_inchannel, z_inchannel):
    ks = jax.random.split(key, 6)
    s = 0.1

    def conv_w(k, cin, cout):
        # PyTorch layout (Cout, Cin, 3, 3) -> HWIO (3, 3, Cin, Cout)
        w = jax.random.normal(k, (cout, cin, 3, 3), jnp.float32) * s
        return jnp.transpose(w, (2, 3, 1, 0))

    return {
        "bn_gamma": jnp.ones((h_inchannel,), jnp.float32),
        "bn_beta": jnp.zeros((h_inchannel,), jnp.float32),
        "w0": conv_w(ks[0], 3, z_inchannel),
        "b0": jax.random.normal(ks[1], (z_inchannel,), jnp.float32) * s,
        "w1": conv_w(ks[2], z_inchannel, h_inchannel),
        "b1": jax.random.normal(ks[3], (h_inchannel,), jnp.float32) * s,
        "w2": conv_w(ks[4], z_inchannel, h_inchannel),
        "b2": jax.random.normal(ks[5], (h_inchannel,), jnp.float32) * s,
    }


def spade_reference(params, h_in_nchw, z_att_nchw):
    x = h_in_nchw
    mean = jnp.mean(x, axis=(0, 2, 3), keepdims=True)
    var = jnp.mean((x - mean) ** 2, axis=(0, 2, 3), keepdims=True)
    gamma = params["bn_gamma"].reshape(1, -1, 1, 1)
    beta = params["bn_beta"].reshape(1, -1, 1, 1)
    h_bar = (x - mean) * jax.lax.rsqrt(var + _EPS) * gamma + beta

    def conv(inp, w_hwio, b):
        y = jax.lax.conv_general_dilated(
            inp, w_hwio, window_strides=(1, 1), padding="SAME",
            dimension_numbers=("NCHW", "HWIO", "NCHW"))
        return y + b.reshape(1, -1, 1, 1)

    xs = jax.nn.relu(conv(z_att_nchw, params["w0"], params["b0"]))
    r_att = conv(xs, params["w1"], params["b1"])
    b_att = conv(xs, params["w2"], params["b2"])
    return r_att * h_bar + b_att


if __name__ == "__main__":
    # small shapes consistent with the module (mlp_shared expects a 3-channel z_att);
    # H=48 exercises first / middle / last row tiles and the split stats pass.
    N, H, W = 2, 48, 16
    h_inchannel, z_inchannel = 8, 4

    key = jax.random.PRNGKey(0)
    k1, k2, kp = jax.random.split(key, 3)

    h_in = jax.random.normal(k1, (N, h_inchannel, H, W), jnp.float32)   # NCHW
    z_att = jax.random.normal(k2, (N, 3, H, W), jnp.float32)            # NCHW, 3 channels

    params = make_params(kp, h_inchannel, z_inchannel)

    h_out = jax.jit(spade_forward)(params, h_in, z_att)
    jax.block_until_ready(h_out)
    assert h_out.shape == (N, h_inchannel, H, W)

    ref = spade_reference(params, h_in, z_att)
    err = float(jnp.max(jnp.abs(h_out - ref)))
    assert err < 1e-3, f"max abs err vs reference: {err}"
    print("KERNEL_OK")
</pallas_src>

<mosaic_0001>
module attributes {stable_mosaic.version = 11 : i64} {
  func.func @bn_stats_kernel(%arg0: i32, %arg1: i32, %arg2: memref<1x8x24x16xf32, #tpu.memory_space<vmem>>, %arg3: memref<1x8x2xf32, #tpu.memory_space<vmem>>) attributes {dimension_semantics = [#tpu.dimension_semantics<parallel>, #tpu.dimension_semantics<arbitrary>], iteration_bounds = array<i64: 2, 2>, scalar_prefetch = 0 : i64, scratch_operands = 0 : i64, tpu.core_type = #tpu.core_type<tc>, window_params = [{transform_indices = @transform_0, window_bounds = array<i64: 1, 8, 24, 16>}, {transform_indices = @transform_1, window_bounds = array<i64: 1, 8, 2>}]} {
    %c0_i32 = arith.constant 0 : i32
    %0 = arith.cmpi eq, %arg1, %c0_i32 : i32
    %1 = arith.extui %0 : i1 to i32
    %c0_i32_0 = arith.constant 0 : i32
    %2 = arith.cmpi ne, %1, %c0_i32_0 : i32
    scf.if %2 {
      %cst_13 = arith.constant 0.000000e+00 : f32
      %19 = vector.broadcast %cst_13 : f32 to vector<1x8x2xf32>
      %c0_14 = arith.constant 0 : index
      %c0_15 = arith.constant 0 : index
      %c0_16 = arith.constant 0 : index
      %20 = vector.load %arg3[%c0_14, %c0_15, %c0_16] : memref<1x8x2xf32, #tpu.memory_space<vmem>>, vector<1x8x2xf32>
      tpu.vector_store %arg3[%c0_14, %c0_15, %c0_16], %19 {strides = array<i32>} : memref<1x8x2xf32, #tpu.memory_space<vmem>>, vector<1x8x2xf32>,
    } else {
    }
    %c0 = arith.constant 0 : index
    %c0_1 = arith.constant 0 : index
    %c0_2 = arith.constant 0 : index
    %c0_3 = arith.constant 0 : index
    %3 = vector.load %arg2[%c0, %c0_1, %c0_2, %c0_3] : memref<1x8x24x16xf32, #tpu.memory_space<vmem>>, vector<1x8x24x16xf32>
    %4 = vector.shape_cast %3 : vector<1x8x24x16xf32> to vector<8x24x16xf32>
    %cst = arith.constant dense<0.000000e+00> : vector<8x24xf32>
    %5 = vector.multi_reduction <add>, %4, %cst [2] : vector<8x24x16xf32> to vector<8x24xf32>
    %cst_4 = arith.constant dense<0.000000e+00> : vector<8xf32>
    %6 = vector.multi_reduction <add>, %5, %cst_4 [1] : vector<8x24xf32> to vector<8xf32>
    %7 = vector.shape_cast %6 : vector<8xf32> to vector<8x1xf32>
    %8 = arith.mulf %4, %4 : vector<8x24x16xf32>
    %cst_5 = arith.constant dense<0.000000e+00> : vector<8x24xf32>
    %9 = vector.multi_reduction <add>, %8, %cst_5 [2] : vector<8x24x16xf32> to vector<8x24xf32>
    %cst_6 = arith.constant dense<0.000000e+00> : vector<8xf32>
    %10 = vector.multi_reduction <add>, %9, %cst_6 [1] : vector<8x24xf32> to vector<8xf32>
    %11 = vector.shape_cast %10 : vector<8xf32> to vector<8x1xf32>
    %c0_7 = arith.constant 0 : index
    %c0_8 = arith.constant 0 : index
    %c0_9 = arith.constant 0 : index
    %12 = vector.load %arg3[%c0_7, %c0_8, %c0_9] : memref<1x8x2xf32, #tpu.memory_space<vmem>>, vector<1x8x2xf32>
    %13 = vector.shape_cast %12 : vector<1x8x2xf32> to vector<8x2xf32>
    %14 = tpu.concatenate %7, %11 in 1 : vector<8x1xf32>, vector<8x1xf32> -> vector<8x2xf32>
    %15 = arith.addf %13, %14 : vector<8x2xf32>
    %c0_10 = arith.constant 0 : index
    %c0_11 = arith.constant 0 : index
    %c0_12 = arith.constant 0 : index
    %16 = vector.load %arg3[%c0_10, %c0_11, %c0_12] : memref<1x8x2xf32, #tpu.memory_space<vmem>>, vector<1x8x2xf32>
    %17 = vector.shape_cast %16 : vector<1x8x2xf32> to vector<8x2xf32>
    %18 = vector.shape_cast %15 : vector<8x2xf32> to vector<1x8x2xf32>
    tpu.vector_store %arg3[%c0_10, %c0_11, %c0_12], %18 {strides = array<i32>} : memref<1x8x2xf32, #tpu.memory_space<vmem>>, vector<1x8x2xf32>,
    return
  }
  func.func @transform_0(%arg0: i32, %arg1: i32) -> (i32, i32, i32, i32) {
    %c0_i32 = arith.constant 0 : i32
    %c0_i32_0 = arith.constant 0 : i32
    %c0_i32_1 = arith.constant 0 : i32
    return %arg1, %c0_i32, %arg0, %c0_i32_0 : i32, i32, i32, i32
  }
  func.func @transform_1(%arg0: i32, %arg1: i32) -> (i32, i32, i32) {
    %c0_i32 = arith.constant 0 : i32
    %c0_i32_0 = arith.constant 0 : i32
    %c0_i32_1 = arith.constant 0 : i32
    return %arg0, %c0_i32, %c0_i32_0 : i32, i32, i32
  }
}

module attributes {stable_mosaic.version = 11 : i64} {
  func.func @spade_kernel(%arg0: i32, %arg1: i32, %arg2: memref<1x1x3x378xf32, #tpu.memory_space<vmem>>, %arg3: memref<1x8x16x16xf32, #tpu.memory_space<vmem>>, %arg4: memref<1x324xf32, #tpu.memory_space<vmem>>, %arg5: memref<9x4x3xf32, #tpu.memory_space<vmem>>, %arg6: memref<4x1xf32, #tpu.memory_space<vmem>>, %arg7: memref<9x8x4xf32, #tpu.memory_space<vmem>>, %arg8: memref<9x8x4xf32, #tpu.memory_space<vmem>>, %arg9: memref<8x1xf32, #tpu.memory_space<vmem>>, %arg10: memref<8x1xf32, #tpu.memory_space<vmem>>, %arg11: memref<8x1xf32, #tpu.memory_space<vmem>>, %arg12: memref<8x1xf32, #tpu.memory_space<vmem>>, %arg13: memref<1x8x16x16xf32, #tpu.memory_space<vmem>>, %arg14: memref<4x460xf32, #tpu.memory_space<vmem>>) attributes {dimension_semantics = [#tpu.dimension_semantics<parallel>, #tpu.dimension_semantics<parallel>], iteration_bounds = array<i64: 2, 3>, scalar_prefetch = 0 : i64, scratch_operands = 1 : i64, tpu.core_type = #tpu.core_type<tc>, window_params = [{transform_indices = @transform_0, window_bounds = array<i64: 1, 1, 3, 378>}, {transform_indices = @transform_1, window_bounds = array<i64: 1, 8, 16, 16>}, {pipeline_mode = #tpu.pipeline_mode<synchronous>, transform_indices = @transform_2, window_bounds = array<i64: 1, 324>}, {pipeline_mode = #tpu.pipeline_mode<synchronous>, transform_indices = @transform_3, window_bounds = array<i64: 9, 4, 3>}, {pipeline_mode = #tpu.pipeline_mode<synchronous>, transform_indices = @transform_4, window_bounds = array<i64: 4, 1>}, {pipeline_mode = #tpu.pipeline_mode<synchronous>, transform_indices = @transform_5, window_bounds = array<i64: 9, 8, 4>}, {pipeline_mode = #tpu.pipeline_mode<synchronous>, transform_indices = @transform_6, window_bounds = array<i64: 9, 8, 4>}, {pipeline_mode = #tpu.pipeline_mode<synchronous>, transform_indices = @transform_7, window_bounds = array<i64: 8, 1>}, {pipeline_mode = #tpu.pipeline_mode<synchronous>, transform_indices = @transform_8, window_bounds = array<i64: 8, 1>}, {pipeline_mode = #tpu.pipeline_mode<synchronous>, transform_indices = @transform_9, window_bounds = array<i64: 8, 1>}, {pipeline_mode = #tpu.pipeline_mode<synchronous>, transform_indices = @transform_10, window_bounds = array<i64: 8, 1>}, {transform_indices = @transform_11, window_bounds = array<i64: 1, 8, 16, 16>}]} {
    %c0 = arith.constant 0 : index
    %c0_0 = arith.constant 0 : index
    %c0_1 = arith.constant 0 : index
    %c0_2 = arith.constant 0 : index
    %0 = vector.load %arg2[%c0, %c0_0, %c0_1, %c0_2] : memref<1x1x3x378xf32, #tpu.memory_space<vmem>>, vector<1x1x3x378xf32>
    %1 = vector.shape_cast %0 : vector<1x1x3x378xf32> to vector<3x378xf32>
    %cst = arith.constant 0.000000e+00 : f32
    %2 = vector.broadcast %cst : f32 to vector<4x324xf32>
    %c0_3 = arith.constant 0 : index
    %c0_4 = arith.constant 0 : index
    %c0_5 = arith.constant 0 : index
    %3 = vector.load %arg5[%c0_3, %c0_4, %c0_5] : memref<9x4x3xf32, #tpu.memory_space<vmem>>, vector<1x4x3xf32>
    %4 = vector.shape_cast %3 : vector<1x4x3xf32> to vector<4x3xf32>
    %5 = vector.extract_strided_slice %1 {offsets = [0, 0], sizes = [3, 324], strides = [1, 1]} : vector<3x378xf32> to vector<3x324xf32>
    %cst_6 = arith.constant dense<0.000000e+00> : vector<4x324xf32>
    %6 = tpu.matmul %4, %5, %cst_6 {dimension_numbers = #tpu.dot_dimension_numbers<[1], [0], [0], [1], [0, 0, 1, 1], [], []>} : vector<4x3xf32>, vector<3x324xf32>, vector<4x324xf32> -> vector<4x324xf32>
    %7 = arith.addf %2, %6 : vector<4x324xf32>
    %c1 = arith.constant 1 : index
    %c0_7 = arith.constant 0 : index
    %c0_8 = arith.constant 0 : index
    %8 = vector.load %arg5[%c1, %c0_7, %c0_8] : memref<9x4x3xf32, #tpu.memory_space<vmem>>, vector<1x4x3xf32>
    %9 = vector.shape_cast %8 : vector<1x4x3xf32> to vector<4x3xf32>
    %10 = vector.extract_strided_slice %1 {offsets = [0, 1], sizes = [3, 324], strides = [1, 1]} : vector<3x378xf32> to vector<3x324xf32>
    %cst_9 = arith.constant dense<0.000000e+00> : vector<4x324xf32>
    %11 = tpu.matmul %9, %10, %cst_9 {dimension_numbers = #tpu.dot_dimension_numbers<[1], [0], [0], [1], [0, 0, 1, 1], [], []>} : vector<4x3xf32>, vector<3x324xf32>, vector<4x324xf32> -> vector<4x324xf32>
    %12 = arith.addf %7, %11 : vector<4x324xf32>
    %c2 = arith.constant 2 : index
    %c0_10 = arith.constant 0 : index
    %c0_11 = arith.constant 0 : index
    %13 = vector.load %arg5[%c2, %c0_10, %c0_11] : memref<9x4x3xf32, #tpu.memory_space<vmem>>, vector<1x4x3xf32>
    %14 = vector.shape_cast %13 : vector<1x4x3xf32> to vector<4x3xf32>
    %15 = vector.extract_strided_slice %1 {offsets = [0, 2], sizes = [3, 324], strides = [1, 1]} : vector<3x378xf32> to vector<3x324xf32>
    %cst_12 = arith.constant dense<0.000000e+00> : vector<4x324xf32>
    %16 = tpu.matmul %14, %15, %cst_12 {dimension_numbers = #tpu.dot_dimension_numbers<[1], [0], [0], [1], [0, 0, 1, 1], [], []>} : vector<4x3xf32>, vector<3x324xf32>, vector<4x324xf32> -> vector<4x324xf32>
    %17 = arith.addf %12, %16 : vector<4x324xf32>
    %c3 = arith.constant 3 : index
    %c0_13 = arith.constant 0 : index
    %c0_14 = arith.constant 0 : index
    %18 = vector.load %arg5[%c3, %c0_13, %c0_14] : memref<9x4x3xf32, #tpu.memory_space<vmem>>, vector<1x4x3xf32>
    %19 = vector.shape_cast %18 : vector<1x4x3xf32> to vector<4x3xf32>
    %20 = vector.extract_strided_slice %1 {offsets = [0, 18], sizes = [3, 324], strides = [1, 1]} : vector<3x378xf32> to vector<3x324xf32>
    %cst_15 = arith.constant dense<0.000000e+00> : vector<4x324xf32>
    %21 = tpu.matmul %19, %20, %cst_15 {dimension_numbers = #tpu.dot_dimension_numbers<[1], [0], [0], [1], [0, 0, 1, 1], [], []>} : vector<4x3xf32>, vector<3x324xf32>, vector<4x324xf32> -> vector<4x324xf32>
    %22 = arith.addf %17, %21 : vector<4x324xf32>
    %c4 = arith.constant 4 : index
    %c0_16 = arith.constant 0 : index
    %c0_17 = arith.constant 0 : index
    %23 = vector.load %arg5[%c4, %c0_16, %c0_17] : memref<9x4x3xf32, #tpu.memory_space<vmem>>, vector<1x4x3xf32>
    %24 = vector.shape_cast %23 : vector<1x4x3xf32> to vector<4x3xf32>
    %25 = vector.extract_strided_slice %1 {offsets = [0, 19], sizes = [3, 324], strides = [1, 1]} : vector<3x378xf32> to vector<3x324xf32>
    %cst_18 = arith.constant dense<0.000000e+00> : vector<4x324xf32>
    %26 = tpu.matmul %24, %25, %cst_18 {dimension_numbers = #tpu.dot_dimension_numbers<[1], [0], [0], [1], [0, 0, 1, 1], [], []>} : vector<4x3xf32>, vector<3x324xf32>, vector<4x324xf32> -> vector<4x324xf32>
    %27 = arith.addf %22, %26 : vector<4x324xf32>
    %c5 = arith.constant 5 : index
    %c0_19 = arith.constant 0 : index
    %c0_20 = arith.constant 0 : index
    %28 = vector.load %arg5[%c5, %c0_19, %c0_20] : memref<9x4x3xf32, #tpu.memory_space<vmem>>, vector<1x4x3xf32>
    %29 = vector.shape_cast %28 : vector<1x4x3xf32> to vector<4x3xf32>
    %30 = vector.extract_strided_slice %1 {offsets = [0, 20], sizes = [3, 324], strides = [1, 1]} : vector<3x378xf32> to vector<3x324xf32>
    %cst_21 = arith.constant dense<0.000000e+00> : vector<4x324xf32>
    %31 = tpu.matmul %29, %30, %cst_21 {dimension_numbers = #tpu.dot_dimension_numbers<[1], [0], [0], [1], [0, 0, 1, 1], [], []>} : vector<4x3xf32>, vector<3x324xf32>, vector<4x324xf32> -> vector<4x324xf32>
    %32 = arith.addf %27, %31 : vector<4x324xf32>
    %c6 = arith.constant 6 : index
    %c0_22 = arith.constant 0 : index
    %c0_23 = arith.constant 0 : index
    %33 = vector.load %arg5[%c6, %c0_22, %c0_23] : memref<9x4x3xf32, #tpu.memory_space<vmem>>, vector<1x4x3xf32>
    %34 = vector.shape_cast %33 : vector<1x4x3xf32> to vector<4x3xf32>
    %35 = vector.extract_strided_slice %1 {offsets = [0, 36], sizes = [3, 324], strides = [1, 1]} : vector<3x378xf32> to vector<3x324xf32>
    %cst_24 = arith.constant dense<0.000000e+00> : vector<4x324xf32>
    %36 = tpu.matmul %34, %35, %cst_24 {dimension_numbers = #tpu.dot_dimension_numbers<[1], [0], [0], [1], [0, 0, 1, 1], [], []>} : vector<4x3xf32>, vector<3x324xf32>, vector<4x324xf32> -> vector<4x324xf32>
    %37 = arith.addf %32, %36 : vector<4x324xf32>
    %c7 = arith.constant 7 : index
    %c0_25 = arith.constant 0 : index
    %c0_26 = arith.constant 0 : index
    %38 = vector.load %arg5[%c7, %c0_25, %c0_26] : memref<9x4x3xf32, #tpu.memory_space<vmem>>, vector<1x4x3xf32>
    %39 = vector.shape_cast %38 : vector<1x4x3xf32> to vector<4x3xf32>
    %40 = vector.extract_strided_slice %1 {offsets = [0, 37], sizes = [3, 324], strides = [1, 1]} : vector<3x378xf32> to vector<3x324xf32>
    %cst_27 = arith.constant dense<0.000000e+00> : vector<4x324xf32>
    %41 = tpu.matmul %39, %40, %cst_27 {dimension_numbers = #tpu.dot_dimension_numbers<[1], [0], [0], [1], [0, 0, 1, 1], [], []>} : vector<4x3xf32>, vector<3x324xf32>, vector<4x324xf32> -> vector<4x324xf32>
    %42 = arith.addf %37, %41 : vector<4x324xf32>
    %c8 = arith.constant 8 : index
    %c0_28 = arith.constant 0 : index
    %c0_29 = arith.constant 0 : index
    %43 = vector.load %arg5[%c8, %c0_28, %c0_29] : memref<9x4x3xf32, #tpu.memory_space<vmem>>, vector<1x4x3xf32>
    %44 = vector.shape_cast %43 : vector<1x4x3xf32> to vector<4x3xf32>
    %45 = vector.extract_strided_slice %1 {offsets = [0, 38], sizes = [3, 324], strides = [1, 1]} : vector<3x378xf32> to vector<3x324xf32>
    %cst_30 = arith.constant dense<0.000000e+00> : vector<4x324xf32>
    %46 = tpu.matmul %44, %45, %cst_30 {dimension_numbers = #tpu.dot_dimension_numbers<[1], [0], [0], [1], [0, 0, 1, 1], [], []>} : vector<4x3xf32>, vector<3x324xf32>, vector<4x324xf32> -> vector<4x324xf32>
    %47 = arith.addf %42, %46 : vector<4x324xf32>
    %c0_31 = arith.constant 0 : index
    %c0_32 = arith.constant 0 : index
    %48 = vector.load %arg6[%c0_31, %c0_32] : memref<4x1xf32, #tpu.memory_space<vmem>>, vector<4x1xf32>
    %49 = vector.broadcast %48 : vector<4x1xf32> to vector<4x324xf32>
    %50 = arith.addf %47, %49 : vector<4x324xf32>
    %cst_33 = arith.constant 0.000000e+00 : f32
    %51 = vector.broadcast %cst_33 : f32 to vector<4x324xf32>
    %52 = arith.maximumf %50, %51 : vector<4x324xf32>
    %c0_34 = arith.constant 0 : index
    %c0_35 = arith.constant 0 : index
    %53 = vector.load %arg4[%c0_34, %c0_35] : memref<1x324xf32, #tpu.memory_space<vmem>>, vector<1x324xf32>
    %54 = vector.broadcast %53 : vector<1x324xf32> to vector<4x324xf32>
    %55 = arith.mulf %52, %54 : vector<4x324xf32>
    %cst_36 = arith.constant 0.000000e+00 : f32
    %56 = vector.broadcast %cst_36 : f32 to vector<4x128xf32>
    %c0_37 = arith.constant 0 : index
    %c0_38 = arith.constant 0 : index
    %57 = vector.load %arg14[%c0_37, %c0_38] : memref<4x460xf32, #tpu.memory_space<vmem>>, vector<4x128xf32>
    tpu.vector_store %arg14[%c0_37, %c0_38], %56 {strides = array<i32>} : memref<4x460xf32, #tpu.memory_space<vmem>>, vector<4x128xf32>,
    %c0_39 = arith.constant 0 : index
    %c128 = arith.constant 128 : index
    %58 = vector.load %arg14[%c0_39, %c128] : memref<4x460xf32, #tpu.memory_space<vmem>>, vector<4x324xf32>
    tpu.vector_store %arg14[%c0_39, %c128], %55 {strides = array<i32>} : memref<4x460xf32, #tpu.memory_space<vmem>>, vector<4x324xf32>,
    %cst_40 = arith.constant 0.000000e+00 : f32
    %59 = vector.broadcast %cst_40 : f32 to vector<4x8xf32>
    %c0_41 = arith.constant 0 : index
    %c452 = arith.constant 452 : index
    %60 = vector.load %arg14[%c0_41, %c452] : memref<4x460xf32, #tpu.memory_space<vmem>>, vector<4x8xf32>
    tpu.vector_store %arg14[%c0_41, %c452], %59 {strides = array<i32>} : memref<4x460xf32, #tpu.memory_space<vmem>>, vector<4x8xf32>,
    %c0_i32 = arith.constant 0 : i32
    %61 = arith.cmpi eq, %arg1, %c0_i32 : i32
    %62 = arith.extui %61 : i1 to i32
    %c0_i32_42 = arith.constant 0 : i32
    %63 = arith.cmpi ne, %62, %c0_i32_42 : i32
    scf.if %63 {
      %cst_144 = arith.constant 0.000000e+00 : f32
      %175 = vector.broadcast %cst_144 : f32 to vector<4x18xf32>
      %c0_145 = arith.constant 0 : index
      %c127_146 = arith.constant 127 : index
      %176 = vector.load %arg14[%c0_145, %c127_146] : memref<4x460xf32, #tpu.memory_space<vmem>>, vector<4x18xf32>
      tpu.vector_store %arg14[%c0_145, %c127_146], %175 {strides = array<i32>} : memref<4x460xf32, #tpu.memory_space<vmem>>, vector<4x18xf32>,
    } else {
    }
    %c2_i32 = arith.constant 2 : i32
    %64 = arith.cmpi eq, %arg1, %c2_i32 : i32
    %65 = arith.extui %64 : i1 to i32
    %c0_i32_43 = arith.constant 0 : i32
    %66 = arith.cmpi ne, %65, %c0_i32_43 : i32
    scf.if %66 {
      %cst_144 = arith.constant 0.000000e+00 : f32
      %175 = vector.broadcast %cst_144 : f32 to vector<4x18xf32>
      %c0_145 = arith.constant 0 : index
      %c433 = arith.constant 433 : index
      %176 = vector.load %arg14[%c0_145, %c433] : memref<4x460xf32, #tpu.memory_space<vmem>>, vector<4x18xf32>
      tpu.vector_store %arg14[%c0_145, %c433], %175 {strides = array<i32>} : memref<4x460xf32, #tpu.memory_space<vmem>>, vector<4x18xf32>,
    } else {
    }
    %cst_44 = arith.constant 0.000000e+00 : f32
    %67 = vector.broadcast %cst_44 : f32 to vector<8x288xf32>
    %cst_45 = arith.constant 0.000000e+00 : f32
    %68 = vector.broadcast %cst_45 : f32 to vector<8x288xf32>
    %c0_46 = arith.constant 0 : index
    %c127 = arith.constant 127 : index
    %69 = vector.load %arg14[%c0_46, %c127] : memref<4x460xf32, #tpu.memory_space<vmem>>, vector<4x288xf32>
    %c0_47 = arith.constant 0 : index
    %c0_48 = arith.constant 0 : index
    %c0_49 = arith.constant 0 : index
    %70 = vector.load %arg7[%c0_47, %c0_48, %c0_49] : memref<9x8x4xf32, #tpu.memory_space<vmem>>, vector<1x8x4xf32>
    %71 = vector.shape_cast %70 : vector<1x8x4xf32> to vector<8x4xf32>
    %cst_50 = arith.constant dense<0.000000e+00> : vector<8x288xf32>
    %72 = tpu.matmul %71, %69, %cst_50 {dimension_numbers = #tpu.dot_dimension_numbers<[1], [0], [0], [1], [0, 0, 1, 1], [], []>} : vector<8x4xf32>, vector<4x288xf32>, vector<8x288xf32> -> vector<8x288xf32>
    %73 = arith.addf %67, %72 : vector<8x288xf32>
    %c0_51 = arith.constant 0 : index
    %c0_52 = arith.constant 0 : index
    %c0_53 = arith.constant 0 : index
    %74 = vector.load %arg8[%c0_51, %c0_52, %c0_53] : memref<9x8x4xf32, #tpu.memory_space<vmem>>, vector<1x8x4xf32>
    %75 = vector.shape_cast %74 : vector<1x8x4xf32> to vector<8x4xf32>
    %cst_54 = arith.constant dense<0.000000e+00> : vector<8x288xf32>
    %76 = tpu.matmul %75, %69, %cst_54 {dimension_numbers = #tpu.dot_dimension_numbers<[1], [0], [0], [1], [0, 0, 1, 1], [], []>} : vector<8x4xf32>, vector<4x288xf32>, vector<8x288xf32> -> vector<8x288xf32>
    %77 = arith.addf %68, %76 : vector<8x288xf32>
    %c0_55 = arith.constant 0 : index
    %c128_56 = arith.constant 128 : index
    %78 = vector.load %arg14[%c0_55, %c128_56] : memref<4x460xf32, #tpu.memory_space<vmem>>, vector<4x288xf32>
    %c1_57 = arith.constant 1 : index
    %c0_58 = arith.constant 0 : index
    %c0_59 = arith.constant 0 : index
    %79 = vector.load %arg7[%c1_57, %c0_58, %c0_59] : memref<9x8x4xf32, #tpu.memory_space<vmem>>, vector<1x8x4xf32>
    %80 = vector.shape_cast %79 : vector<1x8x4xf32> to vector<8x4xf32>
    %cst_60 = arith.constant dense<0.000000e+00> : vector<8x288xf32>
    %81 = tpu.matmul %80, %78, %cst_60 {dimension_numbers = #tpu.dot_dimension_numbers<[1], [0], [0], [1], [0, 0, 1, 1], [], []>} : vector<8x4xf32>, vector<4x288xf32>, vector<8x288xf32> -> vector<8x288xf32>
    %82 = arith.addf %73, %81 : vector<8x288xf32>
    %c1_61 = arith.constant 1 : index
    %c0_62 = arith.constant 0 : index
    %c0_63 = arith.constant 0 : index
    %83 = vector.load %arg8[%c1_61, %c0_62, %c0_63] : memref<9x8x4xf32, #tpu.memory_space<vmem>>, vector<1x8x4xf32>
    %84 = vector.shape_cast %83 : vector<1x8x4xf32> to vector<8x4xf32>
    %cst_64 = arith.constant dense<0.000000e+00> : vector<8x288xf32>
    %85 = tpu.matmul %84, %78, %cst_64 {dimension_numbers = #tpu.dot_dimension_numbers<[1], [0], [0], [1], [0, 0, 1, 1], [], []>} : vector<8x4xf32>, vector<4x288xf32>, vector<8x288xf32> -> vector<8x288xf32>
    %86 = arith.addf %77, %85 : vector<8x288xf32>
    %c0_65 = arith.constant 0 : index
    %c129 = arith.constant 129 : index
    %87 = vector.load %arg14[%c0_65, %c129] : memref<4x460xf32, #tpu.memory_space<vmem>>, vector<4x288xf32>
    %c2_66 = arith.constant 2 : index
    %c0_67 = arith.constant 0 : index
    %c0_68 = arith.constant 0 : index
    %88 = vector.load %arg7[%c2_66, %c0_67, %c0_68] : memref<9x8x4xf32, #tpu.memory_space<vmem>>, vector<1x8x4xf32>
    %89 = vector.shape_cast %88 : vector<1x8x4xf32> to vector<8x4xf32>
    %cst_69 = arith.constant dense<0.000000e+00> : vector<8x288xf32>
    %90 = tpu.matmul %89, %87, %cst_69 {dimension_numbers = #tpu.dot_dimension_numbers<[1], [0], [0], [1], [0, 0, 1, 1], [], []>} : vector<8x4xf32>, vector<4x288xf32>, vector<8x288xf32> -> vector<8x288xf32>
    %91 = arith.addf %82, %90 : vector<8x288xf32>
    %c2_70 = arith.constant 2 : index
    %c0_71 = arith.constant 0 : index
    %c0_72 = arith.constant 0 : index
    %92 = vector.load %arg8[%c2_70, %c0_71, %c0_72] : memref<9x8x4xf32, #tpu.memory_space<vmem>>, vector<1x8x4xf32>
    %93 = vector.shape_cast %92 : vector<1x8x4xf32> to vector<8x4xf32>
    %cst_73 = arith.constant dense<0.000000e+00> : vector<8x288xf32>
    %94 = tpu.matmul %93, %87, %cst_73 {dimension_numbers = #tpu.dot_dimension_numbers<[1], [0], [0], [1], [0, 0, 1, 1], [], []>} : vector<8x4xf32>, vector<4x288xf32>, vector<8x288xf32> -> vector<8x288xf32>
    %95 = arith.addf %86, %94 : vector<8x288xf32>
    %c0_74 = arith.constant 0 : index
    %c145 = arith.constant 145 : index
    %96 = vector.load %arg14[%c0_74, %c145] : memref<4x460xf32, #tpu.memory_space<vmem>>, vector<4x288xf32>
    %c3_75 = arith.constant 3 : index
    %c0_76 = arith.constant 0 : index
    %c0_77 = arith.constant 0 : index
    %97 = vector.load %arg7[%c3_75, %c0_76, %c0_77] : memref<9x8x4xf32, #tpu.memory_space<vmem>>, vector<1x8x4xf32>
    %98 = vector.shape_cast %97 : vector<1x8x4xf32> to vector<8x4xf32>
    %cst_78 = arith.constant dense<0.000000e+00> : vector<8x288xf32>
    %99 = tpu.matmul %98, %96, %cst_78 {dimension_numbers = #tpu.dot_dimension_numbers<[1], [0], [0], [1], [0, 0, 1, 1], [], []>} : vector<8x4xf32>, vector<4x288xf32>, vector<8x288xf32> -> vector<8x288xf32>
    %100 = arith.addf %91, %99 : vector<8x288xf32>
    %c3_79 = arith.constant 3 : index
    %c0_80 = arith.constant 0 : index
    %c0_81 = arith.constant 0 : index
    %101 = vector.load %arg8[%c3_79, %c0_80, %c0_81] : memref<9x8x4xf32, #tpu.memory_space<vmem>>, vector<1x8x4xf32>
    %102 = vector.shape_cast %101 : vector<1x8x4xf32> to vector<8x4xf32>
    %cst_82 = arith.constant dense<0.000000e+00> : vector<8x288xf32>
    %103 = tpu.matmul %102, %96, %cst_82 {dimension_numbers = #tpu.dot_dimension_numbers<[1], [0], [0], [1], [0, 0, 1, 1], [], []>} : vector<8x4xf32>, vector<4x288xf32>, vector<8x288xf32> -> vector<8x288xf32>
    %104 = arith.addf %95, %103 : vector<8x288xf32>
    %c0_83 = arith.constant 0 : index
    %c146 = arith.constant 146 : index
    %105 = vector.load %arg14[%c0_83, %c146] : memref<4x460xf32, #tpu.memory_space<vmem>>, vector<4x288xf32>
    %c4_84 = arith.constant 4 : index
    %c0_85 = arith.constant 0 : index
    %c0_86 = arith.constant 0 : index
    %106 = vector.load %arg7[%c4_84, %c0_85, %c0_86] : memref<9x8x4xf32, #tpu.memory_space<vmem>>, vector<1x8x4xf32>
    %107 = vector.shape_cast %106 : vector<1x8x4xf32> to vector<8x4xf32>
    %cst_87 = arith.constant dense<0.000000e+00> : vector<8x288xf32>
    %108 = tpu.matmul %107, %105, %cst_87 {dimension_numbers = #tpu.dot_dimension_numbers<[1], [0], [0], [1], [0, 0, 1, 1], [], []>} : vector<8x4xf32>, vector<4x288xf32>, vector<8x288xf32> -> vector<8x288xf32>
    %109 = arith.addf %100, %108 : vector<8x288xf32>
    %c4_88 = arith.constant 4 : index
    %c0_89 = arith.constant 0 : index
    %c0_90 = arith.constant 0 : index
    %110 = vector.load %arg8[%c4_88, %c0_89, %c0_90] : memref<9x8x4xf32, #tpu.memory_space<vmem>>, vector<1x8x4xf32>
    %111 = vector.shape_cast %110 : vector<1x8x4xf32> to vector<8x4xf32>
    %cst_91 = arith.constant dense<0.000000e+00> : vector<8x288xf32>
    %112 = tpu.matmul %111, %105, %cst_91 {dimension_numbers = #tpu.dot_dimension_numbers<[1], [0], [0], [1], [0, 0, 1, 1], [], []>} : vector<8x4xf32>, vector<4x288xf32>, vector<8x288xf32> -> vector<8x288xf32>
    %113 = arith.addf %104, %112 : vector<8x288xf32>
    %c0_92 = arith.constant 0 : index
    %c147 = arith.constant 147 : index
    %114 = vector.load %arg14[%c0_92, %c147] : memref<4x460xf32, #tpu.memory_space<vmem>>, vector<4x288xf32>
    %c5_93 = arith.constant 5 : index
    %c0_94 = arith.constant 0 : index
    %c0_95 = arith.constant 0 : index
    %115 = vector.load %arg7[%c5_93, %c0_94, %c0_95] : memref<9x8x4xf32, #tpu.memory_space<vmem>>, vector<1x8x4xf32>
    %116 = vector.shape_cast %115 : vector<1x8x4xf32> to vector<8x4xf32>
    %cst_96 = arith.constant dense<0.000000e+00> : vector<8x288xf32>
    %117 = tpu.matmul %116, %114, %cst_96 {dimension_numbers = #tpu.dot_dimension_numbers<[1], [0], [0], [1], [0, 0, 1, 1], [], []>} : vector<8x4xf32>, vector<4x288xf32>, vector<8x288xf32> -> vector<8x288xf32>
    %118 = arith.addf %109, %117 : vector<8x288xf32>
    %c5_97 = arith.constant 5 : index
    %c0_98 = arith.constant 0 : index
    %c0_99 = arith.constant 0 : index
    %119 = vector.load %arg8[%c5_97, %c0_98, %c0_99] : memref<9x8x4xf32, #tpu.memory_space<vmem>>, vector<1x8x4xf32>
    %120 = vector.shape_cast %119 : vector<1x8x4xf32> to vector<8x4xf32>
    %cst_100 = arith.constant dense<0.000000e+00> : vector<8x288xf32>
    %121 = tpu.matmul %120, %114, %cst_100 {dimension_numbers = #tpu.dot_dimension_numbers<[1], [0], [0], [1], [0, 0, 1, 1], [], []>} : vector<8x4xf32>, vector<4x288xf32>, vector<8x288xf32> -> vector<8x288xf32>
    %122 = arith.addf %113, %121 : vector<8x288xf32>
    %c0_101 = arith.constant 0 : index
    %c163 = arith.constant 163 : index
    %123 = vector.load %arg14[%c0_101, %c163] : memref<4x460xf32, #tpu.memory_space<vmem>>, vector<4x288xf32>
    %c6_102 = arith.constant 6 : index
    %c0_103 = arith.constant 0 : index
    %c0_104 = arith.constant 0 : index
    %124 = vector.load %arg7[%c6_102, %c0_103, %c0_104] : memref<9x8x4xf32, #tpu.memory_space<vmem>>, vector<1x8x4xf32>
    %125 = vector.shape_cast %124 : vector<1x8x4xf32> to vector<8x4xf32>
    %cst_105 = arith.constant dense<0.000000e+00> : vector<8x288xf32>
    %126 = tpu.matmul %125, %123, %cst_105 {dimension_numbers = #tpu.dot_dimension_numbers<[1], [0], [0], [1], [0, 0, 1, 1], [], []>} : vector<8x4xf32>, vector<4x288xf32>, vector<8x288xf32> -> vector<8x288xf32>
    %127 = arith.addf %118, %126 : vector<8x288xf32>
    %c6_106 = arith.constant 6 : index
    %c0_107 = arith.constant 0 : index
    %c0_108 = arith.constant 0 : index
    %128 = vector.load %arg8[%c6_106, %c0_107, %c0_108] : memref<9x8x4xf32, #tpu.memory_space<vmem>>, vector<1x8x4xf32>
    %129 = vector.shape_cast %128 : vector<1x8x4xf32> to vector<8x4xf32>
    %cst_109 = arith.constant dense<0.000000e+00> : vector<8x288xf32>
    %130 = tpu.matmul %129, %123, %cst_109 {dimension_numbers = #tpu.dot_dimension_numbers<[1], [0], [0], [1], [0, 0, 1, 1], [], []>} : vector<8x4xf32>, vector<4x288xf32>, vector<8x288xf32> -> vector<8x288xf32>
    %131 = arith.addf %122, %130 : vector<8x288xf32>
    %c0_110 = arith.constant 0 : index
    %c164 = arith.constant 164 : index
    %132 = vector.load %arg14[%c0_110, %c164] : memref<4x460xf32, #tpu.memory_space<vmem>>, vector<4x288xf32>
    %c7_111 = arith.constant 7 : index
    %c0_112 = arith.constant 0 : index
    %c0_113 = arith.constant 0 : index
    %133 = vector.load %arg7[%c7_111, %c0_112, %c0_113] : memref<9x8x4xf32, #tpu.memory_space<vmem>>, vector<1x8x4xf32>
    %134 = vector.shape_cast %133 : vector<1x8x4xf32> to vector<8x4xf32>
    %cst_114 = arith.constant dense<0.000000e+00> : vector<8x288xf32>
    %135 = tpu.matmul %134, %132, %cst_114 {dimension_numbers = #tpu.dot_dimension_numbers<[1], [0], [0], [1], [0, 0, 1, 1], [], []>} : vector<8x4xf32>, vector<4x288xf32>, vector<8x288xf32> -> vector<8x288xf32>
    %136 = arith.addf %127, %135 : vector<8x288xf32>
    %c7_115 = arith.constant 7 : index
    %c0_116 = arith.constant 0 : index
    %c0_117 = arith.constant 0 : index
    %137 = vector.load %arg8[%c7_115, %c0_116, %c0_117] : memref<9x8x4xf32, #tpu.memory_space<vmem>>, vector<1x8x4xf32>
    %138 = vector.shape_cast %137 : vector<1x8x4xf32> to vector<8x4xf32>
    %cst_118 = arith.constant dense<0.000000e+00> : vector<8x288xf32>
    %139 = tpu.matmul %138, %132, %cst_118 {dimension_numbers = #tpu.dot_dimension_numbers<[1], [0], [0], [1], [0, 0, 1, 1], [], []>} : vector<8x4xf32>, vector<4x288xf32>, vector<8x288xf32> -> vector<8x288xf32>
    %140 = arith.addf %131, %139 : vector<8x288xf32>
    %c0_119 = arith.constant 0 : index
    %c165 = arith.constant 165 : index
    %141 = vector.load %arg14[%c0_119, %c165] : memref<4x460xf32, #tpu.memory_space<vmem>>, vector<4x288xf32>
    %c8_120 = arith.constant 8 : index
    %c0_121 = arith.constant 0 : index
    %c0_122 = arith.constant 0 : index
    %142 = vector.load %arg7[%c8_120, %c0_121, %c0_122] : memref<9x8x4xf32, #tpu.memory_space<vmem>>, vector<1x8x4xf32>
    %143 = vector.shape_cast %142 : vector<1x8x4xf32> to vector<8x4xf32>
    %cst_123 = arith.constant dense<0.000000e+00> : vector<8x288xf32>
    %144 = tpu.matmul %143, %141, %cst_123 {dimension_numbers = #tpu.dot_dimension_numbers<[1], [0], [0], [1], [0, 0, 1, 1], [], []>} : vector<8x4xf32>, vector<4x288xf32>, vector<8x288xf32> -> vector<8x288xf32>
    %145 = arith.addf %136, %144 : vector<8x288xf32>
    %c8_124 = arith.constant 8 : index
    %c0_125 = arith.constant 0 : index
    %c0_126 = arith.constant 0 : index
    %146 = vector.load %arg8[%c8_124, %c0_125, %c0_126] : memref<9x8x4xf32, #tpu.memory_space<vmem>>, vector<1x8x4xf32>
    %147 = vector.shape_cast %146 : vector<1x8x4xf32> to vector<8x4xf32>
    %cst_127 = arith.constant dense<0.000000e+00> : vector<8x288xf32>
    %148 = tpu.matmul %147, %141, %cst_127 {dimension_numbers = #tpu.dot_dimension_numbers<[1], [0], [0], [1], [0, 0, 1, 1], [], []>} : vector<8x4xf32>, vector<4x288xf32>, vector<8x288xf32> -> vector<8x288xf32>
    %149 = arith.addf %140, %148 : vector<8x288xf32>
    %c0_128 = arith.constant 0 : index
    %c0_129 = arith.constant 0 : index
    %150 = vector.load %arg9[%c0_128, %c0_129] : memref<8x1xf32, #tpu.memory_space<vmem>>, vector<8x1xf32>
    %151 = vector.broadcast %150 : vector<8x1xf32> to vector<8x288xf32>
    %152 = arith.addf %145, %151 : vector<8x288xf32>
    %153 = vector.shape_cast %152 : vector<8x288xf32> to vector<8x16x18xf32>
    %154 = vector.extract_strided_slice %153 {offsets = [0, 0, 0], sizes = [8, 16, 16], strides = [1, 1, 1]} : vector<8x16x18xf32> to vector<8x16x16xf32>
    %c0_130 = arith.constant 0 : index
    %c0_131 = arith.constant 0 : index
    %155 = vector.load %arg10[%c0_130, %c0_131] : memref<8x1xf32, #tpu.memory_space<vmem>>, vector<8x1xf32>
    %156 = vector.broadcast %155 : vector<8x1xf32> to vector<8x288xf32>
    %157 = arith.addf %149, %156 : vector<8x288xf32>
    %158 = vector.shape_cast %157 : vector<8x288xf32> to vector<8x16x18xf32>
    %159 = vector.extract_strided_slice %158 {offsets = [0, 0, 0], sizes = [8, 16, 16], strides = [1, 1, 1]} : vector<8x16x18xf32> to vector<8x16x16xf32>
    %c0_132 = arith.constant 0 : index
    %c0_133 = arith.constant 0 : index
    %c0_134 = arith.constant 0 : index
    %c0_135 = arith.constant 0 : index
    %160 = vector.load %arg3[%c0_132, %c0_133, %c0_134, %c0_135] : memref<1x8x16x16xf32, #tpu.memory_space<vmem>>, vector<1x8x16x16xf32>
    %161 = vector.shape_cast %160 : vector<1x8x16x16xf32> to vector<8x16x16xf32>
    %c0_136 = arith.constant 0 : index
    %c0_137 = arith.constant 0 : index
    %162 = vector.load %arg11[%c0_136, %c0_137] : memref<8x1xf32, #tpu.memory_space<vmem>>, vector<8x1xf32>
    %163 = vector.shape_cast %162 : vector<8x1xf32> to vector<8x1x1xf32>
    %164 = vector.broadcast %163 : vector<8x1x1xf32> to vector<8x16x16xf32>
    %165 = arith.mulf %161, %164 : vector<8x16x16xf32>
    %c0_138 = arith.constant 0 : index
    %c0_139 = arith.constant 0 : index
    %166 = vector.load %arg12[%c0_138, %c0_139] : memref<8x1xf32, #tpu.memory_space<vmem>>, vector<8x1xf32>
    %167 = vector.shape_cast %166 : vector<8x1xf32> to vector<8x1x1xf32>
    %168 = vector.broadcast %167 : vector<8x1x1xf32> to vector<8x16x16xf32>
    %169 = arith.addf %165, %168 : vector<8x16x16xf32>
    %170 = arith.mulf %154, %169 : vector<8x16x16xf32>
    %171 = arith.addf %170, %159 : vector<8x16x16xf32>
    %c0_140 = arith.constant 0 : index
    %c0_141 = arith.constant 0 : index
    %c0_142 = arith.constant 0 : index
    %c0_143 = arith.constant 0 : index
    %172 = vector.load %arg13[%c0_140, %c0_141, %c0_142, %c0_143] : memref<1x8x16x16xf32, #tpu.memory_space<vmem>>, vector<1x8x16x16xf32>
    %173 = vector.shape_cast %172 : vector<1x8x16x16xf32> to vector<8x16x16xf32>
    %174 = vector.shape_cast %171 : vector<8x16x16xf32> to vector<1x8x16x16xf32>
    tpu.vector_store %arg13[%c0_140, %c0_141, %c0_142, %c0_143], %174 {strides = array<i32>} : memref<1x8x16x16xf32, #tpu.memory_space<vmem>>, vector<1x8x16x16xf32>,
    return
  }
  func.func @transform_0(%arg0: i32, %arg1: i32) -> (i32, i32, i32, i32) {
    %c0_i32 = arith.constant 0 : i32
    %c0_i32_0 = arith.constant 0 : i32
    %c0_i32_1 = arith.constant 0 : i32
    return %arg0, %arg1, %c0_i32, %c0_i32_0 : i32, i32, i32, i32
  }
  func.func @transform_1(%arg0: i32, %arg1: i32) -> (i32, i32, i32, i32) {
    %c0_i32 = arith.constant 0 : i32
    %c0_i32_0 = arith.constant 0 : i32
    %c0_i32_1 = arith.constant 0 : i32
    return %arg0, %c0_i32, %arg1, %c0_i32_0 : i32, i32, i32, i32
  }
  func.func @transform_2(%arg0: i32, %arg1: i32) -> (i32, i32) {
    %c0_i32 = arith.constant 0 : i32
    %c0_i32_0 = arith.constant 0 : i32
    %c0_i32_1 = arith.constant 0 : i32
    return %c0_i32, %c0_i32_0 : i32, i32
  }
  func.func @transform_3(%arg0: i32, %arg1: i32) -> (i32, i32, i32) {
    %c0_i32 = arith.constant 0 : i32
    %c0_i32_0 = arith.constant 0 : i32
    %c0_i32_1 = arith.constant 0 : i32
    %c0_i32_2 = arith.constant 0 : i32
    return %c0_i32, %c0_i32_0, %c0_i32_1 : i32, i32, i32
  }
  func.func @transform_4(%arg0: i32, %arg1: i32) -> (i32, i32) {
    %c0_i32 = arith.constant 0 : i32
    %c0_i32_0 = arith.constant 0 : i32
    %c0_i32_1 = arith.constant 0 : i32
    return %c0_i32, %c0_i32_0 : i32, i32
  }
  func.func @transform_5(%arg0: i32, %arg1: i32) -> (i32, i32, i32) {
    %c0_i32 = arith.constant 0 : i32
    %c0_i32_0 = arith.constant 0 : i32
    %c0_i32_1 = arith.constant 0 : i32
    %c0_i32_2 = arith.constant 0 : i32
    return %c0_i32, %c0_i32_0, %c0_i32_1 : i32, i32, i32
  }
  func.func @transform_6(%arg0: i32, %arg1: i32) -> (i32, i32, i32) {
    %c0_i32 = arith.constant 0 : i32
    %c0_i32_0 = arith.constant 0 : i32
    %c0_i32_1 = arith.constant 0 : i32
    %c0_i32_2 = arith.constant 0 : i32
    return %c0_i32, %c0_i32_0, %c0_i32_1 : i32, i32, i32
  }
  func.func @transform_7(%arg0: i32, %arg1: i32) -> (i32, i32) {
    %c0_i32 = arith.constant 0 : i32
    %c0_i32_0 = arith.constant 0 : i32
    %c0_i32_1 = arith.constant 0 : i32
    return %c0_i32, %c0_i32_0 : i32, i32
  }
  func.func @transform_8(%arg0: i32, %arg1: i32) -> (i32, i32) {
    %c0_i32 = arith.constant 0 : i32
    %c0_i32_0 = arith.constant 0 : i32
    %c0_i32_1 = arith.constant 0 : i32
    return %c0_i32, %c0_i32_0 : i32, i32
  }
  func.func @transform_9(%arg0: i32, %arg1: i32) -> (i32, i32) {
    %c0_i32 = arith.constant 0 : i32
    %c0_i32_0 = arith.constant 0 : i32
    %c0_i32_1 = arith.constant 0 : i32
    return %c0_i32, %c0_i32_0 : i32, i32
  }
  func.func @transform_10(%arg0: i32, %arg1: i32) -> (i32, i32) {
    %c0_i32 = arith.constant 0 : i32
    %c0_i32_0 = arith.constant 0 : i32
    %c0_i32_1 = arith.constant 0 : i32
    return %c0_i32, %c0_i32_0 : i32, i32
  }
  func.func @transform_11(%arg0: i32, %arg1: i32) -> (i32, i32, i32, i32) {
    %c0_i32 = arith.constant 0 : i32
    %c0_i32_0 = arith.constant 0 : i32
    %c0_i32_1 = arith.constant 0 : i32
    return %arg0, %c0_i32, %arg1, %c0_i32_0 : i32, i32, i32, i32
  }
}

</mosaic_0001>

<bundles_post_ra>
// kernel: spade_forward.2
= control target key start
LH: loop header
LB: loop body
LE: loop exit
PB: predicated region body
PF: predicated region fallthrough
CT: control target
= control target key end

     0   :  { %s982_s6 = smov 0   ;;  %s984_s7 = smov 0   ;;  %s1320_s0 = inlined_call_operand.vmem [shape: f32[2,8,48,16], index: 0, kind: input, shape index: {}]   ;;  %s1321_s1 = inlined_call_operand.vmem [shape: f32[2,8,2], index: 1, kind: output, shape index: {}]  }
   0x1   :  { %s986_s8 = smov 0   ;;  %s988_s9 = smov 0  }
   0x2   :  { %s990_s10 = smov 0   ;;  %s992_s11 = smov 0  }
   0x3   :  { %s994_s12 = smov 0  }
   0x4 LB: > { %s20_s13 = sadd.s32 1, %s961_s10  ;;  %s23_s14 = sadd.s32 1, %s965_s11  ;;  %s969_s12 = sphi %s994_s12, %s11_s12   ;;  %s965_s11 = sphi %s992_s11, %s1327_s11   ;;  %s961_s10 = sphi %s990_s10, %s1326_s10   ;;  %s957_s9 = sphi %s988_s9, %s1325_s9   ;;  %s953_s8 = sphi %s986_s8, %s1324_s8   ;;  %s949_s7 = sphi %s984_s7, %s1323_s7   ;;  %s945_s6 = sphi %s982_s6, %s1322_s6  }
   0x5   : > { %p21_p0 = scmp.ge.s32.totalorder %s20_s13, 2  ;;  %p39_p1 = scmp.ne.s32.totalorder %s949_s7, %s945_s6 }
   0x6   : > { %p40_p2 = scmp.eq.s32.totalorder %s969_s12, 0  ;;  %s32_s18 = sadd.s32 1, %s949_s7 }
   0x7   : > { %s1329_s13 = smov (%p21_p0, %s20_s13), 0  ;;  %s1331_s14 = smov (!%p21_p0, %s23_s14), %s965_s11 }
   0x8   : > { %p41_p3 = por %p40_p2, %p39_p1  ;;  %p25_p4 = scmp.ge.s32.totalorder %s1331_s14, 2 }
   0x9   : > { %s27_s15 = ssub.s32 %s961_s10, %s1329_s13  ;;  %p848_p6 = scmp.ge.s32.totalorder %s969_s12, 4 }
   0xa   : > { %s1333_s14 = smov (%p25_p4, %s1331_s14), 0 }
   0xb   : > { %s28_s16 = ssub.s32 %s965_s11, %s1333_s14  ;;  %91 = sbr.rel (%p848_p6) target bundleno = 39 (0x27), region = 16 }
   0xc   : > { %s29_s17 = sor.u32 %s28_s16, %s27_s15 }
   0xd   : > { %p30_p5 = scmp.eq.s32.totalorder %s29_s17, 0 }
   0xf   : > { %s1033_s19 = scalar_select %p30_p5, %s949_s7, %s32_s18  }
  0x12   : > { %94 = sbr.rel (!%p41_p3) target bundleno = 39 (0x27), region = 20  ;;  %s96_s20 = sand.u32 (%p41_p3), 1, %s949_s7  }
  0x13   : > { %s99_s21 = smul.u32 (%p41_p3), 3, %s965_s11 }
  0x14   : > { %s855_s22 = smul.u32 (%p41_p3), 192, %s96_s20 }
  0x15   : > { %s856_s23 = smul.u32 (%p41_p3), 48, %s961_s10 }
  0x16   : > { %s1047_s29 = scalar_lea.vmem (%p41_p3), [#allocation2], %s855_s22 }
  0x17   : > { %s101_s24 = sadd.s32 (%p41_p3), %s856_s23, %s99_s21 }
  0x18   : > { %s849_s25 = sshll.u32 (%p41_p3), %s101_s24, 3 }
  0x19   : > { %s1042_s28 = scalar_lea.vmem %s1320_s0, %s849_s25 }
  0x1a   : > { %v177_v0 = vld [vmem:[%s1042_s28] sm:$0xff]  ;;  %v179_v1 = vld [vmem:[%s1042_s28 + $0x8] sm:$0xff]  ;;  %v181_v2 = vld [vmem:[%s1042_s28 + $0x10] sm:$0xff] }
  0x1b   : > { %178 = vst [vmem:[%s1047_s29] sm:$0xff] %v177_v0  ;;  %180 = vst [vmem:[%s1047_s29 + $0x8] sm:$0xff] %v179_v1  ;;  %v183_v3 = vld [vmem:[%s1042_s28 + $0x30] sm:$0xff]  ;;  %v185_v4 = vld [vmem:[%s1042_s28 + $0x38] sm:$0xff] }
  0x1c   : > { %182 = vst [vmem:[%s1047_s29 + $0x10] sm:$0xff] %v181_v2  ;;  %v187_v5 = vld [vmem:[%s1042_s28 + $0x40] sm:$0xff]  ;;  %184 = vst [vmem:[%s1047_s29 + $0x18] sm:$0xff] %v183_v3  ;;  %v191_v7 = vld [vmem:[%s1042_s28 + $0x68] sm:$0xff] }
  0x1d   : > { %186 = vst [vmem:[%s1047_s29 + $0x20] sm:$0xff] %v185_v4  ;;  %188 = vst [vmem:[%s1047_s29 + $0x28] sm:$0xff] %v187_v5  ;;  %v189_v6 = vld [vmem:[%s1042_s28 + $0x60] sm:$0xff]  ;;  %v193_v8 = vld [vmem:[%s1042_s28 + $0x70] sm:$0xff] }
  0x1e   : > { %190 = vst [vmem:[%s1047_s29 + $0x30] sm:$0xff] %v189_v6  ;;  %192 = vst [vmem:[%s1047_s29 + $0x38] sm:$0xff] %v191_v7  ;;  %v195_v9 = vld [vmem:[%s1042_s28 + $0x90] sm:$0xff]  ;;  %v197_v10 = vld [vmem:[%s1042_s28 + $0x98] sm:$0xff] }
  0x1f   : > { %194 = vst [vmem:[%s1047_s29 + $0x40] sm:$0xff] %v193_v8  ;;  %v199_v11 = vld [vmem:[%s1042_s28 + $0xa0] sm:$0xff]  ;;  %196 = vst [vmem:[%s1047_s29 + $0x48] sm:$0xff] %v195_v9  ;;  %v203_v13 = vld [vmem:[%s1042_s28 + $0xc8] sm:$0xff] }
  0x20   : > { %198 = vst [vmem:[%s1047_s29 + $0x50] sm:$0xff] %v197_v10  ;;  %200 = vst [vmem:[%s1047_s29 + $0x58] sm:$0xff] %v199_v11  ;;  %v201_v12 = vld [vmem:[%s1042_s28 + $0xc0] sm:$0xff]  ;;  %v205_v14 = vld [vmem:[%s1042_s28 + $0xd0] sm:$0xff] }
  0x21   : > { %202 = vst [vmem:[%s1047_s29 + $0x60] sm:$0xff] %v201_v12  ;;  %204 = vst [vmem:[%s1047_s29 + $0x68] sm:$0xff] %v203_v13  ;;  %v207_v15 = vld [vmem:[%s1042_s28 + $0xf0] sm:$0xff]  ;;  %v209_v16 = vld [vmem:[%s1042_s28 + $0xf8] sm:$0xff] }
  0x22   : > { %206 = vst [vmem:[%s1047_s29 + $0x70] sm:$0xff] %v205_v14  ;;  %v211_v17 = vld [vmem:[%s1042_s28 + $0x100] sm:$0xff]  ;;  %208 = vst [vmem:[%s1047_s29 + $0x78] sm:$0xff] %v207_v15  ;;  %v215_v19 = vld [vmem:[%s1042_s28 + $0x128] sm:$0xff] }
  0x23   : > { %210 = vst [vmem:[%s1047_s29 + $0x80] sm:$0xff] %v209_v16  ;;  %212 = vst [vmem:[%s1047_s29 + $0x88] sm:$0xff] %v211_v17  ;;  %v213_v18 = vld [vmem:[%s1042_s28 + $0x120] sm:$0xff]  ;;  %v217_v20 = vld [vmem:[%s1042_s28 + $0x130] sm:$0xff] }
  0x24   : > { %214 = vst [vmem:[%s1047_s29 + $0x90] sm:$0xff] %v213_v18  ;;  %216 = vst [vmem:[%s1047_s29 + $0x98] sm:$0xff] %v215_v19  ;;  %v219_v21 = vld [vmem:[%s1042_s28 + $0x150] sm:$0xff]  ;;  %v221_v22 = vld [vmem:[%s1042_s28 + $0x158] sm:$0xff] }
  0x25   : > { %218 = vst [vmem:[%s1047_s29 + $0xa0] sm:$0xff] %v217_v20  ;;  %v223_v23 = vld [vmem:[%s1042_s28 + $0x160] sm:$0xff]  ;;  %220 = vst [vmem:[%s1047_s29 + $0xa8] sm:$0xff] %v219_v21 }
  0x26   : > { %222 = vst [vmem:[%s1047_s29 + $0xb0] sm:$0xff] %v221_v22  ;;  %224 = vst [vmem:[%s1047_s29 + $0xb8] sm:$0xff] %v223_v23 }
  0x27 PF: > { %p850_p7 = scmp.ge.s32.totalorder %s969_s12, 1  ;;  %p229_p8 = scmp.lt.s32.totalorder %s969_s12, 5 }
  0x29   : > { %p230_p9 = pnand %p850_p7, %p229_p8 }
  0x2a   : > { %s236_s30 = sand.u32 (!%p230_p9), 1, %s945_s6   ;;  %p255_p10 = scmp.lt.s32.totalorder (!%p230_p9), %s957_s9, 1 }
  0x2b   : > { %233 = sbr.rel (%p230_p9) target bundleno = 444 (0x1bc), region = 58  ;;  %p852_p11 = scmp.ne.s32.totalorder (!%p230_p9), %s953_s8, 0 }
  0x2c   : > { %s857_s2 = smul.u32 (!%p230_p9), 192, %s236_s30 }
  0x2e   : > { %s1104_s16 = scalar_lea.vmem (!%p230_p9), [#allocation2], %s857_s2 }
  0x32   : > { %s1335_s9 = smov (!%p255_p10, %s957_s9), 1  ;;  %262 = sbr.rel (%p852_p11) target bundleno = 57 (0x39), region = 66 }
  0x33   : > { %s851_s3 = sshll.u32 %s1335_s9, 3  ;;  %vm263_vm0 = vcmask (!%p852_p11), 15360   ;;  %v971_v24 = vmov (!%p852_p11), 0.0  }
  0x34   : > { %s1102_s15 = scalar_lea.vmem %s1321_s1, %s851_s3 }
  0x35   : > { %264 = vst.msk [vmem:[%s1102_s15] sm:$0xff] (!%p852_p11), %vm263_vm0, %v971_v24 }
  0x39 PF: > { %v268_v25 = vld [vmem:[%s1104_s16 + $0x18] sm:$0xff]  ;;  %vm289_vm1 = vcmask 130048   ;;  %v265_v26 = vld [vmem:[%s1104_s16] sm:$0xff]  ;;  %v266_v30 = vld [vmem:[%s1104_s16 + $0x8] sm:$0xff]  ;;  %vm397_vm2 = vcmask 130112   ;;  %vm404_vm3 = vcmask 195712  }
  0x3a   : > { %v269_v27 = vld [vmem:[%s1104_s16 + $0x20] sm:$0xff]  ;;  %v299_v28 = vsel %vm289_vm1, %v268_v25, 0.0  ;;  %v290_v29 = vsel %vm289_vm1, %v265_v26, 0.0  ;;  %v523_v31 = vmul.f32 %v265_v26, %v265_v26  ;;  %v293_v33 = vsel %vm289_vm1, %v266_v30, 0.0  ;;  %v270_v41 = vld [vmem:[%s1104_s16 + $0x28] sm:$0xff]  ;;  %v267_v42 = vld [vmem:[%s1104_s16 + $0x10] sm:$0xff] }
  0x3b   : > { %300 = vadd.xlane.f32.xlu1 %v299_v28  ;;  %291 = vadd.xlane.f32.xlu0 %v290_v29  ;;  %v302_v32 = vsel %vm289_vm1, %v269_v27, 0.0  ;;  %v524_v34 = vmul.f32 %v266_v30, %v266_v30  ;;  %v526_v35 = vmul.f32 %v268_v25, %v268_v25  ;;  %v527_v38 = vmul.f32 %v269_v27, %v269_v27  ;;  %v272_v45 = vld [vmem:[%s1104_s16 + $0x38] sm:$0xff]  ;;  %v271_v46 = vld [vmem:[%s1104_s16 + $0x30] sm:$0xff]  ;;  %v274_v57 = vld [vmem:[%s1104_s16 + $0x48] sm:$0xff] }
  0x3c   : > { %v547_v37 = vsel %vm289_vm1, %v523_v31, 0.0  ;;  %v305_v43 = vsel %vm289_vm1, %v270_v41, 0.0  ;;  %v296_v44 = vsel %vm289_vm1, %v267_v42, 0.0  ;;  %v311_v47 = vsel %vm289_vm1, %v272_v45, 0.0  ;;  %v273_v58 = vld [vmem:[%s1104_s16 + $0x40] sm:$0xff]  ;;  %v275_v62 = vld [vmem:[%s1104_s16 + $0x50] sm:$0xff] }
  0x3d   : > { %v550_v36 = vsel %vm289_vm1, %v524_v34, 0.0  ;;  %v559_v39 = vsel %vm289_vm1, %v527_v38, 0.0  ;;  %v556_v40 = vsel %vm289_vm1, %v526_v35, 0.0  ;;  %v308_v48 = vsel %vm289_vm1, %v271_v46, 0.0  ;;  %v277_v5 = vld [vmem:[%s1104_s16 + $0x60] sm:$0xff]  ;;  %v276_v6 = vld [vmem:[%s1104_s16 + $0x58] sm:$0xff] }
  0x3e   : > { %v528_v49 = vmul.f32 %v270_v41, %v270_v41  ;;  %v525_v50 = vmul.f32 %v267_v42, %v267_v42  ;;  %v530_v53 = vmul.f32 %v272_v45, %v272_v45  ;;  %v529_v54 = vmul.f32 %v271_v46, %v271_v46  ;;  %v278_v10 = vld [vmem:[%s1104_s16 + $0x68] sm:$0xff]  ;;  %v280_v17 = vld [vmem:[%s1104_s16 + $0x78] sm:$0xff]  ;;  %v279_v18 = vld [vmem:[%s1104_s16 + $0x70] sm:$0xff] }
  0x3f   : > { %303 = vadd.xlane.f32.xlu1 %v302_v32  ;;  %294 = vadd.xlane.f32.xlu0 %v293_v33  ;;  %v317_v59 = vsel %vm289_vm1, %v274_v57, 0.0  ;;  %v314_v60 = vsel %vm289_vm1, %v273_v58, 0.0  ;;  %v531_v61 = vmul.f32 %v273_v58, %v273_v58  ;;  %v320_v0 = vsel %vm289_vm1, %v275_v62, 0.0  ;;  %v281_v22 = vld [vmem:[%s1104_s16 + $0x80] sm:$0xff]  ;;  %v283_v29 = vld [vmem:[%s1104_s16 + $0x90] sm:$0xff]  ;;  %v282_v30 = vld [vmem:[%s1104_s16 + $0x88] sm:$0xff] }
  0x40   : > { %v562_v51 = vsel %vm289_vm1, %v528_v49, 0.0  ;;  %v553_v52 = vsel %vm289_vm1, %v525_v50, 0.0  ;;  %v568_v55 = vsel %vm289_vm1, %v530_v53, 0.0  ;;  %v565_v56 = vsel %vm289_vm1, %v529_v54, 0.0  ;;  %v284_v34 = vld [vmem:[%s1104_s16 + $0x98] sm:$0xff]  ;;  %v286_v41 = vld [vmem:[%s1104_s16 + $0xa8] sm:$0xff] }
  0x41   : > { %v571_v63 = vsel %vm289_vm1, %v531_v61, 0.0  ;;  %v533_v1 = vmul.f32 %v275_v62, %v275_v62  ;;  %v532_v2 = vmul.f32 %v274_v57, %v274_v57  ;;  %v326_v7 = vsel %vm289_vm1, %v277_v5, 0.0  ;;  %v285_v42 = vld [vmem:[%s1104_s16 + $0xa0] sm:$0xff]  ;;  %v287_v46 = vld [vmem:[%s1104_s16 + $0xb0] sm:$0xff] }
  0x42   : > { %v323_v8 = vsel %vm289_vm1, %v276_v6, 0.0  ;;  %v534_v9 = vmul.f32 %v276_v6, %v276_v6  ;;  %v329_v12 = vsel %vm289_vm1, %v278_v10, 0.0  ;;  %v536_v13 = vmul.f32 %v278_v10, %v278_v10 }
  0x43   : > { %551 = vadd.xlane.f32.xlu1 %v550_v36  ;;  %548 = vadd.xlane.f32.xlu0 %v547_v37  ;;  %v577_v3 = vsel %vm289_vm1, %v533_v1, 0.0  ;;  %v574_v4 = vsel %vm289_vm1, %v532_v2, 0.0  ;;  %v535_v14 = vmul.f32 %v277_v5, %v277_v5  ;;  %v335_v19 = vsel %vm289_vm1, %v280_v17, 0.0 }
  0x44   : > { %v580_v11 = vsel %vm289_vm1, %v534_v9, 0.0  ;;  %v586_v15 = vsel %vm289_vm1, %v536_v13, 0.0  ;;  %v332_v20 = vsel %vm289_vm1, %v279_v18, 0.0  ;;  %v537_v21 = vmul.f32 %v279_v18, %v279_v18 }
  0x45   : > { %v583_v16 = vsel %vm289_vm1, %v535_v14, 0.0  ;;  %v338_v24 = vsel %vm289_vm1, %v281_v22, 0.0  ;;  %v539_v25 = vmul.f32 %v281_v22, %v281_v22  ;;  %v538_v26 = vmul.f32 %v280_v17, %v280_v17 }
  0x46   : > { %v589_v23 = vsel %vm289_vm1, %v537_v21, 0.0  ;;  %v344_v31 = vsel %vm289_vm1, %v283_v29, 0.0  ;;  %v341_v32 = vsel %vm289_vm1, %v282_v30, 0.0  ;;  %v540_v33 = vmul.f32 %v282_v30, %v282_v30 }
  0x47   : > { %560 = vadd.xlane.f32.xlu1 %v559_v39  ;;  %557 = vadd.xlane.f32.xlu0 %v556_v40  ;;  %v595_v27 = vsel %vm289_vm1, %v539_v25, 0.0  ;;  %v592_v28 = vsel %vm289_vm1, %v538_v26, 0.0  ;;  %v347_v36 = vsel %vm289_vm1, %v284_v34, 0.0  ;;  %v542_v37 = vmul.f32 %v284_v34, %v284_v34 }
  0x48   : > { %v598_v35 = vsel %vm289_vm1, %v540_v33, 0.0  ;;  %v541_v38 = vmul.f32 %v283_v29, %v283_v29  ;;  %v543_v45 = vmul.f32 %v285_v42, %v285_v42  ;;  %v545_v49 = vmul.f32 %v287_v46, %v287_v46 }
  0x49   : > { %v604_v39 = vsel %vm289_vm1, %v542_v37, 0.0  ;;  %v544_v50 = vmul.f32 %v286_v41, %v286_v41  ;;  %v386_v57 = vlaneseq  ;;  %vm504_vm4 = vcmask 1041409  }
  0x4a   : > { %v601_v40 = vsel %vm289_vm1, %v541_v38, 0.0  ;;  %vm506_vm5 = vcmask 1042434   ;;  %vm508_vm6 = vcmask 1043459   ;;  %vm510_vm7 = vcmask 1044484  }
  0x4b   : > { %306 = vadd.xlane.f32.xlu1 %v305_v43  ;;  %297 = vadd.xlane.f32.xlu0 %v296_v44  ;;  %v353_v43 = vsel %vm289_vm1, %v286_v41, 0.0  ;;  %v350_v44 = vsel %vm289_vm1, %v285_v42, 0.0  ;;  %v610_v53 = vsel %vm289_vm1, %v544_v50, 0.0  ;;  %v387_v58 = vand.u32 127, %v386_v57 }
  0x4c   : > { %vm512_vm8 = vcmask 1045509   ;;  %vm514_vm9 = vcmask 1046534   ;;  %vm516_vm10 = vcmask 1047559   ;;  %vm519_vm11 = vcmask 195584  }
  0x4d   : > { %v399_v13 = vadd.s32 4294967280, %v387_v58  ;;  %vm767_vm12 = vcmask 7168   ;;  %vm770_vm13 = vcmask 15360  }
  0x4f   : > { %312 = vadd.xlane.f32.xlu1 %v311_v47  ;;  %309 = vadd.xlane.f32.xlu0 %v308_v48  ;;  %v607_v47 = vsel %vm289_vm1, %v543_v45, 0.0  ;;  %v356_v48 = vsel %vm289_vm1, %v287_v46, 0.0 }
  0x53   : > { %563 = vadd.xlane.f32.xlu1 %v562_v51  ;;  %554 = vadd.xlane.f32.xlu0 %v553_v52  ;;  %v288_v51 = vld [vmem:[%s1104_s16 + $0xb8] sm:$0xff]  ;;  %v613_v52 = vsel %vm289_vm1, %v545_v49, 0.0 }
  0x54   : > { %v546_v54 = vmul.f32 %v288_v51, %v288_v51 }
  0x57   : > { %569 = vadd.xlane.f32.xlu1 %v568_v55  ;;  %566 = vadd.xlane.f32.xlu0 %v565_v56  ;;  %v616_v55 = vsel %vm289_vm1, %v546_v54, 0.0  ;;  %v359_v56 = vsel %vm289_vm1, %v288_v51, 0.0 }
  0x5b   : > { %318 = vadd.xlane.f32.xlu1 %v317_v59  ;;  %315 = vadd.xlane.f32.xlu0 %v314_v60  ;;  %v389_v59 = vshrl.u32 %v386_v57, 7  ;;  %v392_v60 = vadd.s32 4294967288, %v387_v58 }
  0x5f   : > { %572 = vadd.xlane.f32.xlu1 %v571_v63  ;;  %321 = vadd.xlane.f32.xlu0 %v320_v0  ;;  %v1180_v63 = vsub.s32 %v387_v58, %v389_v59  ;;  %v1182_v0 = vsub.s32 %v392_v60, %v389_v59 }
  0x63   : > { %578 = vadd.xlane.f32.xlu1 %v577_v3  ;;  %575 = vadd.xlane.f32.xlu0 %v574_v4 }
  0x67   : > { %327 = vadd.xlane.f32.xlu1 %v326_v7  ;;  %324 = vadd.xlane.f32.xlu0 %v323_v8 }
  0x6b   : > { %581 = vadd.xlane.f32.xlu1 %v580_v11  ;;  %330 = vadd.xlane.f32.xlu0 %v329_v12 }
  0x6f   : > { %587 = vadd.xlane.f32.xlu1 %v586_v15  ;;  %584 = vadd.xlane.f32.xlu0 %v583_v16 }
  0x73   : > { %336 = vadd.xlane.f32.xlu1 %v335_v19  ;;  %333 = vadd.xlane.f32.xlu0 %v332_v20  ;;  %v1195_v19 = vsub.s32 %v399_v13, %v389_v59 }
  0x77   : > { %590 = vadd.xlane.f32.xlu1 %v589_v23  ;;  %339 = vadd.xlane.f32.xlu0 %v338_v24 }
  0x7b   : > { %596 = vadd.xlane.f32.xlu1 %v595_v27  ;;  %593 = vadd.xlane.f32.xlu0 %v592_v28 }
  0x7f   : > { %345 = vadd.xlane.f32.xlu1 %v344_v31  ;;  %342 = vadd.xlane.f32.xlu0 %v341_v32 }
  0x83   : > { %599 = vadd.xlane.f32.xlu1 %v598_v35  ;;  %348 = vadd.xlane.f32.xlu0 %v347_v36 }
  0x87   : > { %605 = vadd.xlane.f32.xlu1 %v604_v39  ;;  %602 = vadd.xlane.f32.xlu0 %v601_v40 }
  0x8b   : > { %354 = vadd.xlane.f32.xlu1 %v353_v43  ;;  %351 = vadd.xlane.f32.xlu0 %v350_v44 }
  0x8f   : > { %608 = vadd.xlane.f32.xlu1 %v607_v47  ;;  %357 = vadd.xlane.f32.xlu0 %v356_v48 }
  0x93   : > { %614 = vadd.xlane.f32.xlu1 %v613_v52  ;;  %611 = vadd.xlane.f32.xlu0 %v610_v53 }
  0x97   : > { %617 = vadd.xlane.f32.xlu1 %v616_v55  ;;  %360 = vadd.xlane.f32.xlu0 %v359_v56 }
  0xc8   : > { %v301_v61 = vpop.xlane.xlu1 %300  ;;  %v292_v62 = vpop.xlane.xlu0 %291 }
  0xc9   : > { %v409_v3 = vrot.slane %v301_v61, %v1180_v63  ;;  %v391_v4 = vrot.slane %v292_v62, %v1180_v63 }
  0xcc   : > { %v304_v1 = vpop.xlane.xlu1 %303  ;;  %v295_v2 = vpop.xlane.xlu0 %294 }
  0xcd   : > { %v413_v5 = vrot.slane %v304_v1, %v1182_v0  ;;  %v396_v6 = vrot.slane %v295_v2, %v1182_v0 }
  0xcf   : > { %v414_v7 = vsel %vm397_vm2, %v413_v5, %v409_v3  ;;  %v398_v8 = vsel %vm397_vm2, %v396_v6, %v391_v4 }
  0xd0   : > { %v552_v9 = vpop.xlane.xlu1 %551  ;;  %v549_v10 = vpop.xlane.xlu0 %548 }
  0xd1   : > { %v650_v11 = vrot.slane %v552_v9, %v1182_v0  ;;  %v646_v12 = vrot.slane %v549_v10, %v1180_v63 }
  0xd3   : > { %v651_v14 = vsel %vm397_vm2, %v650_v11, %v646_v12 }
  0xd4   : > { %v561_v15 = vpop.xlane.xlu1 %560  ;;  %v558_v16 = vpop.xlane.xlu0 %557 }
  0xd5   : > { %v664_v17 = vrot.slane %v561_v15, %v1182_v0  ;;  %v660_v18 = vrot.slane %v558_v16, %v1180_v63 }
  0xd7   : > { %v665_v20 = vsel %vm397_vm2, %v664_v17, %v660_v18 }
  0xd8   : > { %v307_v21 = vpop.xlane.xlu1 %306  ;;  %v298_v22 = vpop.xlane.xlu0 %297 }
  0xd9   : > { %v418_v23 = vrot.slane %v307_v21, %v1195_v19  ;;  %v403_v24 = vrot.slane %v298_v22, %v1195_v19 }
  0xdb   : > { %v419_v25 = vsel %vm404_vm3, %v418_v23, %v414_v7  ;;  %v405_v26 = vsel %vm404_vm3, %v403_v24, %v398_v8 }
  0xdc   : > { %v505_v27 = vsel %vm504_vm4, %v419_v25, %v405_v26  ;;  %v313_v28 = vpop.xlane.xlu1 %312  ;;  %v310_v29 = vpop.xlane.xlu0 %309 }
  0xdd   : > { %v427_v30 = vrot.slane %v313_v28, %v1182_v0  ;;  %v423_v31 = vrot.slane %v310_v29, %v1180_v63 }
  0xdf   : > { %v428_v32 = vsel %vm397_vm2, %v427_v30, %v423_v31 }
  0xe0   : > { %v564_v33 = vpop.xlane.xlu1 %563  ;;  %v555_v34 = vpop.xlane.xlu0 %554 }
  0xe1   : > { %v669_v35 = vrot.slane %v564_v33, %v1195_v19  ;;  %v655_v36 = vrot.slane %v555_v34, %v1195_v19 }
  0xe3   : > { %v670_v37 = vsel %vm404_vm3, %v669_v35, %v665_v20  ;;  %v656_v38 = vsel %vm404_vm3, %v655_v36, %v651_v14 }
  0xe4   : > { %v755_v39 = vsel %vm504_vm4, %v670_v37, %v656_v38  ;;  %v570_v40 = vpop.xlane.xlu1 %569  ;;  %v567_v41 = vpop.xlane.xlu0 %566 }
  0xe5   : > { %v678_v5 = vrot.slane %v570_v40, %v1182_v0  ;;  %v674_v6 = vrot.slane %v567_v41, %v1180_v63 }
  0xe7   : > { %v679_v13 = vsel %vm397_vm2, %v678_v5, %v674_v6 }
  0xe8   : > { %v319_v42 = vpop.xlane.xlu1 %318  ;;  %v316_v43 = vpop.xlane.xlu0 %315 }
  0xe9   : > { %v432_v44 = vrot.slane %v316_v43, %v1195_v19  ;;  %v437_v12 = vrot.slane %v319_v42, %v1180_v63 }
  0xeb   : > { %v433_v45 = vsel %vm404_vm3, %v432_v44, %v428_v32 }
  0xec   : > { %v507_v46 = vsel %vm506_vm5, %v433_v45, %v505_v27  ;;  %v573_v47 = vpop.xlane.xlu1 %572  ;;  %v322_v48 = vpop.xlane.xlu0 %321 }
  0xed   : > { %v683_v7 = vrot.slane %v573_v47, %v1195_v19  ;;  %v441_v8 = vrot.slane %v322_v48, %v1182_v0 }
  0xef   : > { %v684_v16 = vsel %vm404_vm3, %v683_v7, %v679_v13  ;;  %v442_v17 = vsel %vm397_vm2, %v441_v8, %v437_v12 }
  0xf0   : > { %v579_v49 = vpop.xlane.xlu1 %578  ;;  %v576_v50 = vpop.xlane.xlu0 %575  ;;  %v756_v23 = vsel %vm506_vm5, %v684_v16, %v755_v39 }
  0xf1   : > { %v692_v14 = vrot.slane %v579_v49, %v1182_v0  ;;  %v688_v15 = vrot.slane %v576_v50, %v1180_v63 }
  0xf3   : > { %v693_v24 = vsel %vm397_vm2, %v692_v14, %v688_v15 }
  0xf4   : > { %v328_v51 = vpop.xlane.xlu1 %327  ;;  %v325_v52 = vpop.xlane.xlu0 %324 }
  0xf5   : > { %v446_v11 = vrot.slane %v325_v52, %v1195_v19  ;;  %v451_v25 = vrot.slane %v328_v51, %v1180_v63 }
  0xf7   : > { %v447_v21 = vsel %vm404_vm3, %v446_v11, %v442_v17 }
  0xf8   : > { %v582_v53 = vpop.xlane.xlu1 %581  ;;  %v331_v54 = vpop.xlane.xlu0 %330  ;;  %v509_v26 = vsel %vm508_vm6, %v447_v21, %v507_v46 }
  0xf9   : > { %v697_v22 = vrot.slane %v582_v53, %v1195_v19  ;;  %v455_v27 = vrot.slane %v331_v54, %v1182_v0 }
  0xfb   : > { %v698_v32 = vsel %vm404_vm3, %v697_v22, %v693_v24  ;;  %v456_v44 = vsel %vm397_vm2, %v455_v27, %v451_v25 }
  0xfc   : > { %v588_v55 = vpop.xlane.xlu1 %587  ;;  %v585_v56 = vpop.xlane.xlu0 %584 }
  0xfd   : > { %v706_v28 = vrot.slane %v588_v55, %v1182_v0  ;;  %v702_v29 = vrot.slane %v585_v56, %v1180_v63 }
  0xff   : > { %v707_v45 = vsel %vm397_vm2, %v706_v28, %v702_v29 }
 0x100   : > { %v1214_v57 = vpop.xlane.xlu1 %336  ;;  %v334_v58 = vpop.xlane.xlu0 %333 }
 0x101   : > { %v460_v33 = vrot.slane %v334_v58, %v1195_v19  ;;  %v465_v36 = vrot.slane %v1214_v57, %v1180_v63 }
 0x103   : > { %v461_v50 = vsel %vm404_vm3, %v460_v33, %v456_v44 }
 0x104   : > { %v591_v59 = vpop.xlane.xlu1 %590  ;;  %v340_v60 = vpop.xlane.xlu0 %339  ;;  %v511_v5 = vsel %vm510_vm7, %v461_v50, %v509_v26 }
 0x105   : > { %v711_v34 = vrot.slane %v591_v59, %v1195_v19  ;;  %v469_v35 = vrot.slane %v340_v60, %v1182_v0 }
 0x107   : > { %v712_v51 = vsel %vm404_vm3, %v711_v34, %v707_v45  ;;  %v470_v52 = vsel %vm397_vm2, %v469_v35, %v465_v36 }
 0x108   : > { %v597_v61 = vpop.xlane.xlu1 %596  ;;  %v594_v62 = vpop.xlane.xlu0 %593 }
 0x109   : > { %v720_v37 = vrot.slane %v597_v61, %v1182_v0  ;;  %v716_v38 = vrot.slane %v594_v62, %v1180_v63  ;;  %v757_v62 = vsel %vm508_vm6, %v698_v32, %v756_v23 }
 0x10a   : > { %v758_v6 = vsel %vm510_vm7, %v712_v51, %v757_v62 }
 0x10b   : > { %v721_v54 = vsel %vm397_vm2, %v720_v37, %v716_v38 }
 0x10c   : > { %v1216_v1 = vpop.xlane.xlu1 %345  ;;  %v1218_v2 = vpop.xlane.xlu0 %342 }
 0x10d   : > { %v474_v39 = vrot.slane %v1218_v2, %v1195_v19  ;;  %v479_v53 = vrot.slane %v1216_v1, %v1180_v63 }
 0x10f   : > { %v475_v58 = vsel %vm404_vm3, %v474_v39, %v470_v52 }
 0x110   : > { %v1220_v3 = vpop.xlane.xlu1 %599  ;;  %v1222_v4 = vpop.xlane.xlu0 %348  ;;  %v513_v11 = vsel %vm512_vm8, %v475_v58, %v511_v5 }
 0x111   : > { %v725_v40 = vrot.slane %v1220_v3, %v1195_v19  ;;  %v483_v41 = vrot.slane %v1222_v4, %v1182_v0 }
 0x113   : > { %v726_v59 = vsel %vm404_vm3, %v725_v40, %v721_v54  ;;  %v484_v60 = vsel %vm397_vm2, %v483_v41, %v479_v53 }
 0x114   : > { %v606_v9 = vpop.xlane.xlu1 %605  ;;  %v603_v10 = vpop.xlane.xlu0 %602 }
 0x115   : > { %v734_v42 = vrot.slane %v606_v9, %v1182_v0  ;;  %v730_v43 = vrot.slane %v603_v10, %v1180_v63 }
 0x117   : > { %v735_v61 = vsel %vm397_vm2, %v734_v42, %v730_v43 }
 0x118   : > { %v355_v18 = vpop.xlane.xlu1 %354  ;;  %v352_v20 = vpop.xlane.xlu0 %351 }
 0x119   : > { %v488_v46 = vrot.slane %v352_v20, %v1195_v19  ;;  %v493_v1 = vrot.slane %v355_v18, %v1180_v63  ;;  %v766_v20 = vld [vmem:[%s1102_s15] sm:$0xff] }
 0x11b   : > { %v489_v2 = vsel %vm404_vm3, %v488_v46, %v484_v60 }
 0x11c   : > { %v609_v30 = vpop.xlane.xlu1 %608  ;;  %v358_v31 = vpop.xlane.xlu0 %357  ;;  %v515_v15 = vsel %vm514_vm9, %v489_v2, %v513_v11 }
 0x11d   : > { %v739_v47 = vrot.slane %v609_v30, %v1195_v19  ;;  %v497_v55 = vrot.slane %v358_v31, %v1182_v0 }
 0x11f   : > { %v740_v3 = vsel %vm404_vm3, %v739_v47, %v735_v61  ;;  %v498_v9 = vsel %vm397_vm2, %v497_v55, %v493_v1 }
 0x120   : > { %v615_v48 = vpop.xlane.xlu1 %614  ;;  %v612_v49 = vpop.xlane.xlu0 %611 }
 0x121   : > { %v748_v56 = vrot.slane %v615_v48, %v1182_v0  ;;  %v744_v57 = vrot.slane %v612_v49, %v1180_v63  ;;  %v759_v63 = vsel %vm512_vm8, %v726_v59, %v758_v6 }
 0x122   : > { %v760_v13 = vsel %vm514_vm9, %v740_v3, %v759_v63 }
 0x123   : > { %v749_v10 = vsel %vm397_vm2, %v748_v56, %v744_v57 }
 0x124   : > { %v618_v4 = vpop.xlane.xlu1 %617  ;;  %v361_v0 = vpop.xlane.xlu0 %360 }
 0x125   : > { %v753_v7 = vrot.slane %v618_v4, %v1195_v19  ;;  %v502_v8 = vrot.slane %v361_v0, %v1195_v19 }
 0x127   : > { %v754_v12 = vsel %vm404_vm3, %v753_v7, %v749_v10  ;;  %v503_v14 = vsel %vm404_vm3, %v502_v8, %v498_v9 }
 0x128   : > { %v761_v19 = vsel %vm516_vm10, %v754_v12, %v760_v13  ;;  %v517_v16 = vsel %vm516_vm10, %v503_v14, %v515_v15 }
 0x129   : > { %v763_v17 = vsel %vm519_vm11, %v761_v19, 0.0  ;;  %v520_v18 = vsel %vm519_vm11, %v517_v16, 0.0 }
 0x12a   : > { %764 = vadd.xlane.f32.xlu1 %v763_v17  ;;  %521 = vadd.xlane.f32.xlu0 %v520_v18 }
 0x1b7   : > { %v765_v21 = vpop.xlane.xlu1 %764  ;;  %v522_v22 = vpop.xlane.xlu0 %521 }
 0x1b8   : > { %v768_v23 = vsel %vm767_vm12, %v522_v22, %v765_v21 }
 0x1b9   : > { %v769_v24 = vadd.f32 %v768_v23, %v766_v20 }
 0x1bb   : > { %771 = vst.msk [vmem:[%s1102_s15] sm:$0xff] %vm770_vm13, %v769_v24 }
 0x1bc PF: > { %s11_s12 = sadd.s32 1, %s969_s12   ;;  %s1322_s6 = smov %s949_s7 }
 0x1bd   : > { %p8_p12 = scmp.ge.s32.totalorder %s11_s12, 6   ;;  %s1323_s7 = smov %s1033_s19 }
 0x1be   : > { %s1324_s8 = smov %s961_s10  ;;  %s1325_s9 = smov %s965_s11 }
 0x1bf   : > { %s1326_s10 = smov %s1329_s13  ;;  %s1327_s11 = smov %s1333_s14 }
 0x1c0   :  { %10 = sbr.rel (!%p8_p12) target bundleno = 4 (0x4), region = 101 }

// kernel: spade_forward.3
= control target key start
LH: loop header
LB: loop body
LE: loop exit
PB: predicated region body
PF: predicated region fallthrough
CT: control target
= control target key end

     0   :  { %s7704_s0 = inlined_call_operand.vmem [shape: f32[2,3,3,378], index: 0, kind: input, shape index: {}]   ;;  %s7705_s1 = inlined_call_operand.vmem [shape: f32[2,8,48,16], index: 1, kind: input, shape index: {}]   ;;  %s7706_s2 = inlined_call_operand.vmem [shape: f32[1,324], index: 2, kind: input, shape index: {}]   ;;  %s7707_s3 = inlined_call_operand.vmem [shape: f32[9,4,3], index: 3, kind: input, shape index: {}]   ;;  %s7708_s4 = inlined_call_operand.vmem [shape: f32[4,1], index: 4, kind: input, shape index: {}]   ;;  %s7709_s5 = inlined_call_operand.vmem [shape: f32[9,8,4], index: 5, kind: input, shape index: {}]   ;;  %s7710_s6 = inlined_call_operand.vmem [shape: f32[9,8,4], index: 6, kind: input, shape index: {}]   ;;  %s7711_s7 = inlined_call_operand.vmem [shape: f32[8,1], index: 7, kind: input, shape index: {}]   ;;  %s7712_s8 = inlined_call_operand.vmem [shape: f32[8,1], index: 8, kind: input, shape index: {}]   ;;  %s7713_s9 = inlined_call_operand.vmem [shape: f32[8,1], index: 9, kind: input, shape index: {}]   ;;  %s7714_s10 = inlined_call_operand.vmem [shape: f32[8,1], index: 10, kind: input, shape index: {}]   ;;  %s7715_s11 = inlined_call_operand.vmem [shape: f32[2,8,48,16], index: 11, kind: output, shape index: {}]  }
   0x1   :  { %7725 = sst [smem:[#allocation8_spill]] %s7704_s0 }
   0x2   :  { %7726 = sst [smem:[#allocation9_spill]] %s7705_s1 }
   0x3   :  { %7727 = sst [smem:[#allocation10_spill]] %s7715_s11 }
   0x4   :  { %s6753_s17 = smov 0   ;;  %s6755_s18 = smov 0  }
   0x5   :  { %s6757_s19 = smov 0   ;;  %s6759_s20 = smov 0  }
   0x6   :  { %s6761_s21 = smov 0   ;;  %s6763_s22 = smov 0  }
   0x7   :  { %s6765_s23 = smov 0  }
   0x8 LB: > { %s30_s24 = sadd.s32 1, %s6651_s21  ;;  %s33_s25 = sadd.s32 1, %s6655_s22  ;;  %s6659_s23 = sphi %s6765_s23, %s21_s23   ;;  %s6655_s22 = sphi %s6763_s22, %s7748_s22   ;;  %s6651_s21 = sphi %s6761_s21, %s7747_s21   ;;  %s6647_s20 = sphi %s6759_s20, %s7746_s20   ;;  %s6643_s19 = sphi %s6757_s19, %s7745_s19   ;;  %s6639_s18 = sphi %s6755_s18, %s7744_s18   ;;  %s6635_s17 = sphi %s6753_s17, %s7743_s17  }
   0x9   : > { %p31_p0 = scmp.ge.s32.totalorder %s30_s24, 3  ;;  %s6090_s26 = sadd.s32 4294967295, %s6659_s23  }
   0xa   : > { %p77_p1 = scmp.ne.s32.totalorder %s6639_s18, %s6635_s17  ;;  %p78_p2 = scmp.eq.s32.totalorder %s6659_s23, 0 }
   0xb   : > { %s7750_s24 = smov (%p31_p0, %s30_s24), 0  ;;  %s7752_s25 = smov (!%p31_p0, %s33_s25), %s6655_s22 }
   0xc   : > { %7728 = sst [smem:[#allocation5_spill]] %s7750_s24  ;;  %p35_p3 = scmp.ge.s32.totalorder %s7752_s25, 2 }
   0xd   : > { %p298_p4 = scmp.eq.s32.totalorder %s6090_s26, 5  ;;  %s66_s27 = ssub.s32 %s6651_s21, %s7750_s24 }
   0xe   : > { %p79_p5 = por %p78_p2, %p77_p1  ;;  %s7754_s25 = smov (%p35_p3, %s7752_s25), 0 }
   0xf   : > { %7729 = sst [smem:[#allocation6_spill]] %s7754_s25  ;;  %p6801_p6 = por %p298_p4, %p77_p1 }
  0x10   : > { %s65_s29 = ssub.s32 %s6655_s22, %s7754_s25  ;;  %s70_s12 = sadd.s32 1, %s6639_s18 }
  0x11   : > { %s7730_s28 = scalar_select %p6801_p6, 1, 0 }
  0x12   : > { %s67_s30 = sor.u32 %s66_s27, %s65_s29  ;;  %p6093_p8 = scmp.ge.s32.totalorder %s6659_s23, 6 }
  0x13   : > { %7731 = sst [smem:[#allocation7_spill]] %s7730_s28  ;;  %p68_p7 = scmp.eq.s32.totalorder %s67_s30, 0 }
  0x14   : > { %347 = sbr.rel (%p6093_p8) target bundleno = 45 (0x2d), region = 52 }
  0x15   : > { %s6809_s13 = scalar_select %p68_p7, %s6639_s18, %s70_s12  }
  0x1b   : > { %362 = sbr.rel (!%p79_p5) target bundleno = 45 (0x2d), region = 60  ;;  %s364_s14 = sand.u32 (%p79_p5), 1, %s6639_s18  }
  0x1c   : > { %s6095_s15 = sshll.u32 (%p79_p5), %s6651_s21, 1  ;;  %s6094_s16 = sshll.u32 (%p79_p5), %s364_s14, 7 }
  0x1d   : > { %s6504_s26 = smul.u32 (%p79_p5), 48, %s6655_s22  ;;  %s7732_s1 = sld [smem:[#allocation9_spill]] (%p79_p5) }
  0x1e   : > { %s366_s29 = scalar_lea.vmem (%p79_p5), [#allocation3], %s6094_s16 }
  0x1f   : > { %s369_s24 = sadd.s32 (%p79_p5), %s6504_s26, %s6095_s15 }
  0x20   : > { %s6096_s11 = sshll.u32 (%p79_p5), %s369_s24, 3 }
  0x23   : > { %s6818_s27 = scalar_lea.vmem %s7732_s1, %s6096_s11 }
  0x24   : > { %v429_v0 = vld [vmem:[%s6818_s27] sm:$0xff]  ;;  %v431_v1 = vld [vmem:[%s6818_s27 + $0x8] sm:$0xff]  ;;  %v433_v2 = vld [vmem:[%s6818_s27 + $0x30] sm:$0xff] }
  0x25   : > { %430 = vst [vmem:[%s366_s29] sm:$0xff] %v429_v0  ;;  %432 = vst [vmem:[%s366_s29 + $0x8] sm:$0xff] %v431_v1  ;;  %v435_v3 = vld [vmem:[%s6818_s27 + $0x38] sm:$0xff]  ;;  %v437_v4 = vld [vmem:[%s6818_s27 + $0x60] sm:$0xff] }
  0x26   : > { %434 = vst [vmem:[%s366_s29 + $0x10] sm:$0xff] %v433_v2  ;;  %v439_v5 = vld [vmem:[%s6818_s27 + $0x68] sm:$0xff]  ;;  %436 = vst [vmem:[%s366_s29 + $0x18] sm:$0xff] %v435_v3  ;;  %v441_v6 = vld [vmem:[%s6818_s27 + $0x90] sm:$0xff] }
  0x27   : > { %438 = vst [vmem:[%s366_s29 + $0x20] sm:$0xff] %v437_v4  ;;  %440 = vst [vmem:[%s366_s29 + $0x28] sm:$0xff] %v439_v5  ;;  %v443_v7 = vld [vmem:[%s6818_s27 + $0x98] sm:$0xff]  ;;  %v445_v8 = vld [vmem:[%s6818_s27 + $0xc0] sm:$0xff] }
  0x28   : > { %442 = vst [vmem:[%s366_s29 + $0x30] sm:$0xff] %v441_v6  ;;  %444 = vst [vmem:[%s366_s29 + $0x38] sm:$0xff] %v443_v7  ;;  %v447_v9 = vld [vmem:[%s6818_s27 + $0xc8] sm:$0xff]  ;;  %v449_v10 = vld [vmem:[%s6818_s27 + $0xf0] sm:$0xff] }
  0x29   : > { %446 = vst [vmem:[%s366_s29 + $0x40] sm:$0xff] %v445_v8  ;;  %v451_v11 = vld [vmem:[%s6818_s27 + $0xf8] sm:$0xff]  ;;  %448 = vst [vmem:[%s366_s29 + $0x48] sm:$0xff] %v447_v9  ;;  %v453_v12 = vld [vmem:[%s6818_s27 + $0x120] sm:$0xff] }
  0x2a   : > { %450 = vst [vmem:[%s366_s29 + $0x50] sm:$0xff] %v449_v10  ;;  %452 = vst [vmem:[%s366_s29 + $0x58] sm:$0xff] %v451_v11  ;;  %v455_v13 = vld [vmem:[%s6818_s27 + $0x128] sm:$0xff]  ;;  %v457_v14 = vld [vmem:[%s6818_s27 + $0x150] sm:$0xff] }
  0x2b   : > { %454 = vst [vmem:[%s366_s29 + $0x60] sm:$0xff] %v453_v12  ;;  %456 = vst [vmem:[%s366_s29 + $0x68] sm:$0xff] %v455_v13  ;;  %v459_v15 = vld [vmem:[%s6818_s27 + $0x158] sm:$0xff] }
  0x2c   : > { %458 = vst [vmem:[%s366_s29 + $0x70] sm:$0xff] %v457_v14  ;;  %460 = vst [vmem:[%s366_s29 + $0x78] sm:$0xff] %v459_v15 }
  0x2d PF: > { %p6097_p9 = scmp.ge.s32.totalorder %s6659_s23, 1  ;;  %p465_p10 = scmp.lt.s32.totalorder %s6659_s23, 7 }
  0x2f   : > { %p466_p11 = pnand %p6097_p9, %p465_p10 }
  0x30   : > { %p519_p12 = scmp.lt.s32.totalorder (!%p466_p11), %s6647_s20, 1  ;;  %p521_p13 = scmp.lt.s32.totalorder (!%p466_p11), %s6643_s19, 2  ;;  %v6661_v16 = vmov (!%p466_p11), 0.0   ;;  %vm6662_vm0 = vmmov (!%p466_p11), 0   ;;  %v1997_v20 = vld [vmem:[%s7708_s4] sm:$0xf] (!%p466_p11) }
  0x31   : > { %469 = sbr.rel (%p466_p11) target bundleno = 1093 (0x445), region = 98  ;;  %6321 = vmatprep.subr.mxu1 (!%p466_p11), %v6661_v16  ;;  %2029 = vst [vmem:[#allocation2] sm:$0xf] (!%p466_p11), %v6661_v16  ;;  %622 = vmatprep.mubr.f32.mxu0 (!%p466_p11), %v6661_v16  ;;  %s7733_s0 = sld [smem:[#allocation8_spill]] (!%p466_p11)  ;;  %v6671_v21 = vmov (!%p466_p11), 0   ;;  %vm551_vm1 = vcmask (!%p466_p11), 1042432  }
  0x32   : > { %s472_s26 = sand.u32 (!%p466_p11), 1, %s6635_s17   ;;  %6323 = vmatprep.mubr.msk.f32.mxu1 (!%p466_p11), %vm6662_vm0, %v6661_v16  ;;  %s6663_s29 = smov (!%p466_p11), 127   ;;  %6596 = vset.pattern.permute.xlu0 (!%p466_p11), %v6671_v21  ;;  %vm544_vm2 = vcmask (!%p466_p11), 1039360   ;;  %v6101_v27 = vld [vmem:[%s7707_s3 + $0x4] sm:$0xf] (!%p466_p11)  ;;  %vm547_vm3 = vcmask (!%p466_p11), 23552  }
  0x33   : > { %s6851_s27 = sshll.u32 (!%p466_p11), %s472_s26, 7  ;;  %s7722_s17 = smov (!%p466_p11), 110   ;;  %vm857_vm4 = vcmask (!%p466_p11), 1031168   ;;  %v532_v33 = vld [vmem:[%s7707_s3] sm:$0xf] (!%p466_p11)  ;;  %vm1021_vm5 = vcmask (!%p466_p11), 900096  }
  0x34   : > { %v6112_v38 = vld [vmem:[%s7707_s3 + $0x8] sm:$0xf] (!%p466_p11)  ;;  %v6118_v41 = vld [vmem:[%s7707_s3 + $0xc] sm:$0xf] (!%p466_p11)  ;;  %vm1185_vm6 = vcmask (!%p466_p11), 891904   ;;  %vm1349_vm7 = vcmask (!%p466_p11), 883712  }
  0x35   : > { %v6124_v43 = vld [vmem:[%s7707_s3 + $0x10] sm:$0xf] (!%p466_p11)  ;;  %v6130_v48 = vld [vmem:[%s7707_s3 + $0x14] sm:$0xf] (!%p466_p11)  ;;  %v6136_v55 = vld [vmem:[%s7707_s3 + $0x18] sm:$0xf] (!%p466_p11) }
  0x36   : > { %vm1513_vm8 = vcmask (!%p466_p11), 752640   ;;  %v6142_v58 = vld [vmem:[%s7707_s3 + $0x1c] sm:$0xf] (!%p466_p11)  ;;  %v6148_v62 = vld [vmem:[%s7707_s3 + $0x20] sm:$0xf] (!%p466_p11)  ;;  %vm1677_vm9 = vcmask (!%p466_p11), 744448  }
  0x37   : > { %vm1841_vm10 = vcmask (!%p466_p11), 736256   ;;  %vm2035_vm11 = vcmask (!%p466_p11), 551936   ;;  %vm2037_vm12 = vcmask (!%p466_p11), 618016   ;;  %s7003_s15 = scalar_lea.vmem (!%p466_p11), [#allocation3], %s6851_s27  ;;  %p6154_p0 = scmp.ne.s32.totalorder (!%p466_p11), %s6643_s19, 0 }
  0x38   : > { %s520_s11 = scalar_select %p519_p12, %s6647_s20, 1 }
  0x39   : > { %s522_s24 = scalar_select %p521_p13, %s6643_s19, 2 }
  0x3a   : > { %s6506_s25 = smul.u32 9, %s520_s11  ;;  %s6664_s11 = smov 126   ;;  %vm2043_vm13 = vcmask (!%p6154_p0), 1044472   ;;  %vm2044_vm14 = vcmask (!%p6154_p0), 138244  }
  0x3b   : > { %s6505_s28 = smul.u32 3, %s522_s24  ;;  %s6666_s24 = smov 109   ;;  %vm2045_vm15 = vmor (!%p6154_p0), %vm2044_vm14, %vm2043_vm13 }
  0x3d   : > { %s525_s30 = sadd.s32 %s6506_s25, %s6505_s28  ;;  %s6667_s25 = smov 108  }
  0x3e   : > { %s6100_s12 = sshll.u32 %s525_s30, 2  ;;  %s6668_s28 = smov 92  }
  0x3f   : > { %s527_s16 = scalar_lea.vmem %s7733_s0, %s6100_s12  ;;  %s6669_s30 = smov 91  }
  0x40   : > { %v530_v17 = vld [vmem:[%s527_s16] sm:$0x77]  ;;  %v531_v19 = vld [vmem:[%s527_s16 + $0x8] sm:$0x7]  ;;  %s6670_s12 = smov 90   ;;  %s7006_s16 = scalar_lea.vmem [#allocation4], %s6851_s27 }
  0x41   : > { %538 = vrot.lane.b32.xlu1 %v530_v17, %s6663_s29  ;;  %v537_v18 = vcombine.high %v530_v17, %v530_v17 }
  0x43   : > { %540 = vrot.lane.b32.xlu0 %v537_v18, %s6663_s29 }
  0x45   : > { %853 = vrot.lane.b32.xlu1 %v537_v18, %s6664_s11 }
  0x47   : > { %542 = vrot.lane.b32.xlu0 %v531_v19, %s6663_s29 }
  0x49   : > { %851 = vrot.lane.b32.xlu1 %v530_v17, %s6664_s11 }
  0x4b   : > { %855 = vrot.lane.b32.xlu0 %v531_v19, %s6664_s11 }
  0x4d   : > { %1019 = vrot.lane.b32.xlu1 %v531_v19, %s7722_s17 }
  0x4f   : > { %1017 = vrot.lane.b32.xlu0 %v537_v18, %s7722_s17 }
  0x51   : > { %1181 = vrot.lane.b32.xlu1 %v537_v18, %s6666_s24 }
  0x53   : > { %1015 = vrot.lane.b32.xlu0 %v530_v17, %s7722_s17 }
  0x55   : > { %1179 = vrot.lane.b32.xlu1 %v530_v17, %s6666_s24 }
  0x57   : > { %1183 = vrot.lane.b32.xlu0 %v531_v19, %s6666_s24 }
  0x59   : > { %1347 = vrot.lane.b32.xlu1 %v531_v19, %s6667_s25 }
  0x5b   : > { %1345 = vrot.lane.b32.xlu0 %v537_v18, %s6667_s25 }
  0x5d   : > { %1509 = vrot.lane.b32.xlu1 %v537_v18, %s6668_s28 }
  0x5f   : > { %1343 = vrot.lane.b32.xlu0 %v530_v17, %s6667_s25 }
  0x61   : > { %1507 = vrot.lane.b32.xlu1 %v530_v17, %s6668_s28 }
  0x63   : > { %1511 = vrot.lane.b32.xlu0 %v531_v19, %s6668_s28 }
  0x65   : > { %1675 = vrot.lane.b32.xlu1 %v531_v19, %s6669_s30 }
  0x67   : > { %1673 = vrot.lane.b32.xlu0 %v537_v18, %s6669_s30 }
  0x69   : > { %1837 = vrot.lane.b32.xlu1 %v537_v18, %s6670_s12 }
  0x6b   : > { %1671 = vrot.lane.b32.xlu0 %v530_v17, %s6669_s30 }
  0x6d   : > { %1835 = vrot.lane.b32.xlu1 %v530_v17, %s6670_s12 }
  0x6f   : > { %1839 = vrot.lane.b32.xlu0 %v531_v19, %s6670_s12 }
  0x73   : > { %2000 = vperm.xlu0 %6596, %v1997_v20  }
  0xb3   : > { %v539_v22 = vpop.permute.xlu1 %538 }
  0xb5   : > { %v541_v23 = vpop.permute.xlu0 %540 }
  0xb6   : > { %v545_v28 = vsel %vm544_vm2, %v539_v22, %v541_v23 }
  0xb7   : > { %v854_v24 = vpop.permute.xlu1 %853 }
  0xb9   : > { %v543_v25 = vpop.permute.xlu0 %542 }
  0xba   : > { %6322 = vmatpush3.msk.msra.mxu1 %vm551_vm1, %v543_v25  ;;  %v546_v26 = vsel %vm544_vm2, %v541_v23, %v543_v25 }
  0xbb   : > { %6102 = vmatprep.subr.msk.mxu0 %vm551_vm1, %v546_v26  ;;  %v852_v29 = vpop.permute.xlu1 %851  ;;  %6324 = vmatmul.mubr.msk.f32.vlgmr.msra.gmra.mrb[0].mxu1 %vm547_vm3, %v6101_v27 }
  0xbc   : > { %6103 = vmatpush1.msk.msra.mxu0 %vm551_vm1, %v545_v28  ;;  %6326 = vmatprep.subr.mxu1 %v6661_v16  ;;  %v858_v35 = vsel %vm857_vm4, %v852_v29, %v854_v24  ;;  %v2011_v29 = vlaneseq }
  0xbd   : > { %6104 = vmatmul.mubr.msk.f32.vlgmr.msra.gmra.mrb[0].mxu0 %vm547_vm3, %v6101_v27  ;;  %6107 = vmatprep.subr.msk.mxu0 %vm551_vm1, %v537_v18  ;;  %v856_v30 = vpop.permute.xlu0 %855 }
  0xbe   : > { %6108 = vmatpush1.msk.msra.mxu0 %vm551_vm1, %v530_v17  ;;  %v859_v31 = vsel %vm857_vm4, %v854_v24, %v856_v30  ;;  %6327 = vmatpush3.msk.msra.mxu1 %vm551_vm1, %v531_v19 }
  0xbf   : > { %6113 = vmatprep.subr.msk.mxu0 %vm551_vm1, %v859_v31  ;;  %6328 = vmatprep.mubr.msk.f32.mxu1 %vm6662_vm0, %v6661_v16  ;;  %v1020_v32 = vpop.permute.xlu1 %1019 }
  0xc0   : > { %6331 = vmatprep.subr.mxu1 %v6661_v16  ;;  %772 = vmatprep.mubr.f32.mxu0 %v6661_v16 }
  0xc1   : > { %6329 = vmatmul.mubr.msk.f32.vlgmr.msra.gmra.mrb[2].mxu1 %vm547_vm3, %v532_v33  ;;  %v1018_v34 = vpop.permute.xlu0 %1017 }
  0xc2   : > { %6332 = vmatpush3.msk.msra.mxu1 %vm551_vm1, %v856_v30  ;;  %6333 = vmatprep.mubr.msk.f32.mxu1 %vm6662_vm0, %v6661_v16  ;;  %v1023_v37 = vsel %vm1021_vm5, %v1018_v34, %v1020_v32 }
  0xc3   : > { %6336 = vmatprep.subr.mxu1 %v6661_v16  ;;  %v1182_v36 = vpop.permute.xlu1 %1181 }
  0xc5   : > { %6109 = vmatmul.mubr.msk.f32.vlgmr.msra.gmra.mrb[0].mxu0 %vm547_vm3, %v532_v33  ;;  %v1016_v39 = vpop.permute.xlu0 %1015  ;;  %6334 = vmatmul.mubr.msk.f32.vlgmr.msra.gmra.mrb[4].mxu1 %vm547_vm3, %v6112_v38  ;;  %v6990_v33 = vshrl.u32 %v2011_v29, 7 }
  0xc6   : > { %6114 = vmatpush1.msk.msra.mxu0 %vm551_vm1, %v858_v35  ;;  %933 = vmatprep.mubr.f32.mxu0 %v6661_v16  ;;  %v1022_v44 = vsel %vm1021_vm5, %v1016_v39, %v1018_v34 }
  0xc7   : > { %6119 = vmatprep.subr.msk.mxu0 %vm551_vm1, %v1023_v37  ;;  %6337 = vmatpush3.msk.msra.mxu1 %vm551_vm1, %v1020_v32  ;;  %v1180_v40 = vpop.permute.xlu1 %1179  ;;  %v2021_v34 = vsub.s32 2, %v6990_v33 }
  0xc8   : > { %6338 = vmatprep.mubr.msk.f32.mxu1 %vm6662_vm0, %v6661_v16  ;;  %6341 = vmatprep.subr.mxu1 %v6661_v16  ;;  %v1186_v51 = vsel %vm1185_vm6, %v1180_v40, %v1182_v36 }
  0xc9   : > { %v1184_v42 = vpop.permute.xlu0 %1183  ;;  %6339 = vmatmul.mubr.msk.f32.vlgmr.msra.gmra.mrb[6].mxu1 %vm547_vm3, %v6118_v41 }
  0xca   : > { %6342 = vmatpush3.msk.msra.mxu1 %vm551_vm1, %v1184_v42  ;;  %6343 = vmatprep.mubr.msk.f32.mxu1 %vm6662_vm0, %v6661_v16  ;;  %v1187_v46 = vsel %vm1185_vm6, %v1182_v36, %v1184_v42  ;;  %v2009_v36 = vld [vmem:[%s7706_s2] sm:$0x7] }
  0xcb   : > { %v1348_v45 = vpop.permute.xlu1 %1347  ;;  %6346 = vmatprep.subr.mxu1 %v6661_v16  ;;  %v2022_v40 = vrot.slane %v2009_v36, %v2021_v34 }
  0xcd   : > { %6115 = vmatmul.mubr.msk.f32.vlgmr.msra.gmra.mrb[0].mxu0 %vm547_vm3, %v6112_v38  ;;  %v1346_v47 = vpop.permute.xlu0 %1345  ;;  %6344 = vmatmul.mubr.msk.f32.vlgmr.msra.gmra.mrb[8].mxu1 %vm547_vm3, %v6124_v43 }
  0xce   : > { %6120 = vmatpush1.msk.msra.mxu0 %vm551_vm1, %v1022_v44  ;;  %1097 = vmatprep.mubr.f32.mxu0 %v6661_v16  ;;  %v1351_v53 = vsel %vm1349_vm7, %v1346_v47, %v1348_v45  ;;  %v6998_v44 = vsub.s32 0, %v6990_v33 }
  0xcf   : > { %6125 = vmatprep.subr.msk.mxu0 %vm551_vm1, %v1187_v46  ;;  %v1510_v49 = vpop.permute.xlu1 %1509  ;;  %6347 = vmatpush3.msk.msra.mxu1 %vm551_vm1, %v1348_v45  ;;  %v2017_v45 = vsub.s32 1, %v6990_v33 }
  0xd0   : > { %6348 = vmatprep.mubr.msk.f32.mxu1 %vm6662_vm0, %v6661_v16  ;;  %6351 = vmatprep.subr.mxu1 %v6661_v16 }
  0xd1   : > { %v1344_v50 = vpop.permute.xlu0 %1343  ;;  %6349 = vmatmul.mubr.msk.f32.vlgmr.msra.gmra.mrb[10].mxu1 %vm547_vm3, %v6130_v48 }
  0xd2   : > { %6353 = vmatprep.mubr.msk.f32.mxu1 %vm6662_vm0, %v6661_v16  ;;  %v1350_v59 = vsel %vm1349_vm7, %v1344_v50, %v1346_v47 }
  0xd3   : > { %v1508_v52 = vpop.permute.xlu1 %1507 }
  0xd4   : > { %v1514_v0 = vsel %vm1513_vm8, %v1508_v52, %v1510_v49 }
  0xd5   : > { %6121 = vmatmul.mubr.msk.f32.vlgmr.msra.gmra.mrb[0].mxu0 %vm547_vm3, %v6118_v41  ;;  %v1512_v54 = vpop.permute.xlu0 %1511 }
  0xd6   : > { %6126 = vmatpush1.msk.msra.mxu0 %vm551_vm1, %v1186_v51  ;;  %1261 = vmatprep.mubr.f32.mxu0 %v6661_v16  ;;  %v1515_v60 = vsel %vm1513_vm8, %v1510_v49, %v1512_v54  ;;  %v2018_v51 = vrot.slane %v2009_v36, %v2017_v45 }
  0xd7   : > { %6131 = vmatprep.subr.msk.mxu0 %vm551_vm1, %v1351_v53  ;;  %6352 = vmatpush3.msk.msra.mxu1 %vm551_vm1, %v1512_v54  ;;  %v1676_v56 = vpop.permute.xlu1 %1675 }
  0xd8   : > { %6354 = vmatmul.mubr.msk.f32.vlgmr.msra.gmra.mrb[12].mxu1 %vm547_vm3, %v6136_v55  ;;  %6356 = vmatprep.subr.mxu1 %v6661_v16 }
  0xd9   : > { %v1674_v57 = vpop.permute.xlu0 %1673  ;;  %6357 = vmatpush3.msk.msra.mxu1 %vm551_vm1, %v1676_v56  ;;  %6358 = vmatprep.mubr.msk.f32.mxu1 %vm6662_vm0, %v6661_v16 }
  0xda   : > { %6361 = vmatprep.subr.mxu1 %v6661_v16  ;;  %v1679_v1 = vsel %vm1677_vm9, %v1674_v57, %v1676_v56 }
  0xdb   : > { %v1838_v2 = vpop.permute.xlu1 %1837 }
  0xdc   : > { %6359 = vmatmul.mubr.msk.f32.vlgmr.msra.gmra.mrb[14].mxu1 %vm547_vm3, %v6142_v58 }
  0xdd   : > { %6127 = vmatmul.mubr.msk.f32.vlgmr.msra.gmra.mrb[0].mxu0 %vm547_vm3, %v6124_v43  ;;  %v1672_v61 = vpop.permute.xlu0 %1671  ;;  %6363 = vmatprep.mubr.msk.f32.mxu1 %vm6662_vm0, %v6661_v16 }
  0xde   : > { %6132 = vmatpush1.msk.msra.mxu0 %vm551_vm1, %v1350_v59  ;;  %1425 = vmatprep.mubr.f32.mxu0 %v6661_v16  ;;  %v1678_v3 = vsel %vm1677_vm9, %v1672_v61, %v1674_v57  ;;  %v6672_v57 = vmov (!%p6154_p0), 0.0  }
  0xdf   : > { %6137 = vmatprep.subr.msk.mxu0 %vm551_vm1, %v1515_v60  ;;  %v1836_v5 = vpop.permute.xlu1 %1835 }
  0xe0   : > { %v1842_v6 = vsel %vm1841_vm10, %v1836_v5, %v1838_v2 }
  0xe1   : > { %v1840_v63 = vpop.permute.xlu0 %1839 }
  0xe2   : > { %6362 = vmatpush3.msk.msra.mxu1 %vm551_vm1, %v1840_v63  ;;  %v1843_v4 = vsel %vm1841_vm10, %v1838_v2, %v1840_v63 }
  0xe3   : > { %6364 = vmatmul.mubr.msk.f32.vlgmr.msra.gmra.mrb[16].mxu1 %vm547_vm3, %v6148_v62 }
  0xe5   : > { %6133 = vmatmul.mubr.msk.f32.vlgmr.msra.gmra.mrb[0].mxu0 %vm547_vm3, %v6130_v48  ;;  %v2014_v48 = vrot.slane %v2009_v36, %v6998_v44 }
  0xe6   : > { %6138 = vmatpush1.msk.msra.mxu0 %vm551_vm1, %v1514_v0  ;;  %1589 = vmatprep.mubr.f32.mxu0 %v6661_v16 }
  0xe7   : > { %6143 = vmatprep.subr.msk.mxu0 %vm551_vm1, %v1679_v1 }
  0xed   : > { %6139 = vmatmul.mubr.msk.f32.vlgmr.msra.gmra.mrb[0].mxu0 %vm547_vm3, %v6136_v55 }
  0xee   : > { %6144 = vmatpush1.msk.msra.mxu0 %vm551_vm1, %v1678_v3  ;;  %1753 = vmatprep.mubr.f32.mxu0 %v6661_v16 }
  0xef   : > { %6149 = vmatprep.subr.msk.mxu0 %vm551_vm1, %v1843_v4 }
  0xf2   : > { %v2001_v37 = vpop.permute.xlu0 %2000 }
  0xf5   : > { %6145 = vmatmul.mubr.msk.f32.vlgmr.msra.gmra.mrb[0].mxu0 %vm547_vm3, %v6142_v58 }
  0xf6   : > { %6150 = vmatpush1.msk.msra.mxu0 %vm551_vm1, %v1842_v6  ;;  %1917 = vmatprep.mubr.f32.mxu0 %v6661_v16 }
  0xfd   : > { %6151 = vmatmul.mubr.msk.f32.vlgmr.msra.gmra.mrb[0].mxu0 %vm547_vm3, %v6148_v62 }
 0x18e   : > { %v695_v7 = vpop.f32.mrb[0].mxu1 }
 0x18f   : > { %v6325_v8 = vpop.f32.mrb[1].mxu1 }
 0x194   : > { %v845_v9 = vpop.f32.mrb[2].mxu1 }
 0x195   : > { %v846_v10 = vadd.f32 %v845_v9, %v695_v7  ;;  %v6330_v11 = vpop.f32.mrb[3].mxu1 }
 0x198   : > { %v1006_v12 = vpop.f32.mrb[4].mxu1 }
 0x199   : > { %v1012_v13 = vadd.f32 %v1006_v12, %v846_v10  ;;  %v6335_v14 = vpop.f32.mrb[5].mxu1 }
 0x19c   : > { %v1170_v15 = vpop.f32.mrb[6].mxu1 }
 0x19d   : > { %v1176_v17 = vadd.f32 %v1170_v15, %v1012_v13  ;;  %v6340_v18 = vpop.f32.mrb[7].mxu1 }
 0x1a0   : > { %v1334_v19 = vpop.f32.mrb[8].mxu1 }
 0x1a1   : > { %v1340_v20 = vadd.f32 %v1334_v19, %v1176_v17  ;;  %v6345_v22 = vpop.f32.mrb[9].mxu1 }
 0x1a4   : > { %v1498_v23 = vpop.f32.mrb[10].mxu1 }
 0x1a5   : > { %v1504_v24 = vadd.f32 %v1498_v23, %v1340_v20  ;;  %v6350_v25 = vpop.f32.mrb[11].mxu1 }
 0x1ab   : > { %v1662_v26 = vpop.f32.mrb[12].mxu1 }
 0x1ac   : > { %v1668_v27 = vadd.f32 %v1662_v26, %v1504_v24  ;;  %v6355_v28 = vpop.f32.mrb[13].mxu1 }
 0x1af   : > { %v1826_v30 = vpop.f32.mrb[14].mxu1 }
 0x1b0   : > { %v1832_v31 = vadd.f32 %v1826_v30, %v1668_v27  ;;  %v6360_v32 = vpop.f32.mrb[15].mxu1 }
 0x1b6   : > { %v1990_v35 = vpop.f32.mrb[16].mxu1 }
 0x1b7   : > { %v1996_v38 = vadd.f32 %v1990_v35, %v1832_v31  ;;  %v6365_v39 = vpop.f32.mrb[17].mxu1 }
 0x1b9   : > { %v2005_v41 = vadd.f32 %v2001_v37, %v1996_v38 }
 0x1bb   : > { %v2008_v42 = vmax.f32 %v2005_v41, 0.0 }
 0x1bd   : > { %v2028_v43 = vmul.f32 %v2022_v40, %v2008_v42 }
 0x1bf   : > { %2036 = vst.msk [vmem:[#allocation2 + $0xc] sm:$0xf] %vm2035_vm11, %v2028_v43 }
 0x1c0   : > { %2038 = vst.msk [vmem:[#allocation2 + $0xc] sm:$0xf] %vm2037_vm12, %v6661_v16 }
 0x1d0   : > { %v1919_v46 = vpop.f32.mrb[0].mxu0 }
 0x1d1   : > { %v2003_v47 = vadd.f32 %v2001_v37, %v1919_v46  ;;  %v1921_v49 = vpop.f32.mrb[1].mxu0 }
 0x1d2   : > { %v2004_v50 = vadd.f32 %v2001_v37, %v1921_v49 }
 0x1d3   : > { %v2006_v52 = vmax.f32 %v2003_v47, 0.0 }
 0x1d4   : > { %v2007_v53 = vmax.f32 %v2004_v50, 0.0  ;;  %2042 = sbr.rel (%p6154_p0) target bundleno = 476 (0x1dc), region = 106 }
 0x1d5   : > { %v2026_v54 = vmul.f32 %v2014_v48, %v2006_v52 }
 0x1d6   : > { %v2027_v55 = vmul.f32 %v2018_v51, %v2007_v53 }
 0x1d8   : > { %v2032_v56 = vcombine.low %v2026_v54, %v2027_v55 }
 0x1da   : > { %2034 = vst [vmem:[#allocation2 + $0x4] sm:$0xff] %v2032_v56 }
 0x1db   : > { %2046 = vst.msk [vmem:[#allocation2] sm:$0xff] %vm2045_vm15, %v6672_v57 }
 0x1dc PF: > { %p6155_p1 = scmp.ne.s32.totalorder %s6643_s19, 2 }
 0x1dd   : > { %vm2051_vm1 = vcmask (!%p6155_p1), 544136   ;;  %v6673_v58 = vmov (!%p6155_p1), 0.0  }
 0x1de   : > { %2050 = sbr.rel (%p6155_p1) target bundleno = 485 (0x1e5), region = 110  ;;  %2052 = vst.msk [vmem:[#allocation2 + $0xc] sm:$0xf] (!%p6155_p1), %vm2051_vm1, %v6673_v58 }
 0x1e5 PF: > { %v2053_v59 = vld [vmem:[#allocation2] sm:$0xff]  ;;  %v2054_v60 = vld [vmem:[#allocation2 + $0x8] sm:$0xff]  ;;  %vm2068_vm3 = vcmask 1043456   ;;  %2139 = vmatprep.mubr.f32.mxu0 %v6661_v16  ;;  %6366 = vmatprep.subr.mxu1 %v6661_v16  ;;  %s6674_s27 = smov 1   ;;  %vm2064_vm4 = vcmask 31744   ;;  %s6675_s25 = smov 111  }
 0x1e6   : > { %v7010_v61 = vld [vmem:[#allocation2 + $0x4] sm:$0xff]  ;;  %2220 = vrot.lane.b32.xlu1 %v2053_v59, %s6674_s27  ;;  %v2218_v62 = vcombine.high %v2053_v59, %v2053_v59  ;;  %v2219_v63 = vcombine.high %v2054_v60, %v2054_v60  ;;  %6368 = vmatprep.mubr.msk.f32.mxu1 %vm6662_vm0, %v6661_v16  ;;  %v7029_v2 = vld [vmem:[#allocation2 + $0xc] sm:$0xf]  ;;  %v6677_v10 = vmov 1966171168   ;;  %vm2228_vm7 = vcmask 7168  }
 0x1e7   : > { %v7016_v0 = vcombine.high %v7010_v61, %v7010_v61  ;;  %v6156_v1 = vld [vmem:[%s7709_s5 + $0x8] sm:$0xff]  ;;  %6598 = vset.pattern.permute.xlu1 %v6671_v21  ;;  %6599 = vset.pattern.permute.xlu0 %v6671_v21  ;;  %v4893_v9 = vld [vmem:[%s7711_s7] sm:$0xff]  ;;  %v5584_v11 = vunpack.c.l.s4 %v6677_v10  ;;  %vm3002_vm10 = vcmask 908288   ;;  %s7723_s12 = smov 2   ;;  %s6683_s14 = smov 56  }
 0x1e8   : > { %2222 = vrot.lane.b32.xlu0 %v2218_v62, %s6674_s27  ;;  %v2673_v3 = vld [vmem:[#allocation2 + $0xc] sm:$0xf]  ;;  %6367 = vmatpush3.msk.msra.mxu1 %vm2068_vm3, %v7029_v2  ;;  %v5229_v12 = vld [vmem:[%s7712_s8] sm:$0xff]  ;;  %s6685_s26 = smov 112   ;;  %s6686_s11 = smov 76  }
 0x1e9   : > { %6157 = vmatprep.subr.msk.mxu0 %vm2068_vm3, %v7016_v0  ;;  %6369 = vmatmul.mubr.msk.f32.vlgmr.msra.gmra.mrb[18].mxu1 %vm2064_vm4, %v6156_v1  ;;  %v2990_v21 = vld [vmem:[#allocation2 + $0xc] sm:$0xf]  ;;  %v5580_v13 = vld [vmem:[%s7713_s9] sm:$0xff]  ;;  %v5585_v14 = vunpack.c.0.s8 %v5584_v11  ;;  %v6178_v11 = vld [vmem:[%s7709_s5 + $0x10] sm:$0xff]  ;;  %s7735_s0 = smov 2   ;;  %s7736_s1 = smov 74  }
 0x1ea   : > { %6158 = vmatpush1.msk.msra.mxu0 %vm2068_vm3, %v7010_v61  ;;  %2226 = vrot.lane.b32.xlu1 %v2219_v63, %s6674_s27  ;;  %v3308_v4 = vld [vmem:[#allocation2 + $0xc] sm:$0xf]  ;;  %v5582_v15 = vcombine.high %v5580_v13, %v5580_v13  ;;  %v5711_v25 = vld [vmem:[%s7714_s10] sm:$0xff] }
 0x1eb   : > { %6159 = vmatmul.mubr.msk.f32.vlgmr.msra.gmra.mrb[2].mxu0 %vm2064_vm4, %v6156_v1  ;;  %6371 = vmatprep.subr.mxu1 %v6661_v16  ;;  %v3625_v5 = vld [vmem:[#allocation2 + $0xc] sm:$0xf]  ;;  %v5588_v17 = vsub.s32 %v5585_v14, %v6990_v33  ;;  %v5713_v41 = vcombine.high %v5711_v25, %v5711_v25 }
 0x1ec   : > { %2305 = vmatprep.mubr.f32.mxu0 %v6661_v16  ;;  %2224 = vrot.lane.b32.xlu0 %v2054_v60, %s6674_s27  ;;  %v3942_v6 = vld [vmem:[#allocation2 + $0xc] sm:$0xf]  ;;  %s6684_s27 = smov 20  }
 0x1ed   : > { %6373 = vmatprep.mubr.msk.f32.mxu1 %vm6662_vm0, %v6661_v16  ;;  %v4260_v7 = vld [vmem:[#allocation2 + $0xc] sm:$0xf]  ;;  %v5589_v18 = vrot.slane %v5580_v13, %v5588_v17  ;;  %v5596_v19 = vrot.slane %v5582_v15, %v5588_v17  ;;  %v5720_v34 = vrot.slane %v5711_v25, %v5588_v17  ;;  %v5727_v47 = vrot.slane %v5713_v41, %v5588_v17  ;;  %v6184_v15 = vld [vmem:[%s7710_s6 + $0x10] sm:$0xff] }
 0x1ee   : > { %2683 = vrot.lane.b32.xlu1 %v2673_v3, %s6663_s29  ;;  %v4577_v8 = vld [vmem:[#allocation2 + $0xc] sm:$0xf] }
 0x1ef   : > { %v5597_v20 = vcombine.high %v5589_v18, %v5589_v18  ;;  %v5605_v22 = vrot.slane %v5589_v18, %v5588_v17  ;;  %v5598_v24 = vcombine.high %v5596_v19, %v5596_v19  ;;  %v5612_v30 = vrot.slane %v5596_v19, %v5588_v17  ;;  %v6190_v19 = vld [vmem:[%s7709_s5 + $0x18] sm:$0xff] }
 0x1f0   : > { %2681 = vrot.lane.b32.xlu0 %v7016_v0, %s6663_s29  ;;  %v5728_v40 = vcombine.high %v5720_v34, %v5720_v34  ;;  %v5736_v43 = vrot.slane %v5720_v34, %v5588_v17  ;;  %v5729_v52 = vcombine.high %v5727_v47, %v5727_v47  ;;  %v5743_v54 = vrot.slane %v5727_v47, %v5588_v17 }
 0x1f1   : > { %v5619_v23 = vrot.slane %v5597_v20, %v5588_v17  ;;  %v5634_v26 = vrot.slane %v5605_v22, %v6998_v44  ;;  %v5627_v27 = vcombine.high %v5605_v22, %v5605_v22  ;;  %v5626_v32 = vrot.slane %v5598_v24, %v5588_v17  ;;  %v6196_v24 = vld [vmem:[%s7710_s6 + $0x18] sm:$0xff] }
 0x1f2   : > { %2998 = vrot.lane.b32.xlu1 %v7016_v0, %s6675_s25  ;;  %v5650_v36 = vrot.slane %v5612_v30, %v6998_v44  ;;  %v5628_v37 = vcombine.high %v5612_v30, %v5612_v30  ;;  %v5750_v46 = vrot.slane %v5728_v40, %v5588_v17  ;;  %v5765_v48 = vrot.slane %v5736_v43, %v6998_v44 }
 0x1f3   : > { %v5638_v28 = vrot.slane %v5619_v23, %v6998_v44  ;;  %v5629_v29 = vcombine.high %v5619_v23, %v5619_v23  ;;  %v5642_v35 = vrot.slane %v5627_v27, %v6998_v44  ;;  %v5654_v38 = vrot.slane %v5626_v32, %v6998_v44  ;;  %v6202_v27 = vld [vmem:[%s7709_s5 + $0x20] sm:$0xff] }
 0x1f4   : > { %2679 = vrot.lane.b32.xlu0 %v7010_v61, %s6663_s29  ;;  %s6676_s29 = smov 93   ;;  %v5630_v39 = vcombine.high %v5626_v32, %v5626_v32  ;;  %v5658_v42 = vrot.slane %v5628_v37, %v6998_v44  ;;  %v5758_v49 = vcombine.high %v5736_v43, %v5736_v43  ;;  %v5769_v50 = vrot.slane %v5750_v46, %v6998_v44 }
 0x1f5   : > { %v5646_v31 = vrot.slane %v5629_v29, %v6998_v44  ;;  %v5760_v51 = vcombine.high %v5750_v46, %v5750_v46  ;;  %v5757_v56 = vrot.slane %v5729_v52, %v5588_v17  ;;  %v5781_v57 = vrot.slane %v5743_v54, %v6998_v44  ;;  %v6232_v46 = vld [vmem:[%s7710_s6 + $0x30] sm:$0xff] }
 0x1f6   : > { %2996 = vrot.lane.b32.xlu1 %v7010_v61, %s6675_s25  ;;  %v5662_v45 = vrot.slane %v5630_v39, %v6998_v44  ;;  %v5773_v53 = vrot.slane %v5758_v49, %v6998_v44  ;;  %v5759_v58 = vcombine.high %v5743_v54, %v5743_v54  ;;  %v6220_v39 = vld [vmem:[%s7710_s6 + $0x28] sm:$0xff] }
 0x1f7   : > { %v5777_v55 = vrot.slane %v5760_v51, %v6998_v44  ;;  %v5785_v59 = vrot.slane %v5757_v56, %v6998_v44  ;;  %v5761_v60 = vcombine.high %v5757_v56, %v5757_v56 }
 0x1f8   : > { %3000 = vrot.lane.b32.xlu0 %v2990_v21, %s6675_s25  ;;  %v5789_v62 = vrot.slane %v5759_v58, %v6998_v44  ;;  %s6679_s25 = smov 4  }
 0x1f9   : > { %v5793_v63 = vrot.slane %v5761_v60, %v6998_v44  ;;  %v6167_v44 = vld [vmem:[%s7710_s6 + $0x8] sm:$0xff] }
 0x1fa   : > { %3318 = vrot.lane.b32.xlu1 %v3308_v4, %s7722_s17 }
 0x1fc   : > { %3316 = vrot.lane.b32.xlu0 %v7016_v0, %s7722_s17 }
 0x1fe   : > { %3633 = vrot.lane.b32.xlu1 %v7016_v0, %s6666_s24 }
 0x200   : > { %3314 = vrot.lane.b32.xlu0 %v7010_v61, %s7722_s17 }
 0x202   : > { %3631 = vrot.lane.b32.xlu1 %v7010_v61, %s6666_s24 }
 0x204   : > { %3635 = vrot.lane.b32.xlu0 %v3625_v5, %s6666_s24  ;;  %v2055_v5 = vld [vmem:[%s7709_s5] sm:$0xff]  ;;  %s7720_s24 = smov 38  }
 0x206   : > { %3952 = vrot.lane.b32.xlu1 %v3942_v6, %s6676_s29 }
 0x208   : > { %3950 = vrot.lane.b32.xlu0 %v7016_v0, %s6676_s29 }
 0x20a   : > { %4268 = vrot.lane.b32.xlu1 %v7016_v0, %s6668_s28 }
 0x20c   : > { %3948 = vrot.lane.b32.xlu0 %v7010_v61, %s6676_s29  ;;  %s7721_s29 = smov 74  }
 0x20e   : > { %4266 = vrot.lane.b32.xlu1 %v7010_v61, %s6668_s28 }
 0x210   : > { %4270 = vrot.lane.b32.xlu0 %v4260_v7, %s6668_s28 }
 0x212   : > { %4587 = vrot.lane.b32.xlu1 %v4577_v8, %s6669_s30 }
 0x214   : > { %4585 = vrot.lane.b32.xlu0 %v7016_v0, %s6669_s30 }
 0x216   : > { %4896 = vperm.xlu1 %6598, %v4893_v9  }
 0x218   : > { %4583 = vrot.lane.b32.xlu0 %v7010_v61, %s6669_s30  ;;  %s7719_s30 = smov 114  }
 0x21a   : > { %5668 = vperm.xlu1 %6598, %v5638_v28  }
 0x21c   : > { %5232 = vperm.xlu0 %6599, %v5229_v12  }
 0x21e   : > { %5676 = vperm.xlu1 %6598, %v5646_v31   ;;  %v6208_v31 = vld [vmem:[%s7710_s6 + $0x20] sm:$0xff] }
 0x220   : > { %5664 = vperm.xlu0 %6599, %v5634_v26  }
 0x222   : > { %5684 = vperm.xlu1 %6598, %v5654_v38  }
 0x224   : > { %5672 = vperm.xlu0 %6599, %v5642_v35   ;;  %v6214_v35 = vld [vmem:[%s7709_s5 + $0x28] sm:$0xff] }
 0x226   : > { %5692 = vperm.xlu1 %6598, %v5662_v45  }
 0x228   : > { %5680 = vperm.xlu0 %6599, %v5650_v36  }
 0x22a   : > { %5799 = vperm.xlu1 %6598, %v5769_v50   ;;  %v6238_v50 = vld [vmem:[%s7709_s5 + $0x38] sm:$0xff] }
 0x22c   : > { %5688 = vperm.xlu0 %6599, %v5658_v42   ;;  %v6226_v42 = vld [vmem:[%s7709_s5 + $0x30] sm:$0xff] }
 0x22e   : > { %5807 = vperm.xlu1 %6598, %v5777_v55  }
 0x230   : > { %5795 = vperm.xlu0 %6599, %v5765_v48  }
 0x232   : > { %5815 = vperm.xlu1 %6598, %v5785_v59   ;;  %v6256_v59 = vld [vmem:[%s7710_s6 + $0x40] sm:$0xff] }
 0x234   : > { %5803 = vperm.xlu0 %6599, %v5773_v53   ;;  %v6244_v53 = vld [vmem:[%s7710_s6 + $0x38] sm:$0xff] }
 0x236   : > { %5823 = vperm.xlu1 %6598, %v5793_v63  }
 0x238   : > { %5811 = vperm.xlu0 %6599, %v5781_v57   ;;  %v6250_v57 = vld [vmem:[%s7709_s5 + $0x40] sm:$0xff] }
 0x23c   : > { %5819 = vperm.xlu0 %6599, %v5789_v62  }
 0x258   : > { %v2221_v1 = vpop.permute.xlu1 %2220 }
 0x25a   : > { %v2223_v3 = vpop.permute.xlu0 %2222 }
 0x25b   : > { %v2229_v8 = vsel %vm2228_vm7, %v2221_v1, %v2223_v3 }
 0x25c   : > { %v2227_v21 = vpop.permute.xlu1 %2226 }
 0x25e   : > { %v2225_v4 = vpop.permute.xlu0 %2224 }
 0x25f   : > { %v2230_v6 = vsel %vm2228_vm7, %v2223_v3, %v2225_v4  ;;  %v2231_v7 = vsel %vm2228_vm7, %v2225_v4, %v2227_v21  ;;  %v5566_v4 = vld [vmem:[%s7003_s15 + $0x10] sm:$0xff] }
 0x260   : > { %6162 = vmatprep.subr.msk.mxu0 %vm2068_vm3, %v2230_v6  ;;  %6372 = vmatpush3.msk.msra.mxu1 %vm2068_vm3, %v2231_v7  ;;  %v2684_v10 = vpop.permute.xlu1 %2683 }
 0x261   : > { %6163 = vmatpush1.msk.msra.mxu0 %vm2068_vm3, %v2229_v8  ;;  %6374 = vmatmul.mubr.msk.f32.vlgmr.msra.gmra.mrb[20].mxu1 %vm2064_vm4, %v2055_v5 }
 0x262   : > { %6164 = vmatmul.mubr.msk.f32.vlgmr.msra.gmra.mrb[2].mxu0 %vm2064_vm4, %v2055_v5  ;;  %6168 = vmatprep.subr.msk.mxu0 %vm2068_vm3, %v7016_v0  ;;  %v2682_v9 = vpop.permute.xlu0 %2681  ;;  %v5567_v5 = vld [vmem:[%s7003_s15 + $0x18] sm:$0xff] }
 0x263   : > { %6376 = vmatprep.subr.mxu1 %v6661_v16  ;;  %6169 = vmatpush1.msk.msra.mxu0 %vm2068_vm3, %v7010_v61  ;;  %v2056_v61 = vld [vmem:[%s7710_s6] sm:$0xff]  ;;  %v2686_v0 = vsel %vm544_vm2, %v2682_v9, %v2684_v10 }
 0x264   : > { %6377 = vmatpush3.msk.msra.mxu1 %vm2068_vm3, %v7029_v2  ;;  %6378 = vmatprep.mubr.msk.f32.mxu1 %vm6662_vm0, %v6661_v16  ;;  %v2999_v12 = vpop.permute.xlu1 %2998 }
 0x265   : > { %6173 = vmatprep.subr.msk.mxu0 %vm2068_vm3, %v2230_v6  ;;  %6381 = vmatprep.subr.mxu1 %v6661_v16 }
 0x266   : > { %2451 = vmatprep.mubr.f32.mxu0 %v6661_v16  ;;  %6379 = vmatmul.mubr.msk.f32.vlgmr.msra.gmra.mrb[22].mxu1 %vm2064_vm4, %v6167_v44  ;;  %v2680_v2 = vpop.permute.xlu0 %2679 }
 0x267   : > { %6382 = vmatpush3.msk.msra.mxu1 %vm2068_vm3, %v2231_v7  ;;  %6170 = vmatmul.mubr.msk.f32.vlgmr.msra.gmra.mrb[4].mxu0 %vm2064_vm4, %v6167_v44  ;;  %v2685_v13 = vsel %vm544_vm2, %v2680_v2, %v2682_v9  ;;  %vm3954_vm2 = vcmask 760832   ;;  %v5570_v44 = vld [vmem:[%s7003_s15 + $0x30] sm:$0xff]  ;;  %v5571_v9 = vld [vmem:[%s7003_s15 + $0x38] sm:$0xff] }
 0x268   : > { %6174 = vmatpush1.msk.msra.mxu0 %vm2068_vm3, %v2229_v8  ;;  %6383 = vmatprep.mubr.msk.f32.mxu1 %vm6662_vm0, %v6661_v16  ;;  %v2997_v17 = vpop.permute.xlu1 %2996 }
 0x269   : > { %6386 = vmatprep.subr.mxu1 %v6661_v16  ;;  %2595 = vmatprep.mubr.f32.mxu0 %v6661_v16  ;;  %v3003_v22 = vsel %vm3002_vm10, %v2997_v17, %v2999_v12 }
 0x26a   : > { %6384 = vmatmul.mubr.msk.f32.vlgmr.msra.gmra.mrb[24].mxu1 %vm2064_vm4, %v2056_v61  ;;  %6179 = vmatprep.subr.msk.mxu0 %vm2068_vm3, %v2686_v0  ;;  %v3001_v14 = vpop.permute.xlu0 %3000 }
 0x26b   : > { %6387 = vmatpush3.msk.msra.mxu1 %vm2068_vm3, %v2684_v10  ;;  %6388 = vmatprep.mubr.msk.f32.mxu1 %vm6662_vm0, %v6661_v16  ;;  %v3004_v18 = vsel %vm3002_vm10, %v2999_v12, %v3001_v14  ;;  %v5575_v12 = vld [vmem:[%s7003_s15 + $0x58] sm:$0xff] }
 0x26c   : > { %6391 = vmatprep.subr.mxu1 %v6661_v16  ;;  %v3319_v23 = vpop.permute.xlu1 %3318 }
 0x26e   : > { %6389 = vmatmul.mubr.msk.f32.vlgmr.msra.gmra.mrb[26].mxu1 %vm2064_vm4, %v6178_v11  ;;  %v3317_v20 = vpop.permute.xlu0 %3316 }
 0x26f   : > { %6175 = vmatmul.mubr.msk.f32.vlgmr.msra.gmra.mrb[4].mxu0 %vm2064_vm4, %v2056_v61  ;;  %6392 = vmatpush3.msk.msra.mxu1 %vm2068_vm3, %v2684_v10  ;;  %v3321_v26 = vsel %vm1021_vm5, %v3317_v20, %v3319_v23 }
 0x270   : > { %6180 = vmatpush1.msk.msra.mxu0 %vm2068_vm3, %v2685_v13  ;;  %6393 = vmatprep.mubr.msk.f32.mxu1 %vm6662_vm0, %v6661_v16  ;;  %v3634_v28 = vpop.permute.xlu1 %3633 }
 0x271   : > { %6185 = vmatprep.subr.msk.mxu0 %vm2068_vm3, %v2686_v0  ;;  %2760 = vmatprep.mubr.f32.mxu0 %v6661_v16 }
 0x272   : > { %6394 = vmatmul.mubr.msk.f32.vlgmr.msra.gmra.mrb[28].mxu1 %vm2064_vm4, %v6184_v15  ;;  %6396 = vmatprep.subr.mxu1 %v6661_v16  ;;  %v3315_v25 = vpop.permute.xlu0 %3314 }
 0x273   : > { %6181 = vmatmul.mubr.msk.f32.vlgmr.msra.gmra.mrb[2].mxu0 %vm2064_vm4, %v6178_v11  ;;  %6397 = vmatpush3.msk.msra.mxu1 %vm2068_vm3, %v3001_v14  ;;  %v3320_v29 = vsel %vm1021_vm5, %v3315_v25, %v3317_v20  ;;  %v5574_v11 = vld [vmem:[%s7003_s15 + $0x50] sm:$0xff]  ;;  %vm5874_vm5 = vcmask 130048  }
 0x274   : > { %6186 = vmatpush1.msk.msra.mxu0 %vm2068_vm3, %v2685_v13  ;;  %6398 = vmatprep.mubr.msk.f32.mxu1 %vm6662_vm0, %v6661_v16  ;;  %v3632_v32 = vpop.permute.xlu1 %3631 }
 0x275   : > { %2909 = vmatprep.mubr.f32.mxu0 %v6661_v16  ;;  %6191 = vmatprep.subr.msk.mxu0 %vm2068_vm3, %v3004_v18  ;;  %v3637_v37 = vsel %vm1185_vm6, %v3632_v32, %v3634_v28  ;;  %v5569_v32 = vld [vmem:[%s7003_s15 + $0x28] sm:$0xff] }
 0x276   : > { %6399 = vmatmul.mubr.msk.f32.vlgmr.msra.gmra.mrb[30].mxu1 %vm2064_vm4, %v6190_v19  ;;  %6401 = vmatprep.subr.mxu1 %v6661_v16  ;;  %v3636_v30 = vpop.permute.xlu0 %3635 }
 0x277   : > { %6187 = vmatmul.mubr.msk.f32.vlgmr.msra.gmra.mrb[4].mxu0 %vm2064_vm4, %v6184_v15  ;;  %6402 = vmatpush3.msk.msra.mxu1 %vm2068_vm3, %v3001_v14  ;;  %v3638_v34 = vsel %vm1185_vm6, %v3634_v28, %v3636_v30  ;;  %v5565_v28 = vld [vmem:[%s7003_s15 + $0x8] sm:$0xff] }
 0x278   : > { %6192 = vmatpush1.msk.msra.mxu0 %vm2068_vm3, %v3003_v22  ;;  %6403 = vmatprep.mubr.msk.f32.mxu1 %vm6662_vm0, %v6661_v16  ;;  %v3953_v38 = vpop.permute.xlu1 %3952 }
 0x279   : > { %6197 = vmatprep.subr.msk.mxu0 %vm2068_vm3, %v3004_v18  ;;  %3078 = vmatprep.mubr.f32.mxu0 %v6661_v16 }
 0x27a   : > { %6404 = vmatmul.mubr.msk.f32.vlgmr.msra.gmra.mrb[32].mxu1 %vm2064_vm4, %v6196_v24  ;;  %6406 = vmatprep.subr.mxu1 %v6661_v16  ;;  %v3951_v36 = vpop.permute.xlu0 %3950 }
 0x27b   : > { %6193 = vmatmul.mubr.msk.f32.vlgmr.msra.gmra.mrb[2].mxu0 %vm2064_vm4, %v6190_v19  ;;  %6407 = vmatpush3.msk.msra.mxu1 %vm2068_vm3, %v3319_v23  ;;  %v3956_v41 = vsel %vm3954_vm2, %v3951_v36, %v3953_v38 }
 0x27c   : > { %6198 = vmatpush1.msk.msra.mxu0 %vm2068_vm3, %v3003_v22  ;;  %6408 = vmatprep.mubr.msk.f32.mxu1 %vm6662_vm0, %v6661_v16  ;;  %v4269_v43 = vpop.permute.xlu1 %4268 }
 0x27d   : > { %3227 = vmatprep.mubr.f32.mxu0 %v6661_v16  ;;  %6203 = vmatprep.subr.msk.mxu0 %vm2068_vm3, %v3321_v26 }
 0x27e   : > { %6409 = vmatmul.mubr.msk.f32.vlgmr.msra.gmra.mrb[34].mxu1 %vm2064_vm4, %v6202_v27  ;;  %6411 = vmatprep.subr.mxu1 %v6661_v16  ;;  %v3949_v40 = vpop.permute.xlu0 %3948 }
 0x27f   : > { %6199 = vmatmul.mubr.msk.f32.vlgmr.msra.gmra.mrb[4].mxu0 %vm2064_vm4, %v6196_v24  ;;  %6412 = vmatpush3.msk.msra.mxu1 %vm2068_vm3, %v3319_v23  ;;  %v3955_v45 = vsel %vm3954_vm2, %v3949_v40, %v3951_v36 }
 0x280   : > { %6204 = vmatpush1.msk.msra.mxu0 %vm2068_vm3, %v3320_v29  ;;  %6413 = vmatprep.mubr.msk.f32.mxu1 %vm6662_vm0, %v6661_v16  ;;  %v4267_v48 = vpop.permute.xlu1 %4266 }
 0x281   : > { %6209 = vmatprep.subr.msk.mxu0 %vm2068_vm3, %v3321_v26  ;;  %3395 = vmatprep.mubr.f32.mxu0 %v6661_v16  ;;  %v4272_v52 = vsel %vm1513_vm8, %v4267_v48, %v4269_v43 }
 0x282   : > { %6414 = vmatmul.mubr.msk.f32.vlgmr.msra.gmra.mrb[36].mxu1 %vm2064_vm4, %v6208_v31  ;;  %6416 = vmatprep.subr.mxu1 %v6661_v16  ;;  %v4271_v47 = vpop.permute.xlu0 %4270 }
 0x283   : > { %6205 = vmatmul.mubr.msk.f32.vlgmr.msra.gmra.mrb[2].mxu0 %vm2064_vm4, %v6202_v27  ;;  %6417 = vmatpush3.msk.msra.mxu1 %vm2068_vm3, %v3636_v30  ;;  %v4273_v49 = vsel %vm1513_vm8, %v4269_v43, %v4271_v47  ;;  %v5564_v27 = vld [vmem:[%s7003_s15] sm:$0xff] }
 0x284   : > { %6210 = vmatpush1.msk.msra.mxu0 %vm2068_vm3, %v3320_v29  ;;  %6418 = vmatprep.mubr.msk.f32.mxu1 %vm6662_vm0, %v6661_v16  ;;  %v4588_v54 = vpop.permute.xlu1 %4587 }
 0x285   : > { %3544 = vmatprep.mubr.f32.mxu0 %v6661_v16  ;;  %6215 = vmatprep.subr.msk.mxu0 %vm2068_vm3, %v3638_v34 }
 0x286   : > { %6419 = vmatmul.mubr.msk.f32.vlgmr.msra.gmra.mrb[38].mxu1 %vm2064_vm4, %v6214_v35  ;;  %6421 = vmatprep.subr.mxu1 %v6661_v16  ;;  %v4586_v51 = vpop.permute.xlu0 %4585 }
 0x287   : > { %6211 = vmatmul.mubr.msk.f32.vlgmr.msra.gmra.mrb[4].mxu0 %vm2064_vm4, %v6208_v31  ;;  %6422 = vmatpush3.msk.msra.mxu1 %vm2068_vm3, %v3636_v30  ;;  %v4590_v56 = vsel %vm1677_vm9, %v4586_v51, %v4588_v54 }
 0x288   : > { %6216 = vmatpush1.msk.msra.mxu0 %vm2068_vm3, %v3637_v37  ;;  %6423 = vmatprep.mubr.msk.f32.mxu1 %vm6662_vm0, %v6661_v16 }
 0x289   : > { %6221 = vmatprep.subr.msk.mxu0 %vm2068_vm3, %v3638_v34  ;;  %3712 = vmatprep.mubr.f32.mxu0 %v6661_v16 }
 0x28a   : > { %6424 = vmatmul.mubr.msk.f32.vlgmr.msra.gmra.mrb[40].mxu1 %vm2064_vm4, %v6220_v39  ;;  %6426 = vmatprep.subr.mxu1 %v6661_v16  ;;  %v4584_v55 = vpop.permute.xlu0 %4583 }
 0x28b   : > { %6217 = vmatmul.mubr.msk.f32.vlgmr.msra.gmra.mrb[2].mxu0 %vm2064_vm4, %v6214_v35  ;;  %6427 = vmatpush3.msk.msra.mxu1 %vm2068_vm3, %v3953_v38  ;;  %v4589_v58 = vsel %vm1677_vm9, %v4584_v55, %v4586_v51 }
 0x28c   : > { %6222 = vmatpush1.msk.msra.mxu0 %vm2068_vm3, %v3637_v37  ;;  %6428 = vmatprep.mubr.msk.f32.mxu1 %vm6662_vm0, %v6661_v16 }
 0x28d   : > { %3861 = vmatprep.mubr.f32.mxu0 %v6661_v16  ;;  %6227 = vmatprep.subr.msk.mxu0 %vm2068_vm3, %v3956_v41 }
 0x28e   : > { %6429 = vmatmul.mubr.msk.f32.vlgmr.msra.gmra.mrb[42].mxu1 %vm2064_vm4, %v6226_v42  ;;  %6431 = vmatprep.subr.mxu1 %v6661_v16 }
 0x28f   : > { %6223 = vmatmul.mubr.msk.f32.vlgmr.msra.gmra.mrb[4].mxu0 %vm2064_vm4, %v6220_v39  ;;  %6432 = vmatpush3.msk.msra.mxu1 %vm2068_vm3, %v3953_v38  ;;  %v5573_v38 = vld [vmem:[%s7003_s15 + $0x48] sm:$0xff] }
 0x290   : > { %6228 = vmatpush1.msk.msra.mxu0 %vm2068_vm3, %v3955_v45  ;;  %6433 = vmatprep.mubr.msk.f32.mxu1 %vm6662_vm0, %v6661_v16 }
 0x291   : > { %6233 = vmatprep.subr.msk.mxu0 %vm2068_vm3, %v3956_v41  ;;  %4030 = vmatprep.mubr.f32.mxu0 %v6661_v16 }
 0x292   : > { %6434 = vmatmul.mubr.msk.f32.vlgmr.msra.gmra.mrb[44].mxu1 %vm2064_vm4, %v6232_v46  ;;  %6436 = vmatprep.subr.mxu1 %v6661_v16 }
 0x293   : > { %6229 = vmatmul.mubr.msk.f32.vlgmr.msra.gmra.mrb[2].mxu0 %vm2064_vm4, %v6226_v42  ;;  %6437 = vmatpush3.msk.msra.mxu1 %vm2068_vm3, %v4271_v47 }
 0x294   : > { %6234 = vmatpush1.msk.msra.mxu0 %vm2068_vm3, %v3955_v45  ;;  %6438 = vmatprep.mubr.msk.f32.mxu1 %vm6662_vm0, %v6661_v16 }
 0x295   : > { %4179 = vmatprep.mubr.f32.mxu0 %v6661_v16  ;;  %6239 = vmatprep.subr.msk.mxu0 %vm2068_vm3, %v4273_v49  ;;  %v7312_v63 = vpop.permute.xlu1 %4896 }
 0x296   : > { %6439 = vmatmul.mubr.msk.f32.vlgmr.msra.gmra.mrb[46].mxu1 %vm2064_vm4, %v6238_v50  ;;  %6441 = vmatprep.subr.mxu1 %v6661_v16 }
 0x297   : > { %6235 = vmatmul.mubr.msk.f32.vlgmr.msra.gmra.mrb[4].mxu0 %vm2064_vm4, %v6232_v46  ;;  %6442 = vmatpush3.msk.msra.mxu1 %vm2068_vm3, %v4271_v47 }
 0x298   : > { %6240 = vmatpush1.msk.msra.mxu0 %vm2068_vm3, %v4272_v52  ;;  %6443 = vmatprep.mubr.msk.f32.mxu1 %vm6662_vm0, %v6661_v16 }
 0x299   : > { %6245 = vmatprep.subr.msk.mxu0 %vm2068_vm3, %v4273_v49  ;;  %4347 = vmatprep.mubr.f32.mxu0 %v6661_v16  ;;  %v5669_v1 = vpop.permute.xlu1 %5668 }
 0x29a   : > { %6444 = vmatmul.mubr.msk.f32.vlgmr.msra.gmra.mrb[48].mxu1 %vm2064_vm4, %v6244_v53  ;;  %6446 = vmatprep.subr.mxu1 %v6661_v16  ;;  %v5697_v7 = vmul.f32 %v5669_v1, %v5566_v4  ;;  %v5698_v8 = vmul.f32 %v5669_v1, %v5567_v5 }
 0x29b   : > { %6241 = vmatmul.mubr.msk.f32.vlgmr.msra.gmra.mrb[2].mxu0 %vm2064_vm4, %v6238_v50  ;;  %6447 = vmatpush3.msk.msra.mxu1 %vm2068_vm3, %v4588_v54  ;;  %v7334_v23 = vpop.permute.xlu0 %5232 }
 0x29c   : > { %6246 = vmatpush1.msk.msra.mxu0 %vm2068_vm3, %v4272_v52  ;;  %6448 = vmatprep.mubr.msk.f32.mxu1 %vm6662_vm0, %v6661_v16 }
 0x29d   : > { %4496 = vmatprep.mubr.f32.mxu0 %v6661_v16  ;;  %6251 = vmatprep.subr.msk.mxu0 %vm2068_vm3, %v4590_v56  ;;  %v5677_v3 = vpop.permute.xlu1 %5676 }
 0x29e   : > { %6449 = vmatmul.mubr.msk.f32.vlgmr.msra.gmra.mrb[50].mxu1 %vm2064_vm4, %v6250_v57  ;;  %6451 = vmatprep.subr.mxu1 %v6661_v16  ;;  %v5701_v10 = vmul.f32 %v5677_v3, %v5570_v44  ;;  %v5702_v61 = vmul.f32 %v5677_v3, %v5571_v9 }
 0x29f   : > { %6247 = vmatmul.mubr.msk.f32.vlgmr.msra.gmra.mrb[4].mxu0 %vm2064_vm4, %v6244_v53  ;;  %6452 = vmatpush3.msk.msra.mxu1 %vm2068_vm3, %v4588_v54  ;;  %v5665_v24 = vpop.permute.xlu0 %5664 }
 0x2a0   : > { %6252 = vmatpush1.msk.msra.mxu0 %vm2068_vm3, %v4589_v58  ;;  %6453 = vmatprep.mubr.msk.f32.mxu1 %vm6662_vm0, %v6661_v16  ;;  %v5695_v30 = vmul.f32 %v5665_v24, %v5564_v27  ;;  %v5696_v31 = vmul.f32 %v5665_v24, %v5565_v28  ;;  %vm4926_vm0 = vcmask 15360  }
 0x2a1   : > { %6257 = vmatprep.subr.msk.mxu0 %vm2068_vm3, %v4590_v56  ;;  %4664 = vmatprep.mubr.f32.mxu0 %v6661_v16  ;;  %v5685_v21 = vpop.permute.xlu1 %5684 }
 0x2a2   : > { %6454 = vmatmul.mubr.msk.f32.vlgmr.msra.gmra.mrb[52].mxu1 %vm2064_vm4, %v6256_v59  ;;  %v5705_v17 = vmul.f32 %v5685_v21, %v5574_v11  ;;  %v5706_v18 = vmul.f32 %v5685_v21, %v5575_v12 }
 0x2a3   : > { %6253 = vmatmul.mubr.msk.f32.vlgmr.msra.gmra.mrb[2].mxu0 %vm2064_vm4, %v6250_v57  ;;  %v7336_v25 = vpop.permute.xlu0 %5672 }
 0x2a4   : > { %6258 = vmatpush1.msk.msra.mxu0 %vm2068_vm3, %v4589_v58  ;;  %4813 = vmatprep.mubr.f32.mxu0 %v6661_v16  ;;  %v5700_v35 = vmul.f32 %v7336_v25, %v5569_v32 }
 0x2a5   : > { %v7316_v6 = vpop.permute.xlu1 %5692 }
 0x2a7   : > { %6259 = vmatmul.mubr.msk.f32.vlgmr.msra.gmra.mrb[4].mxu0 %vm2064_vm4, %v6256_v59  ;;  %v7338_v26 = vpop.permute.xlu0 %5680 }
 0x2a8   : > { %v5704_v40 = vmul.f32 %v7338_v26, %v5573_v38 }
 0x2a9   : > { %v5800_v16 = vpop.permute.xlu1 %5799 }
 0x2aa   : > { %v7320_v0 = vadd.f32 %v5800_v16, %v5697_v7  ;;  %v7322_v2 = vadd.f32 %v5800_v16, %v5698_v8 }
 0x2ab   : > { %v7342_v29 = vpop.permute.xlu0 %5688 }
 0x2ad   : > { %v5808_v13 = vpop.permute.xlu1 %5807 }
 0x2ae   : > { %v7326_v14 = vadd.f32 %v5808_v13, %v5701_v10  ;;  %v7328_v15 = vadd.f32 %v5808_v13, %v5702_v61 }
 0x2af   : > { %v5796_v34 = vpop.permute.xlu0 %5795 }
 0x2b0   : > { %v7346_v36 = vadd.f32 %v5796_v34, %v5695_v30  ;;  %v7348_v37 = vadd.f32 %v5796_v34, %v5696_v31 }
 0x2b1   : > { %v5816_v19 = vpop.permute.xlu1 %5815 }
 0x2b2   : > { %v7330_v20 = vadd.f32 %v5816_v19, %v5705_v17  ;;  %v7332_v22 = vadd.f32 %v5816_v19, %v5706_v18 }
 0x2b3   : > { %v7351_v39 = vpop.permute.xlu0 %5803 }
 0x2b4   : > { %v7355_v41 = vadd.f32 %v7351_v39, %v5700_v35 }
 0x2b7   : > { %v7357_v42 = vpop.permute.xlu0 %5811 }
 0x2b8   : > { %v7360_v43 = vadd.f32 %v7357_v42, %v5704_v40 }
 0x2bc   : > { %v2212_v60 = vpop.f32.mrb[18].mxu1 }
 0x2bd   : > { %v6370_v62 = vpop.f32.mrb[19].mxu1 }
 0x334   : > { %v2378_v45 = vpop.f32.mrb[20].mxu1 }
 0x335   : > { %v2379_v46 = vadd.f32 %v2378_v45, %v2212_v60  ;;  %v6375_v47 = vpop.f32.mrb[21].mxu1 }
 0x339   : > { %v2524_v48 = vpop.f32.mrb[22].mxu1 }
 0x33a   : > { %v6380_v49 = vpop.f32.mrb[23].mxu1 }
 0x33d   : > { %v2668_v50 = vpop.f32.mrb[24].mxu1 }
 0x33e   : > { %v2669_v51 = vadd.f32 %v2668_v50, %v2524_v48  ;;  %v6385_v52 = vpop.f32.mrb[25].mxu1 }
 0x341   : > { %v2833_v53 = vpop.f32.mrb[26].mxu1 }
 0x342   : > { %v2839_v54 = vadd.f32 %v2833_v53, %v2379_v46  ;;  %v6390_v55 = vpop.f32.mrb[27].mxu1 }
 0x345   : > { %v2982_v56 = vpop.f32.mrb[28].mxu1 }
 0x346   : > { %v2988_v57 = vadd.f32 %v2982_v56, %v2669_v51  ;;  %v6395_v58 = vpop.f32.mrb[29].mxu1 }
 0x349   : > { %v3151_v59 = vpop.f32.mrb[30].mxu1 }
 0x34a   : > { %v3157_v62 = vadd.f32 %v3151_v59, %v2839_v54  ;;  %v6400_v1 = vpop.f32.mrb[31].mxu1  ;;  %v7406_v59 = vpop.permute.xlu0 %5819 }
 0x34d   : > { %v3300_v3 = vpop.f32.mrb[32].mxu1 }
 0x34e   : > { %v3306_v21 = vadd.f32 %v3300_v3, %v2988_v57  ;;  %v6405_v4 = vpop.f32.mrb[33].mxu1 }
 0x351   : > { %v3468_v5 = vpop.f32.mrb[34].mxu1 }
 0x352   : > { %v3474_v60 = vadd.f32 %v3468_v5, %v3157_v62  ;;  %v6410_v7 = vpop.f32.mrb[35].mxu1 }
 0x355   : > { %v3617_v8 = vpop.f32.mrb[36].mxu1 }
 0x356   : > { %v3623_v44 = vadd.f32 %v3617_v8, %v3306_v21  ;;  %v6415_v9 = vpop.f32.mrb[37].mxu1 }
 0x357   : > { %v6691_v9 = vmov 1983009808  }
 0x359   : > { %v3785_v16 = vpop.f32.mrb[38].mxu1 }
 0x35a   : > { %v3791_v10 = vadd.f32 %v3785_v16, %v3474_v60  ;;  %v6420_v61 = vpop.f32.mrb[39].mxu1  ;;  %v4960_v16 = vunpack.c.l.s4 %v6691_v9 }
 0x35d   : > { %v3934_v11 = vpop.f32.mrb[40].mxu1 }
 0x35e   : > { %v3940_v12 = vadd.f32 %v3934_v11, %v3623_v44  ;;  %v6425_v13 = vpop.f32.mrb[41].mxu1  ;;  %v5579_v11 = vld [vmem:[%s7003_s15 + $0x78] sm:$0xff] }
 0x35f   : > { %v5577_v13 = vld [vmem:[%s7003_s15 + $0x68] sm:$0xff] }
 0x361   : > { %v4103_v17 = vpop.f32.mrb[42].mxu1 }
 0x362   : > { %v4109_v18 = vadd.f32 %v4103_v17, %v3791_v10  ;;  %v6430_v19 = vpop.f32.mrb[43].mxu1  ;;  %v6692_v17 = vmov 1934713408  }
 0x363   : > { %v5578_v19 = vld [vmem:[%s7003_s15 + $0x70] sm:$0xff] }
 0x365   : > { %v4252_v24 = vpop.f32.mrb[44].mxu1 }
 0x366   : > { %v4258_v27 = vadd.f32 %v4252_v24, %v3940_v12  ;;  %v6435_v28 = vpop.f32.mrb[45].mxu1  ;;  %v4961_v12 = vunpack.c.0.s8 %v4960_v16  ;;  %v5710_v24 = vmul.f32 %v7316_v6, %v5579_v11 }
 0x369   : > { %v4420_v30 = vpop.f32.mrb[46].mxu1 }
 0x36a   : > { %v4426_v31 = vadd.f32 %v4420_v30, %v4109_v18  ;;  %v6440_v32 = vpop.f32.mrb[47].mxu1  ;;  %v5024_v18 = vunpack.c.l.s4 %v6692_v17 }
 0x36b   : > { %v5572_v32 = vld [vmem:[%s7003_s15 + $0x40] sm:$0xff] }
 0x36d   : > { %v4569_v34 = vpop.f32.mrb[48].mxu1 }
 0x36e   : > { %v4575_v35 = vadd.f32 %v4569_v34, %v4258_v27  ;;  %v6445_v38 = vpop.f32.mrb[49].mxu1  ;;  %v5576_v34 = vld [vmem:[%s7003_s15 + $0x60] sm:$0xff] }
 0x36f   : > { %v7428_v38 = vsub.s32 %v4961_v12, %v6990_v33 }
 0x371   : > { %v4737_v40 = vpop.f32.mrb[50].mxu1 }
 0x372   : > { %v4743_v45 = vadd.f32 %v4737_v40, %v4426_v31  ;;  %v6450_v46 = vpop.f32.mrb[51].mxu1  ;;  %v5568_v31 = vld [vmem:[%s7003_s15 + $0x20] sm:$0xff] }
 0x373   : > { %v7432_v46 = vmul.f32 %v7316_v6, %v5578_v19  ;;  %v7448_v6 = vmul.f32 %v7342_v29, %v5576_v34 }
 0x374   : > { %v4901_v47 = vadd.f32 %v7312_v63, %v4743_v45 }
 0x375   : > { %v4886_v48 = vpop.f32.mrb[52].mxu1 }
 0x376   : > { %v4892_v49 = vadd.f32 %v4886_v48, %v4575_v35  ;;  %4954 = vrot.lane.b32.xlu0 %v4901_v47, %s7719_s30  ;;  %4950 = vrot.lane.b32.xlu1 %v4901_v47, %s6679_s25  ;;  %v4666_v50 = vpop.f32.mrb[2].mxu0  ;;  %v6455_v51 = vpop.f32.mrb[53].mxu1  ;;  %s6687_s30 = smov 40   ;;  %v5708_v35 = vmul.f32 %v7342_v29, %v5577_v13  ;;  %v5025_v47 = vunpack.c.0.s8 %v5024_v18 }
 0x377   : > { %v7366_v52 = vadd.f32 %v7312_v63, %v4666_v50  ;;  %v4668_v53 = vpop.f32.mrb[3].mxu0  ;;  %v7439_v50 = vmul.f32 %v7336_v25, %v5568_v31 }
 0x378   : > { %v4900_v56 = vadd.f32 %v7312_v63, %v4668_v53  ;;  %v5237_v63 = vadd.f32 %v7334_v23, %v4892_v49 }
 0x37a   : > { %4909 = vrot.lane.b32.xlu0 %v7366_v52, %s7721_s29  ;;  %4903 = vrot.lane.b32.xlu1 %v7366_v52, %s7722_s17  ;;  %v4815_v54 = vpop.f32.mrb[4].mxu0  ;;  %s6689_s29 = smov 58   ;;  %s6690_s17 = smov 22  }
 0x37b   : > { %v4817_v55 = vpop.f32.mrb[5].mxu0  ;;  %v7384_v57 = vadd.f32 %v7334_v23, %v4815_v54 }
 0x37c   : > { %v5236_v58 = vadd.f32 %v7334_v23, %v4817_v55  ;;  %v7404_v23 = vpop.permute.xlu1 %5823 }
 0x37d   : > { %v7436_v49 = vadd.f32 %v7404_v23, %v5710_v24 }
 0x37e   : > { %4915 = vrot.lane.b32.xlu0 %v7366_v52, %s7720_s24  ;;  %4906 = vrot.lane.b32.xlu1 %v7366_v52, %s6668_s28  ;;  %s6688_s24 = smov 94  }
 0x382   : > { %4922 = vrot.lane.b32.xlu0 %v7366_v52, %s7723_s12  ;;  %4912 = vrot.lane.b32.xlu1 %v7366_v52, %s6683_s14 }
 0x386   : > { %4918 = vrot.lane.b32.xlu1 %v7366_v52, %s6684_s27  ;;  %4929 = vrot.lane.b32.xlu0 %v4900_v56, %s6685_s26 }
 0x38a   : > { %4935 = vrot.lane.b32.xlu0 %v4900_v56, %s6686_s11  ;;  %4924 = vrot.lane.b32.xlu1 %v4900_v56, %s7723_s12  ;;  %s7734_s12 = smov 110  }
 0x38e   : > { %4941 = vrot.lane.b32.xlu0 %v4900_v56, %s6687_s30  ;;  %4932 = vrot.lane.b32.xlu1 %v4900_v56, %s6688_s24 }
 0x392   : > { %4948 = vrot.lane.b32.xlu0 %v4900_v56, %s6679_s25  ;;  %4938 = vrot.lane.b32.xlu1 %v4900_v56, %s6689_s29 }
 0x396   : > { %4944 = vrot.lane.b32.xlu1 %v4900_v56, %s6690_s17  ;;  %5242 = vrot.lane.b32.xlu0 %v7384_v57, %s6668_s28  ;;  %s7737_s28 = smov 38   ;;  %v7445_v56 = vmul.f32 %v7338_v26, %v5572_v32 }
 0x39a   : > { %5285 = vrot.lane.b32.xlu1 %v5237_v63, %s6679_s25  ;;  %5248 = vrot.lane.b32.xlu0 %v7384_v57, %s6683_s14 }
 0x39e   : > { %5254 = vrot.lane.b32.xlu0 %v7384_v57, %s6684_s27  ;;  %5239 = vrot.lane.b32.xlu1 %v7384_v57, %s7734_s12  ;;  %s7738_s12 = smov 114  }
 0x3a2   : > { %5260 = vrot.lane.b32.xlu0 %v5236_v58, %s7735_s0  ;;  %5245 = vrot.lane.b32.xlu1 %v7384_v57, %s7736_s1  ;;  %s6263_s1 = sshll.u32 (%p6801_p6), %s6643_s19, 1 }
 0x3a6   : > { %5267 = vrot.lane.b32.xlu0 %v5236_v58, %s6688_s24  ;;  %5251 = vrot.lane.b32.xlu1 %v7384_v57, %s7737_s28 }
 0x3aa   : > { %5273 = vrot.lane.b32.xlu0 %v5236_v58, %s6689_s29  ;;  %5258 = vrot.lane.b32.xlu1 %v7384_v57, %s7735_s0 }
 0x3ae   : > { %5283 = vrot.lane.b32.xlu0 %v5236_v58, %s6679_s25  ;;  %5264 = vrot.lane.b32.xlu1 %v5236_v58, %s6685_s26 }
 0x3b2   : > { %5279 = vrot.lane.b32.xlu0 %v5236_v58, %s6690_s17  ;;  %5270 = vrot.lane.b32.xlu1 %v5236_v58, %s6686_s11  ;;  %s6507_s17 = smul.u32 (%p6801_p6), 48, %s6647_s20  ;;  %s7740_s20 = sld [smem:[#allocation10_spill]] (%p6801_p6) }
 0x3b4   : > { %s5900_s15 = sadd.s32 (%p6801_p6), %s6507_s17, %s6263_s1 }
 0x3b6   : > { %5276 = vrot.lane.b32.xlu1 %v5236_v58, %s6687_s30  ;;  %v7453_v58 = vadd.f32 %v7406_v59, %v5708_v35  ;;  %s6264_s30 = sshll.u32 (%p6801_p6), %s5900_s15, 3 }
 0x3b8   : > { %s5902_s29 = scalar_lea.vmem (%p6801_p6), %s7740_s20, %s6264_s30 }
 0x3ba   : > { %5289 = vrot.lane.b32.xlu1 %v5237_v63, %s7738_s12 }
 0x3e8   : > { %v4951_v62 = vpop.permute.xlu1 %4950  ;;  %v7408_v1 = vpop.permute.xlu0 %4954 }
 0x3ec   : > { %v4904_v3 = vpop.permute.xlu1 %4903  ;;  %v4910_v21 = vpop.permute.xlu0 %4909 }
 0x3ed   : > { %v4973_v40 = vcombine.low %v4904_v3, %v4910_v21  ;;  %v4974_v51 = vcombine.high %v4904_v3, %v4910_v21 }
 0x3ef   : > { %v7456_v25 = vrot.slane %v4973_v40, %v7428_v38  ;;  %v7468_v9 = vrot.slane %v4974_v51, %v7428_v38 }
 0x3f0   : > { %v4907_v4 = vpop.permute.xlu1 %4906  ;;  %v7410_v5 = vpop.permute.xlu0 %4915 }
 0x3f1   : > { %v4957_v27 = vcombine.low %v7366_v52, %v4907_v4  ;;  %v4958_v48 = vcombine.high %v7366_v52, %v4907_v4  ;;  %v7459_v4 = vsub.s32 %v5025_v47, %v6990_v33 }
 0x3f3   : > { %v7442_v53 = vrot.slane %v4957_v27, %v7428_v38  ;;  %v7462_v26 = vrot.slane %v4958_v48, %v7428_v38 }
 0x3f4   : > { %v7412_v60 = vpop.permute.xlu1 %4912  ;;  %v4923_v7 = vpop.permute.xlu0 %4922 }
 0x3f5   : > { %v5021_v16 = vcombine.low %v7442_v53, %v7456_v25  ;;  %v5022_v13 = vcombine.high %v7442_v53, %v7456_v25 }
 0x3f8   : > { %v7414_v8 = vpop.permute.xlu1 %4918  ;;  %v7416_v44 = vpop.permute.xlu0 %4929 }
 0x3f9   : > { %v4989_v29 = vcombine.low %v7412_v60, %v7414_v8  ;;  %v4990_v17 = vcombine.high %v7412_v60, %v7414_v8 }
 0x3fb   : > { %v4997_v27 = vrot.slane %v4989_v29, %v7428_v38 }
 0x3fc   : > { %v4925_v10 = vpop.permute.xlu1 %4924  ;;  %v4936_v61 = vpop.permute.xlu0 %4935 }
 0x3fd   : > { %v4927_v45 = vsel %vm4926_vm0, %v4923_v7, %v4925_v10  ;;  %v5093_v63 = vcombine.low %v7416_v44, %v4936_v61  ;;  %v5094_v11 = vcombine.high %v7416_v44, %v4936_v61  ;;  %v5037_v61 = vcombine.low %v7462_v26, %v7468_v9 }
 0x3fe   : > { %v5005_v52 = vcombine.low %v7410_v5, %v4927_v45  ;;  %v5006_v10 = vcombine.high %v7410_v5, %v4927_v45 }
 0x3ff   : > { %v5101_v18 = vrot.slane %v5093_v63, %v7428_v38  ;;  %v5108_v31 = vrot.slane %v5094_v11, %v7428_v38 }
 0x400   : > { %v4933_v28 = vpop.permute.xlu1 %4932  ;;  %v4942_v30 = vpop.permute.xlu0 %4941  ;;  %v7492_v8 = vrot.slane %v5006_v10, %v7428_v38 }
 0x404   : > { %v4939_v54 = vpop.permute.xlu1 %4938  ;;  %v4949_v55 = vpop.permute.xlu0 %4948 }
 0x405   : > { %v5109_v3 = vcombine.low %v4933_v28, %v4939_v54  ;;  %v5110_v21 = vcombine.high %v4933_v28, %v4939_v54  ;;  %v4952_v7 = vsel %vm2064_vm4, %v4949_v55, %v4951_v62  ;;  %v7481_v62 = vrot.slane %v5005_v52, %v7428_v38 }
 0x406   : > { %v5125_v24 = vcombine.low %v4942_v30, %v4952_v7  ;;  %v5126_v44 = vcombine.high %v4942_v30, %v4952_v7 }
 0x407   : > { %v5117_v19 = vrot.slane %v5109_v3, %v7428_v38  ;;  %v5124_v5 = vrot.slane %v5110_v21, %v7428_v38  ;;  %v5053_v51 = vcombine.low %v4997_v27, %v7481_v62  ;;  %v5054_v29 = vcombine.high %v4997_v27, %v7481_v62 }
 0x408   : > { %v4945_v33 = vpop.permute.xlu1 %4944  ;;  %v7474_v12 = vpop.permute.xlu0 %5242  ;;  %v5133_v30 = vrot.slane %v5125_v24, %v7428_v38  ;;  %v5140_v45 = vrot.slane %v5126_v44, %v7428_v38 }
 0x409   : > { %v5141_v28 = vcombine.low %v4945_v33, %v7408_v1  ;;  %v5142_v60 = vcombine.high %v4945_v33, %v7408_v1  ;;  %v5157_v32 = vcombine.low %v5101_v18, %v5117_v19  ;;  %v5158_v34 = vcombine.high %v5101_v18, %v5117_v19 }
 0x40a   : > { %v5004_v1 = vrot.slane %v4990_v17, %v7428_v38  ;;  %v5173_v54 = vcombine.low %v5108_v31, %v5124_v5  ;;  %v5174_v55 = vcombine.high %v5108_v31, %v5124_v5  ;;  %v5061_v44 = vrot.slane %v5053_v51, %v7459_v4 }
 0x40b   : > { %v5149_v47 = vrot.slane %v5141_v28, %v7428_v38  ;;  %v5156_v48 = vrot.slane %v5142_v60, %v7428_v38  ;;  %v5165_v10 = vrot.slane %v5157_v32, %v7459_v4  ;;  %v5172_v11 = vrot.slane %v5158_v34, %v7459_v4 }
 0x40c   : > { %v7495_v35 = vpop.permute.xlu1 %5285  ;;  %v7497_v40 = vpop.permute.xlu0 %5248  ;;  %v5069_v7 = vcombine.low %v5004_v1, %v7492_v8  ;;  %v5070_v62 = vcombine.high %v5004_v1, %v7492_v8  ;;  %v5181_v27 = vrot.slane %v5173_v54, %v7459_v4  ;;  %v5188_v28 = vrot.slane %v5174_v55, %v7459_v4 }
 0x40d   : > { %v5189_v52 = vcombine.low %v5133_v30, %v5149_v47  ;;  %v5190_v63 = vcombine.high %v5133_v30, %v5149_v47  ;;  %v5205_v3 = vcombine.low %v5140_v45, %v5156_v48  ;;  %v5206_v21 = vcombine.high %v5140_v45, %v5156_v48 }
 0x40f   : > { %v5197_v17 = vrot.slane %v5189_v52, %v7459_v4  ;;  %v5204_v19 = vrot.slane %v5190_v63, %v7459_v4  ;;  %v5213_v5 = vrot.slane %v5205_v3, %v7459_v4  ;;  %v5220_v24 = vrot.slane %v5206_v21, %v7459_v4 }
 0x410   : > { %v5240_v33 = vpop.permute.xlu1 %5239  ;;  %v7509_v18 = vpop.permute.xlu0 %5254 }
 0x411   : > { %v5221_v60 = vcombine.low %v5165_v10, %v5197_v17  ;;  %v5222_v31 = vcombine.high %v5165_v10, %v5197_v17  ;;  %v5223_v32 = vcombine.low %v5172_v11, %v5204_v19  ;;  %v5224_v34 = vcombine.high %v5172_v11, %v5204_v19 }
 0x412   : > { %v5225_v30 = vcombine.low %v5181_v27, %v5213_v5  ;;  %v5226_v45 = vcombine.high %v5181_v27, %v5213_v5  ;;  %v5227_v47 = vcombine.low %v5188_v28, %v5220_v24  ;;  %v5228_v48 = vcombine.high %v5188_v28, %v5220_v24 }
 0x413   : > { %v7520_v63 = vmul.f32 %v7348_v37, %v5221_v60  ;;  %v7523_v51 = vmul.f32 %v7322_v2, %v5222_v31  ;;  %v7526_v8 = vmul.f32 %v7355_v41, %v5223_v32  ;;  %v7529_v1 = vmul.f32 %v7328_v15, %v5224_v34 }
 0x414   : > { %v5246_v52 = vpop.permute.xlu1 %5245  ;;  %v5261_v54 = vpop.permute.xlu0 %5260  ;;  %v7532_v55 = vmul.f32 %v7360_v43, %v5225_v30  ;;  %v7535_v3 = vmul.f32 %v7332_v22, %v5226_v45  ;;  %v7538_v21 = vmul.f32 %v7453_v58, %v5227_v47  ;;  %v7541_v37 = vmul.f32 %v7436_v49, %v5228_v48 }
 0x415   : > { %v5840_v2 = vadd.f32 %v7404_v23, %v7432_v46  ;;  %v5830_v15 = vadd.f32 %v7351_v39, %v7439_v50  ;;  %v5038_v41 = vcombine.high %v7462_v26, %v7468_v9  ;;  %v5068_v43 = vrot.slane %v5054_v29, %v7459_v4 }
 0x416   : > { %v5029_v22 = vrot.slane %v5021_v16, %v7459_v4  ;;  %v5077_v58 = vrot.slane %v5069_v7, %v7459_v4  ;;  %v5308_v49 = vcombine.low %v5240_v33, %v5246_v52  ;;  %v5309_v10 = vcombine.high %v5240_v33, %v5246_v52 }
 0x417   : > { %v5834_v23 = vadd.f32 %v7357_v42, %v7445_v56  ;;  %v5838_v39 = vadd.f32 %v7406_v59, %v7448_v6  ;;  %v5036_v46 = vrot.slane %v5022_v13, %v7459_v4  ;;  %v5084_v50 = vrot.slane %v5070_v62, %v7459_v4 }
 0x418   : > { %v5252_v11 = vpop.permute.xlu1 %5251  ;;  %v5045_v16 = vrot.slane %v5037_v61, %v7459_v4  ;;  %v5085_v29 = vcombine.low %v5029_v22, %v5061_v44  ;;  %v5292_v7 = vcombine.low %v7384_v57, %v7474_v12  ;;  %v5293_v42 = vcombine.high %v7384_v57, %v7474_v12  ;;  %v7573_v25 = vpop.permute.xlu0 %5267 }
 0x419   : > { %v5052_v59 = vrot.slane %v5038_v41, %v7459_v4  ;;  %v5086_v56 = vcombine.high %v5029_v22, %v5061_v44  ;;  %v5087_v6 = vcombine.low %v5036_v46, %v5068_v43  ;;  %v5088_v53 = vcombine.high %v5036_v46, %v5068_v43 }
 0x41a   : > { %v5089_v13 = vcombine.low %v5045_v16, %v5077_v58  ;;  %v5090_v33 = vcombine.high %v5045_v16, %v5077_v58  ;;  %v5316_v17 = vrot.slane %v5308_v49, %v7428_v38  ;;  %v5323_v26 = vrot.slane %v5309_v10, %v7428_v38 }
 0x41b   : > { %v5091_v61 = vcombine.low %v5052_v59, %v5084_v50  ;;  %v5092_v19 = vcombine.high %v5052_v59, %v5084_v50  ;;  %v5324_v5 = vcombine.low %v7497_v40, %v7509_v18  ;;  %v5325_v57 = vcombine.high %v7497_v40, %v7509_v18 }
 0x41c   : > { %v5259_v9 = vpop.permute.xlu1 %5258  ;;  %v5842_v12 = vmul.f32 %v7346_v36, %v5085_v29  ;;  %v5300_v24 = vrot.slane %v5292_v7, %v7428_v38  ;;  %v5307_v44 = vrot.slane %v5293_v42, %v7428_v38  ;;  %v5844_v27 = vmul.f32 %v7320_v0, %v5086_v56  ;;  %v5274_v52 = vpop.permute.xlu0 %5273 }
 0x41d   : > { %v5262_v62 = vsel %vm4926_vm0, %v5259_v9, %v5261_v54  ;;  %v5846_v28 = vmul.f32 %v5830_v15, %v5087_v6  ;;  %v5848_v32 = vmul.f32 %v7326_v14, %v5088_v53  ;;  %v5332_v36 = vrot.slane %v5324_v5, %v7428_v38 }
 0x41e   : > { %v5340_v60 = vcombine.low %v5252_v11, %v5262_v62  ;;  %v5341_v31 = vcombine.high %v5252_v11, %v5262_v62  ;;  %v5356_v34 = vcombine.low %v5300_v24, %v5316_v17  ;;  %v5357_v30 = vcombine.high %v5300_v24, %v5316_v17 }
 0x41f   : > { %v5372_v45 = vcombine.low %v5307_v44, %v5323_v26  ;;  %v5339_v18 = vrot.slane %v5325_v57, %v7428_v38  ;;  %v5850_v0 = vmul.f32 %v5834_v23, %v5089_v13  ;;  %v5852_v54 = vmul.f32 %v7330_v20, %v5090_v33 }
 0x420   : > { %v5265_v40 = vpop.permute.xlu1 %5264  ;;  %v5348_v47 = vrot.slane %v5340_v60, %v7428_v38  ;;  %v5355_v48 = vrot.slane %v5341_v31, %v7428_v38  ;;  %v5854_v15 = vmul.f32 %v5838_v39, %v5091_v61  ;;  %v5373_v41 = vcombine.high %v5307_v44, %v5323_v26  ;;  %v5284_v13 = vpop.permute.xlu0 %5283 }
 0x421   : > { %v5856_v49 = vmul.f32 %v5840_v2, %v5092_v19  ;;  %v5364_v10 = vrot.slane %v5356_v34, %v7459_v4  ;;  %v5371_v11 = vrot.slane %v5357_v30, %v7459_v4  ;;  %v5380_v46 = vrot.slane %v5372_v45, %v7459_v4 }
 0x422   : > { %v5388_v14 = vcombine.low %v5332_v36, %v5348_v47  ;;  %v5389_v43 = vcombine.high %v5332_v36, %v5348_v47  ;;  %v5404_v22 = vcombine.low %v5339_v18, %v5355_v48  ;;  %v5405_v58 = vcombine.high %v5339_v18, %v5355_v48 }
 0x423   : > { %v5387_v29 = vrot.slane %v5373_v41, %v7459_v4  ;;  %v5444_v7 = vcombine.low %v7573_v25, %v5274_v52 }
 0x424   : > { %v5271_v50 = vpop.permute.xlu1 %5270  ;;  %v5396_v16 = vrot.slane %v5388_v14, %v7459_v4  ;;  %v5403_v23 = vrot.slane %v5389_v43, %v7459_v4  ;;  %v5412_v20 = vrot.slane %v5404_v22, %v7459_v4  ;;  %v5419_v39 = vrot.slane %v5405_v58, %v7459_v4 }
 0x425   : > { %v5428_v2 = vcombine.low %v5265_v40, %v5271_v50  ;;  %v5429_v42 = vcombine.high %v5265_v40, %v5271_v50  ;;  %v5452_v45 = vrot.slane %v5444_v7, %v7428_v38  ;;  %v5280_v40 = vpop.permute.xlu0 %5279 }
 0x426   : > { %v5420_v59 = vcombine.low %v5364_v10, %v5396_v16  ;;  %v5421_v56 = vcombine.high %v5364_v10, %v5396_v16  ;;  %v5422_v6 = vcombine.low %v5371_v11, %v5403_v23  ;;  %v5423_v53 = vcombine.high %v5371_v11, %v5403_v23 }
 0x427   : > { %v5424_v33 = vcombine.low %v5380_v46, %v5412_v20  ;;  %v5425_v17 = vcombine.high %v5380_v46, %v5412_v20  ;;  %v5426_v26 = vcombine.low %v5387_v29, %v5419_v39  ;;  %v5427_v9 = vcombine.high %v5387_v29, %v5419_v39 }
 0x428   : > { %v5277_v61 = vpop.permute.xlu1 %5276  ;;  %v5858_v19 = vadd.f32 %v5842_v12, %v5420_v59  ;;  %v5860_v5 = vadd.f32 %v5844_v27, %v5421_v56  ;;  %v5862_v57 = vadd.f32 %v5846_v28, %v5422_v6  ;;  %v5864_v24 = vadd.f32 %v5848_v32, %v5423_v53 }
 0x429   : > { %v5866_v44 = vadd.f32 %v5850_v0, %v5424_v33  ;;  %v5868_v62 = vadd.f32 %v5852_v54, %v5425_v17  ;;  %v5870_v60 = vadd.f32 %v5854_v15, %v5426_v26  ;;  %v5872_v31 = vadd.f32 %v5856_v49, %v5427_v9 }
 0x42a   : > { %5875 = vst.msk [vmem:[%s7006_s16] sm:$0xff] %vm5874_vm5, %v5858_v19  ;;  %5877 = vst.msk [vmem:[%s7006_s16 + $0x10] sm:$0xff] %vm5874_vm5, %v5860_v5  ;;  %v5445_v12 = vcombine.high %v7573_v25, %v5274_v52  ;;  %v5287_v27 = vsel %vm2064_vm4, %v5284_v13, %v7495_v35  ;;  %v5436_v28 = vrot.slane %v5428_v2, %v7428_v38 }
 0x42b   : > { %5879 = vst.msk [vmem:[%s7006_s16 + $0x20] sm:$0xff] %vm5874_vm5, %v5862_v57  ;;  %5881 = vst.msk [vmem:[%s7006_s16 + $0x30] sm:$0xff] %vm5874_vm5, %v5864_v24  ;;  %v5460_v32 = vcombine.low %v5277_v61, %v5287_v27  ;;  %v5461_v34 = vcombine.high %v5277_v61, %v5287_v27  ;;  %v5443_v25 = vrot.slane %v5429_v42, %v7428_v38 }
 0x42c   : > { %5883 = vst.msk [vmem:[%s7006_s16 + $0x40] sm:$0xff] %vm5874_vm5, %v5866_v44  ;;  %5885 = vst.msk [vmem:[%s7006_s16 + $0x50] sm:$0xff] %vm5874_vm5, %v5868_v62  ;;  %v5290_v30 = vpop.permute.xlu1 %5289  ;;  %v5459_v18 = vrot.slane %v5445_v12, %v7428_v38  ;;  %v5492_v47 = vcombine.low %v5436_v28, %v5452_v45  ;;  %v5493_v48 = vcombine.high %v5436_v28, %v5452_v45 }
 0x42d   : > { %5887 = vst.msk [vmem:[%s7006_s16 + $0x60] sm:$0xff] %vm5874_vm5, %v5870_v60  ;;  %5889 = vst.msk [vmem:[%s7006_s16 + $0x70] sm:$0xff] %vm5874_vm5, %v5872_v31  ;;  %v5476_v36 = vcombine.low %v5280_v40, %v5290_v30  ;;  %v5477_v35 = vcombine.high %v5280_v40, %v5290_v30  ;;  %v5468_v52 = vrot.slane %v5460_v32, %v7428_v38 }
 0x42e   : > { %v5475_v0 = vrot.slane %v5461_v34, %v7428_v38  ;;  %v5508_v41 = vcombine.low %v5443_v25, %v5459_v18  ;;  %v5509_v14 = vcombine.high %v5443_v25, %v5459_v18  ;;  %v5500_v10 = vrot.slane %v5492_v47, %v7459_v4 }
 0x42f   : > { %v5484_v54 = vrot.slane %v5476_v36, %v7428_v38  ;;  %v5491_v15 = vrot.slane %v5477_v35, %v7428_v38  ;;  %v5507_v11 = vrot.slane %v5493_v48, %v7459_v4 }
 0x430   : > { %v5516_v38 = vrot.slane %v5508_v41, %v7459_v4  ;;  %v5523_v20 = vrot.slane %v5509_v14, %v7459_v4 }
 0x431   : > { %v5524_v43 = vcombine.low %v5468_v52, %v5484_v54  ;;  %v5525_v22 = vcombine.high %v5468_v52, %v5484_v54  ;;  %v5540_v58 = vcombine.low %v5475_v0, %v5491_v15  ;;  %v5541_v49 = vcombine.high %v5475_v0, %v5491_v15 }
 0x433   : > { %v5532_v46 = vrot.slane %v5524_v43, %v7459_v4  ;;  %v5539_v50 = vrot.slane %v5525_v22, %v7459_v4  ;;  %v5548_v16 = vrot.slane %v5540_v58, %v7459_v4  ;;  %v5555_v23 = vrot.slane %v5541_v49, %v7459_v4  ;;  %v5976_v19 = vld [vmem:[%s7006_s16 + $0x40] sm:$0xff] (%p6801_p6)  ;;  %v5980_v57 = vld [vmem:[%s7006_s16 + $0x50] sm:$0xff] (%p6801_p6) }
 0x434   : > { %v5984_v44 = vld [vmem:[%s7006_s16 + $0x60] sm:$0xff] (%p6801_p6)  ;;  %v5988_v60 = vld [vmem:[%s7006_s16 + $0x70] sm:$0xff] (%p6801_p6)  ;;  %5977 = vst [vmem:[%s5902_s29 + $0xc0] sm:$0xff] (%p6801_p6), %v5976_v19  ;;  %5981 = vst [vmem:[%s5902_s29 + $0xf0] sm:$0xff] (%p6801_p6), %v5980_v57 }
 0x435   : > { %v5556_v39 = vcombine.low %v5500_v10, %v5532_v46  ;;  %v5557_v29 = vcombine.high %v5500_v10, %v5532_v46  ;;  %v5558_v7 = vcombine.low %v5507_v11, %v5539_v50  ;;  %v5559_v2 = vcombine.high %v5507_v11, %v5539_v50  ;;  %5985 = vst [vmem:[%s5902_s29 + $0x120] sm:$0xff] (%p6801_p6), %v5984_v44 }
 0x436   : > { %v5560_v42 = vcombine.low %v5516_v38, %v5548_v16  ;;  %v5561_v59 = vcombine.high %v5516_v38, %v5548_v16  ;;  %v5562_v56 = vcombine.low %v5523_v20, %v5555_v23  ;;  %v5563_v6 = vcombine.high %v5523_v20, %v5555_v23  ;;  %5897 = sbr.rel (!%p6801_p6) target bundleno = 1093 (0x445), region = 114  ;;  %5989 = vst [vmem:[%s5902_s29 + $0x150] sm:$0xff] (%p6801_p6), %v5988_v60 }
 0x437   : > { %v5859_v53 = vadd.f32 %v7520_v63, %v5556_v39  ;;  %v5861_v4 = vadd.f32 %v7523_v51, %v5557_v29  ;;  %v5863_v13 = vadd.f32 %v7526_v8, %v5558_v7  ;;  %v5865_v33 = vadd.f32 %v7529_v1, %v5559_v2  ;;  %v5960_v63 = vld [vmem:[%s7006_s16] sm:$0xff] (%p6801_p6)  ;;  %v5964_v8 = vld [vmem:[%s7006_s16 + $0x10] sm:$0xff] (%p6801_p6) }
 0x438   : > { %v5867_v17 = vadd.f32 %v7532_v55, %v5560_v42  ;;  %v5869_v26 = vadd.f32 %v7535_v3, %v5561_v59  ;;  %v5871_v9 = vadd.f32 %v7538_v21, %v5562_v56  ;;  %v5873_v61 = vadd.f32 %v7541_v37, %v5563_v6  ;;  %v5968_v55 = vld [vmem:[%s7006_s16 + $0x20] sm:$0xff] (%p6801_p6)  ;;  %v5972_v21 = vld [vmem:[%s7006_s16 + $0x30] sm:$0xff] (%p6801_p6)  ;;  %5961 = vst [vmem:[%s5902_s29] sm:$0xff] (%p6801_p6), %v5960_v63 }
 0x439   : > { %5876 = vst.msk [vmem:[%s7006_s16 + $0x8] sm:$0xff] %vm5874_vm5, %v5859_v53  ;;  %5878 = vst.msk [vmem:[%s7006_s16 + $0x18] sm:$0xff] %vm5874_vm5, %v5861_v4 }
 0x43a   : > { %5880 = vst.msk [vmem:[%s7006_s16 + $0x28] sm:$0xff] %vm5874_vm5, %v5863_v13  ;;  %5882 = vst.msk [vmem:[%s7006_s16 + $0x38] sm:$0xff] %vm5874_vm5, %v5865_v33 }
 0x43b   : > { %5884 = vst.msk [vmem:[%s7006_s16 + $0x48] sm:$0xff] %vm5874_vm5, %v5867_v17  ;;  %5886 = vst.msk [vmem:[%s7006_s16 + $0x58] sm:$0xff] %vm5874_vm5, %v5869_v26 }
 0x43c   : > { %5888 = vst.msk [vmem:[%s7006_s16 + $0x68] sm:$0xff] %vm5874_vm5, %v5871_v9  ;;  %5890 = vst.msk [vmem:[%s7006_s16 + $0x78] sm:$0xff] %vm5874_vm5, %v5873_v61 }
 0x43d   : > { %5965 = vst [vmem:[%s5902_s29 + $0x30] sm:$0xff] %v5964_v8  ;;  %5969 = vst [vmem:[%s5902_s29 + $0x60] sm:$0xff] %v5968_v55 }
 0x43e   : > { %5973 = vst [vmem:[%s5902_s29 + $0x90] sm:$0xff] %v5972_v21 }
 0x440   : > { %v5962_v51 = vld [vmem:[%s7006_s16 + $0x8] sm:$0xff]  ;;  %v5966_v1 = vld [vmem:[%s7006_s16 + $0x18] sm:$0xff] }
 0x441   : > { %v5970_v3 = vld [vmem:[%s7006_s16 + $0x28] sm:$0xff]  ;;  %v5974_v37 = vld [vmem:[%s7006_s16 + $0x38] sm:$0xff]  ;;  %5963 = vst [vmem:[%s5902_s29 + $0x8] sm:$0xff] %v5962_v51  ;;  %5967 = vst [vmem:[%s5902_s29 + $0x38] sm:$0xff] %v5966_v1 }
 0x442   : > { %v5978_v5 = vld [vmem:[%s7006_s16 + $0x48] sm:$0xff]  ;;  %v5982_v24 = vld [vmem:[%s7006_s16 + $0x58] sm:$0xff]  ;;  %5971 = vst [vmem:[%s5902_s29 + $0x68] sm:$0xff] %v5970_v3  ;;  %5975 = vst [vmem:[%s5902_s29 + $0x98] sm:$0xff] %v5974_v37 }
 0x443   : > { %v5986_v62 = vld [vmem:[%s7006_s16 + $0x68] sm:$0xff]  ;;  %5979 = vst [vmem:[%s5902_s29 + $0xc8] sm:$0xff] %v5978_v5  ;;  %5983 = vst [vmem:[%s5902_s29 + $0xf8] sm:$0xff] %v5982_v24  ;;  %v5990_v31 = vld [vmem:[%s7006_s16 + $0x78] sm:$0xff] }
 0x444   : > { %5987 = vst [vmem:[%s5902_s29 + $0x128] sm:$0xff] %v5986_v62  ;;  %5991 = vst [vmem:[%s5902_s29 + $0x158] sm:$0xff] %v5990_v31 }
 0x445 PF: > { %s21_s23 = sadd.s32 1, %s6659_s23   ;;  %s7741_s24 = sld [smem:[#allocation5_spill]] }
 0x446   : > { %p18_p2 = scmp.ge.s32.totalorder %s21_s23, 8   ;;  %s7742_s14 = sld [smem:[#allocation6_spill]] }
 0x447   : > { %s7743_s17 = smov %s6639_s18  ;;  %s7744_s18 = smov %s6809_s13 }
 0x448   : > { %s7745_s19 = smov %s6651_s21  ;;  %s7746_s20 = smov %s6655_s22 }
 0x449   :  { %20 = sbr.rel (!%p18_p2) target bundleno = 8 (0x8), region = 210 }
 0x44b   : > { %s7747_s21 = smov %s7741_s24 }
 0x44c   : > { %s7748_s22 = smov %s7742_s14 }

</bundles_post_ra>
